<compile_context>
chip_gen: v7x
topology: tpu7x:2x2x1
jax: 0.10.0
libtpu: 0.0.40
codegen_flags: <defaults>
</compile_context>

<pallas_src>
import math
import numpy as np
import jax
import jax.numpy as jnp
from jax.experimental import pallas as pl
from jax.experimental.pallas import tpu as pltpu

# ----- Glow hyper-parameters (shapes implied by the module __init__) -----
K = 4                 # params.K flow steps
B, C, H, W = 2, 4, 16, 16
HID = 32              # params.hiddenChannels
HALF = C // 2
HW = H * W            # flattened spatial size per image (lanes)
LOGSCALE_FACTOR = 3.0  # Conv2dZeros logscale factor
LOG2PI = math.log(2.0 * math.pi)


# ============================ Pallas kernel ============================
def _shift_lanes(a, delta):
    """out[:, j] = a[:, (j + delta) mod N]. Wrap positions are masked by caller."""
    n = a.shape[1]
    d = delta % n
    if d == 0:
        return a
    return jnp.concatenate([a[:, d:], a[:, :d]], axis=1)


def _conv3x3_t(x_t, w_t, mask):
    """3x3 SAME conv in transposed layout as ONE MXU matmul.

    x_t  : (Cin, HW)       channels-on-sublanes, flattened (y*W + x) on lanes
    w_t  : (Cout, 9*Cin)   tap-major: w_t[o, t*Cin + i] = W_torch[o, i, dy, dx]
    mask : (9, HW)         1.0 where the tap's source pixel is inside the image
    """
    taps = []
    for t in range(9):
        dy, dx = t // 3, t % 3
        delta = (dy - 1) * W + (dx - 1)
        if delta == 0:
            taps.append(x_t)                                   # center tap, always valid
        else:
            taps.append(_shift_lanes(x_t, delta) * mask[t:t + 1, :])
    patches = jnp.concatenate(taps, axis=0)                    # (9*Cin, HW)
    return jnp.dot(w_t, patches, preferred_element_type=jnp.float32)


def glow_kernel(dlog_ref,                 # SMEM (K,) per-step constant logdet (actnorm + invconv)
                x_ref,                    # (C, HW)   this image's input, transposed layout
                winv_ref,                 # (K, C, C)        invconv weight (Cout, Cin)
                w1_ref,                   # (K, HID, 9*HALF) conv1 3x3
                w2_ref,                   # (K, HID, HID)    conv2 1x1
                w3_ref,                   # (K, C, 9*HID)    Conv2dZeros 3x3
                vec_ref,                  # (K, HID, 8) packed column vectors:
                                          #   [:, :C, 0]=an_bias [:, :C, 1]=an_logs
                                          #   [:, :C, 2]=b3      [:, :C, 3]=l3
                                          #   [:, :,  4]=b1      [:, :,  5]=b2
                mask_ref,                 # (9, HW) conv tap validity masks
                z_out_ref, ll_out_ref):   # outputs: latent (C, HW), likelihood (1,1,1)
    z = x_ref[...]                        # (C, HW) f32
    mask = mask_ref[...]
    logdet = jnp.zeros((1, 1), jnp.float32)

    for k in range(K):                    # K flow steps, fully unrolled
        vec = vec_ref[k]                  # (HID, 8)
        an_b, an_l = vec[:C, 0:1], vec[:C, 1:2]
        b3c, l3c = vec[:C, 2:3], vec[:C, 3:4]
        b1c, b2c = vec[:, 4:5], vec[:, 5:6]

        # ---- ActNorm2d (forward): z = (z + bias) * exp(logs) ----
        z = (z + an_b) * jnp.exp(an_l)

        # ---- Invertible 1x1 conv: channel mixing ----
        z = jnp.dot(winv_ref[k], z, preferred_element_type=jnp.float32)

        # actnorm + invconv log-determinants (constant per pixel) precomputed on host
        logdet = logdet + dlog_ref[k]

        # ---- Affine coupling ----
        z1 = z[:HALF, :]                  # (HALF, HW) passed through unchanged
        z2 = z[HALF:, :]

        h = jnp.maximum(_conv3x3_t(z1, w1_ref[k], mask) + b1c, 0.0)           # conv1 3x3 -> ReLU
        h = jnp.maximum(jnp.dot(w2_ref[k], h,
                                preferred_element_type=jnp.float32) + b2c, 0.0)  # conv2 1x1 -> ReLU
        h = (_conv3x3_t(h, w3_ref[k], mask) + b3c) * jnp.exp(l3c * LOGSCALE_FACTOR)  # Conv2dZeros

        # split_feature(h, "cross"): channels pre-permuted to [even... | odd...]
        shift = h[:HALF, :]
        spre = h[HALF:, :] + 2.0
        # numerically-stable log(sigmoid(spre)) and scale = exp(log_scale)
        m = jnp.maximum(-spre, 0.0)
        log_scale = -(m + jnp.log(jnp.exp(-m) + jnp.exp(-spre - m)))
        z2 = (z2 + shift) * jnp.exp(log_scale)
        logdet = logdet + jnp.sum(log_scale, keepdims=True)

        z = jnp.concatenate([z1, z2], axis=0)      # (C, HW), single carried value

    # ---- prior (mean=0, logs=0) + likelihood ----
    z_out_ref[...] = z
    gl = jnp.sum(-0.5 * (LOG2PI + z * z), keepdims=True)
    ll_out_ref[0] = -(logdet + gl)


# ============================ wrapper ============================
def _build_tap_mask():
    yy, xx = np.meshgrid(np.arange(H), np.arange(W), indexing='ij')
    yy = yy.reshape(-1)
    xx = xx.reshape(-1)
    m = np.zeros((9, HW), np.float32)
    for t in range(9):
        oy, ox = t // 3 - 1, t % 3 - 1
        ok = (yy + oy >= 0) & (yy + oy < H) & (xx + ox >= 0) & (xx + ox < W)
        m[t] = ok.astype(np.float32)
    return m


_TAP_MASK = _build_tap_mask()


def glow_forward_pallas(x_nhwc, p):
    # transposed activation layout: (C, B*H*W), flattened (b, y, x) row-major
    x_t = x_nhwc.astype(jnp.float32).reshape(B * HW, C).T

    # weights in (Cout, ...) orientation for the transposed layout
    winv_t = jnp.swapaxes(p['w_inv'], 1, 2)          # (K, C, C)
    w1_t = jnp.swapaxes(p['w1'], 1, 2)               # (K, HID, 9*HALF)
    w2_t = jnp.swapaxes(p['w2'], 1, 2)               # (K, HID, HID)
    w3_t = jnp.swapaxes(p['w3'], 1, 2)               # (K, C, 9*HID)

    # pack the six tiny per-step column vectors into one resident tensor
    vecs = jnp.zeros((K, HID, 8), jnp.float32)
    vecs = vecs.at[:, :C, 0].set(p['an_bias'][:, 0, :])
    vecs = vecs.at[:, :C, 1].set(p['an_logs'][:, 0, :])
    vecs = vecs.at[:, :C, 2].set(p['b3'][:, 0, :])
    vecs = vecs.at[:, :C, 3].set(p['l3'][:, 0, :])
    vecs = vecs.at[:, :, 4].set(p['b1'][:, 0, :])
    vecs = vecs.at[:, :, 5].set(p['b2'][:, 0, :])

    # per-step constant logdet: H*W*sum(actnorm logs) + H*W*slogdet(W_inv)
    dlog = p['dlog_inv'] + jnp.float32(HW) * jnp.sum(p['an_logs'], axis=(1, 2))

    mask = jnp.asarray(_TAP_MASK)

    grid_spec = pltpu.PrefetchScalarGridSpec(
        num_scalar_prefetch=1,            # dlog (K,) lives in SMEM
        grid=(B,),                        # one program per image (parallel across TCs on v7x)
        in_specs=[
            pl.BlockSpec((C, HW), lambda b, d: (0, b)),               # x_t, per-image block
            pl.BlockSpec((K, C, C), lambda b, d: (0, 0, 0)),          # invconv weights (resident)
            pl.BlockSpec((K, HID, 9 * HALF), lambda b, d: (0, 0, 0)),  # conv1 W (resident)
            pl.BlockSpec((K, HID, HID), lambda b, d: (0, 0, 0)),      # conv2 W (resident)
            pl.BlockSpec((K, C, 9 * HID), lambda b, d: (0, 0, 0)),    # conv3 W (resident)
            pl.BlockSpec((K, HID, 8), lambda b, d: (0, 0, 0)),        # packed biases/logs
            pl.BlockSpec((9, HW), lambda b, d: (0, 0)),               # tap masks
        ],
        out_specs=[
            pl.BlockSpec((C, HW), lambda b, d: (0, b)),               # latent, per-image block
            pl.BlockSpec((1, 1, 1), lambda b, d: (b, 0, 0)),          # likelihood
        ],
    )
    z_t, ll = pl.pallas_call(
        glow_kernel,
        out_shape=(jax.ShapeDtypeStruct((C, B * HW), jnp.float32),
                   jax.ShapeDtypeStruct((B, 1, 1), jnp.float32)),
        grid_spec=grid_spec,
        compiler_params=pltpu.CompilerParams(dimension_semantics=("parallel",)),
    )(dlog, x_t, winv_t, w1_t, w2_t, w3_t, vecs, mask)

    z_nhwc = z_t.T.reshape(B, H, W, C)
    return z_nhwc, ll.reshape(B)


# ============================ parameter construction ============================
def build_params(key):
    ks = jax.random.split(key, 12)

    def nrm(k_, shape, std=0.05):
        return std * jax.random.normal(k_, shape, jnp.float32)

    def conv_w(k_, cin, cout):
        # PyTorch conv weight (Cout, Cin, 3, 3) -> tap-major im2col layout (3*3*Cin, Cout)
        wt = nrm(k_, (cout, cin, 3, 3))
        return jnp.transpose(wt, (2, 3, 1, 0)).reshape(9 * cin, cout)

    an_bias = 0.1 * jax.random.normal(ks[0], (K, 1, C), jnp.float32)
    an_logs = 0.1 * jax.random.normal(ks[1], (K, 1, C), jnp.float32)

    # InvertibleConv1x1: random rotation matrices (QR of a normal sample),
    # stored in (Cin, Cout) layout for the reference einsum.
    w_inv = jnp.stack([
        jnp.linalg.qr(jax.random.normal(jax.random.fold_in(ks[2], i), (C, C), jnp.float32))[0]
        for i in range(K)])
    dlog_inv = jax.vmap(lambda m: jnp.linalg.slogdet(m)[1])(w_inv).astype(jnp.float32) * (H * W)

    w1 = jnp.stack([conv_w(jax.random.fold_in(ks[3], i), HALF, HID) for i in range(K)])
    b1 = 0.05 * jax.random.normal(ks[4], (K, 1, HID), jnp.float32)
    w2 = jnp.stack([jnp.transpose(nrm(jax.random.fold_in(ks[5], i), (HID, HID)))
                    for i in range(K)])                      # 1x1 conv: (Cin, Cout)
    b2 = 0.05 * jax.random.normal(ks[6], (K, 1, HID), jnp.float32)
    w3 = jnp.stack([conv_w(jax.random.fold_in(ks[7], i), HID, C) for i in range(K)])
    b3 = 0.05 * jax.random.normal(ks[8], (K, 1, C), jnp.float32)
    l3 = 0.05 * jax.random.normal(ks[9], (K, 1, C), jnp.float32)

    # Pre-permute conv3 output channels so split_feature(h, "cross")
    # (even channels = shift, odd channels = scale) becomes a contiguous split.
    perm = jnp.array(list(range(0, C, 2)) + list(range(1, C, 2)), dtype=jnp.int32)
    w3 = w3[:, :, perm]
    b3 = b3[:, :, perm]
    l3 = l3[:, :, perm]

    return dict(an_bias=an_bias, an_logs=an_logs, w_inv=w_inv, dlog_inv=dlog_inv,
                w1=w1, b1=b1, w2=w2, b2=b2, w3=w3, b3=b3, l3=l3)


# ============================ pure-JAX reference ============================
def _conv3x3_same_ref(x, w_flat, bias_row):
    cin = x.shape[-1]
    xp = jnp.pad(x, ((0, 0), (1, 1), (1, 1), (0, 0)))
    out = None
    for t in range(9):
        dy, dx = t // 3, t % 3
        patch = xp[:, dy:dy + H, dx:dx + W, :]
        wk = w_flat[t * cin:(t + 1) * cin]
        c = jnp.einsum('bhwi,io->bhwo', patch, wk, precision=jax.lax.Precision.HIGHEST)
        out = c if out is None else out + c
    return out + bias_row


def glow_forward_ref(x_nhwc, p):
    z = x_nhwc.astype(jnp.float32)
    logdet = jnp.zeros((B,), jnp.float32)
    for k in range(K):
        z = (z + p['an_bias'][k, 0]) * jnp.exp(p['an_logs'][k, 0])
        logdet = logdet + (H * W) * jnp.sum(p['an_logs'][k, 0])
        z = jnp.einsum('bhwi,io->bhwo', z, p['w_inv'][k], precision=jax.lax.Precision.HIGHEST)
        logdet = logdet + p['dlog_inv'][k]
        z1, z2 = z[..., :HALF], z[..., HALF:]
        h = jnp.maximum(_conv3x3_same_ref(z1, p['w1'][k], p['b1'][k, 0]), 0.0)
        h = jnp.maximum(jnp.einsum('bhwi,io->bhwo', h, p['w2'][k],
                                   precision=jax.lax.Precision.HIGHEST) + p['b2'][k, 0], 0.0)
        h = _conv3x3_same_ref(h, p['w3'][k], p['b3'][k, 0]) * jnp.exp(p['l3'][k, 0] * LOGSCALE_FACTOR)
        shift, spre = h[..., :HALF], h[..., HALF:]
        scale = jax.nn.sigmoid(spre + 2.0)
        z2 = (z2 + shift) * scale
        logdet = logdet + jnp.sum(jax.nn.log_sigmoid(spre + 2.0), axis=(1, 2, 3))
        z = jnp.concatenate([z1, z2], axis=-1)
    gl = jnp.sum(-0.5 * (LOG2PI + z * z), axis=(1, 2, 3))
    return z, -(logdet + gl)


# ============================ main ============================
if __name__ == "__main__":
    key = jax.random.PRNGKey(0)
    kx, kp = jax.random.split(key)

    # PyTorch-side input is NCHW; the kernel uses a transposed NHWC-derived layout.
    x_nchw = jax.random.normal(kx, (B, C, H, W), jnp.float32)
    x_nhwc = jnp.transpose(x_nchw, (0, 2, 3, 1))
    params = build_params(kp)

    z_nhwc, likelihood = jax.jit(glow_forward_pallas)(x_nhwc, params)
    jax.block_until_ready((z_nhwc, likelihood))

    # Sanity check against a pure-JAX reference of the same math.
    z_ref, ll_ref = glow_forward_ref(x_nhwc, params)
    np.testing.assert_allclose(np.asarray(z_nhwc), np.asarray(z_ref), rtol=2e-3, atol=2e-3)
    np.testing.assert_allclose(np.asarray(likelihood), np.asarray(ll_ref), rtol=2e-3, atol=2e-1)

    result = {
        'latent': jnp.transpose(z_nhwc, (0, 3, 1, 2)),   # back to NCHW like the module
        'likelihood': likelihood,
        'y_logits': None,                                # y_condition=False
    }
    print("KERNEL_OK")
</pallas_src>

<mosaic_0001>
module attributes {stable_mosaic.version = 11 : i64} {
  func.func @glow_kernel(%arg0: i32, %arg1: memref<4xf32, #tpu.memory_space<smem>>, %arg2: memref<4x256xf32, #tpu.memory_space<vmem>>, %arg3: memref<4x4x4xf32, #tpu.memory_space<vmem>>, %arg4: memref<4x32x18xf32, #tpu.memory_space<vmem>>, %arg5: memref<4x32x32xf32, #tpu.memory_space<vmem>>, %arg6: memref<4x4x288xf32, #tpu.memory_space<vmem>>, %arg7: memref<4x32x8xf32, #tpu.memory_space<vmem>>, %arg8: memref<9x256xf32, #tpu.memory_space<vmem>>, %arg9: memref<4x256xf32, #tpu.memory_space<vmem>>, %arg10: memref<1x1x1xf32, #tpu.memory_space<vmem>>) attributes {dimension_semantics = [#tpu.dimension_semantics<parallel>], iteration_bounds = array<i64: 2>, scalar_prefetch = 1 : i64, scratch_operands = 0 : i64, tpu.core_type = #tpu.core_type<tc>, window_params = [{transform_indices = @transform_0, window_bounds = array<i64: 4, 256>}, {pipeline_mode = #tpu.pipeline_mode<synchronous>, transform_indices = @transform_1, window_bounds = array<i64: 4, 4, 4>}, {pipeline_mode = #tpu.pipeline_mode<synchronous>, transform_indices = @transform_2, window_bounds = array<i64: 4, 32, 18>}, {pipeline_mode = #tpu.pipeline_mode<synchronous>, transform_indices = @transform_3, window_bounds = array<i64: 4, 32, 32>}, {pipeline_mode = #tpu.pipeline_mode<synchronous>, transform_indices = @transform_4, window_bounds = array<i64: 4, 4, 288>}, {pipeline_mode = #tpu.pipeline_mode<synchronous>, transform_indices = @transform_5, window_bounds = array<i64: 4, 32, 8>}, {pipeline_mode = #tpu.pipeline_mode<synchronous>, transform_indices = @transform_6, window_bounds = array<i64: 9, 256>}, {transform_indices = @transform_7, window_bounds = array<i64: 4, 256>}, {transform_indices = @transform_8, window_bounds = array<i64: 1, 1, 1>}]} {
    %c0 = arith.constant 0 : index
    %c0_0 = arith.constant 0 : index
    %0 = vector.load %arg2[%c0, %c0_0] : memref<4x256xf32, #tpu.memory_space<vmem>>, vector<4x256xf32>
    %c0_1 = arith.constant 0 : index
    %c0_2 = arith.constant 0 : index
    %1 = vector.load %arg8[%c0_1, %c0_2] : memref<9x256xf32, #tpu.memory_space<vmem>>, vector<9x256xf32>
    %cst = arith.constant 0.000000e+00 : f32
    %2 = vector.broadcast %cst : f32 to vector<1x1xf32>
    %c0_3 = arith.constant 0 : index
    %c0_4 = arith.constant 0 : index
    %c0_5 = arith.constant 0 : index
    %3 = vector.load %arg7[%c0_3, %c0_4, %c0_5] : memref<4x32x8xf32, #tpu.memory_space<vmem>>, vector<1x32x8xf32>
    %4 = vector.shape_cast %3 : vector<1x32x8xf32> to vector<32x8xf32>
    %5 = vector.extract_strided_slice %4 {offsets = [0, 0], sizes = [4, 1], strides = [1, 1]} : vector<32x8xf32> to vector<4x1xf32>
    %6 = vector.extract_strided_slice %4 {offsets = [0, 1], sizes = [4, 1], strides = [1, 1]} : vector<32x8xf32> to vector<4x1xf32>
    %7 = vector.extract_strided_slice %4 {offsets = [0, 2], sizes = [4, 1], strides = [1, 1]} : vector<32x8xf32> to vector<4x1xf32>
    %8 = vector.extract_strided_slice %4 {offsets = [0, 3], sizes = [4, 1], strides = [1, 1]} : vector<32x8xf32> to vector<4x1xf32>
    %9 = vector.extract_strided_slice %4 {offsets = [0, 4], sizes = [32, 1], strides = [1, 1]} : vector<32x8xf32> to vector<32x1xf32>
    %10 = vector.extract_strided_slice %4 {offsets = [0, 5], sizes = [32, 1], strides = [1, 1]} : vector<32x8xf32> to vector<32x1xf32>
    %11 = vector.broadcast %5 : vector<4x1xf32> to vector<4x256xf32>
    %12 = arith.addf %0, %11 : vector<4x256xf32>
    %13 = math.exp %6 : vector<4x1xf32>
    %14 = vector.broadcast %13 : vector<4x1xf32> to vector<4x256xf32>
    %15 = arith.mulf %12, %14 : vector<4x256xf32>
    %c0_6 = arith.constant 0 : index
    %c0_7 = arith.constant 0 : index
    %c0_8 = arith.constant 0 : index
    %16 = vector.load %arg3[%c0_6, %c0_7, %c0_8] : memref<4x4x4xf32, #tpu.memory_space<vmem>>, vector<1x4x4xf32>
    %17 = vector.shape_cast %16 : vector<1x4x4xf32> to vector<4x4xf32>
    %cst_9 = arith.constant dense<0.000000e+00> : vector<4x256xf32>
    %18 = tpu.matmul %17, %15, %cst_9 {dimension_numbers = #tpu.dot_dimension_numbers<[1], [0], [0], [1], [0, 0, 1, 1], [], []>} : vector<4x4xf32>, vector<4x256xf32>, vector<4x256xf32> -> vector<4x256xf32>
    %c0_10 = arith.constant 0 : index
    %19 = memref.load %arg1[%c0_10] : memref<4xf32, #tpu.memory_space<smem>>
    %20 = vector.broadcast %19 : f32 to vector<1x1xf32>
    %21 = arith.addf %2, %20 : vector<1x1xf32>
    %22 = vector.extract_strided_slice %18 {offsets = [0, 0], sizes = [2, 256], strides = [1, 1]} : vector<4x256xf32> to vector<2x256xf32>
    %23 = vector.extract_strided_slice %18 {offsets = [2, 0], sizes = [2, 256], strides = [1, 1]} : vector<4x256xf32> to vector<2x256xf32>
    %c0_11 = arith.constant 0 : index
    %c0_12 = arith.constant 0 : index
    %c0_13 = arith.constant 0 : index
    %24 = vector.load %arg4[%c0_11, %c0_12, %c0_13] : memref<4x32x18xf32, #tpu.memory_space<vmem>>, vector<1x32x18xf32>
    %25 = vector.shape_cast %24 : vector<1x32x18xf32> to vector<32x18xf32>
    %26 = vector.extract_strided_slice %22 {offsets = [0, 239], sizes = [2, 17], strides = [1, 1]} : vector<2x256xf32> to vector<2x17xf32>
    %27 = vector.extract_strided_slice %22 {offsets = [0, 0], sizes = [2, 239], strides = [1, 1]} : vector<2x256xf32> to vector<2x239xf32>
    %28 = tpu.concatenate %26, %27 in 1 : vector<2x17xf32>, vector<2x239xf32> -> vector<2x256xf32>
    %29 = vector.extract_strided_slice %1 {offsets = [0, 0], sizes = [1, 256], strides = [1, 1]} : vector<9x256xf32> to vector<1x256xf32>
    %30 = vector.broadcast %29 : vector<1x256xf32> to vector<2x256xf32>
    %31 = arith.mulf %28, %30 : vector<2x256xf32>
    %32 = vector.extract_strided_slice %22 {offsets = [0, 240], sizes = [2, 16], strides = [1, 1]} : vector<2x256xf32> to vector<2x16xf32>
    %33 = vector.extract_strided_slice %22 {offsets = [0, 0], sizes = [2, 240], strides = [1, 1]} : vector<2x256xf32> to vector<2x240xf32>
    %34 = tpu.concatenate %32, %33 in 1 : vector<2x16xf32>, vector<2x240xf32> -> vector<2x256xf32>
    %35 = vector.extract_strided_slice %1 {offsets = [1, 0], sizes = [1, 256], strides = [1, 1]} : vector<9x256xf32> to vector<1x256xf32>
    %36 = vector.broadcast %35 : vector<1x256xf32> to vector<2x256xf32>
    %37 = arith.mulf %34, %36 : vector<2x256xf32>
    %38 = vector.extract_strided_slice %22 {offsets = [0, 241], sizes = [2, 15], strides = [1, 1]} : vector<2x256xf32> to vector<2x15xf32>
    %39 = vector.extract_strided_slice %22 {offsets = [0, 0], sizes = [2, 241], strides = [1, 1]} : vector<2x256xf32> to vector<2x241xf32>
    %40 = tpu.concatenate %38, %39 in 1 : vector<2x15xf32>, vector<2x241xf32> -> vector<2x256xf32>
    %41 = vector.extract_strided_slice %1 {offsets = [2, 0], sizes = [1, 256], strides = [1, 1]} : vector<9x256xf32> to vector<1x256xf32>
    %42 = vector.broadcast %41 : vector<1x256xf32> to vector<2x256xf32>
    %43 = arith.mulf %40, %42 : vector<2x256xf32>
    %44 = vector.extract_strided_slice %22 {offsets = [0, 255], sizes = [2, 1], strides = [1, 1]} : vector<2x256xf32> to vector<2x1xf32>
    %45 = vector.extract_strided_slice %22 {offsets = [0, 0], sizes = [2, 255], strides = [1, 1]} : vector<2x256xf32> to vector<2x255xf32>
    %46 = tpu.concatenate %44, %45 in 1 : vector<2x1xf32>, vector<2x255xf32> -> vector<2x256xf32>
    %47 = vector.extract_strided_slice %1 {offsets = [3, 0], sizes = [1, 256], strides = [1, 1]} : vector<9x256xf32> to vector<1x256xf32>
    %48 = vector.broadcast %47 : vector<1x256xf32> to vector<2x256xf32>
    %49 = arith.mulf %46, %48 : vector<2x256xf32>
    %50 = vector.extract_strided_slice %22 {offsets = [0, 1], sizes = [2, 255], strides = [1, 1]} : vector<2x256xf32> to vector<2x255xf32>
    %51 = vector.extract_strided_slice %22 {offsets = [0, 0], sizes = [2, 1], strides = [1, 1]} : vector<2x256xf32> to vector<2x1xf32>
    %52 = tpu.concatenate %50, %51 in 1 : vector<2x255xf32>, vector<2x1xf32> -> vector<2x256xf32>
    %53 = vector.extract_strided_slice %1 {offsets = [5, 0], sizes = [1, 256], strides = [1, 1]} : vector<9x256xf32> to vector<1x256xf32>
    %54 = vector.broadcast %53 : vector<1x256xf32> to vector<2x256xf32>
    %55 = arith.mulf %52, %54 : vector<2x256xf32>
    %56 = vector.extract_strided_slice %22 {offsets = [0, 15], sizes = [2, 241], strides = [1, 1]} : vector<2x256xf32> to vector<2x241xf32>
    %57 = vector.extract_strided_slice %22 {offsets = [0, 0], sizes = [2, 15], strides = [1, 1]} : vector<2x256xf32> to vector<2x15xf32>
    %58 = tpu.concatenate %56, %57 in 1 : vector<2x241xf32>, vector<2x15xf32> -> vector<2x256xf32>
    %59 = vector.extract_strided_slice %1 {offsets = [6, 0], sizes = [1, 256], strides = [1, 1]} : vector<9x256xf32> to vector<1x256xf32>
    %60 = vector.broadcast %59 : vector<1x256xf32> to vector<2x256xf32>
    %61 = arith.mulf %58, %60 : vector<2x256xf32>
    %62 = vector.extract_strided_slice %22 {offsets = [0, 16], sizes = [2, 240], strides = [1, 1]} : vector<2x256xf32> to vector<2x240xf32>
    %63 = vector.extract_strided_slice %22 {offsets = [0, 0], sizes = [2, 16], strides = [1, 1]} : vector<2x256xf32> to vector<2x16xf32>
    %64 = tpu.concatenate %62, %63 in 1 : vector<2x240xf32>, vector<2x16xf32> -> vector<2x256xf32>
    %65 = vector.extract_strided_slice %1 {offsets = [7, 0], sizes = [1, 256], strides = [1, 1]} : vector<9x256xf32> to vector<1x256xf32>
    %66 = vector.broadcast %65 : vector<1x256xf32> to vector<2x256xf32>
    %67 = arith.mulf %64, %66 : vector<2x256xf32>
    %68 = vector.extract_strided_slice %22 {offsets = [0, 17], sizes = [2, 239], strides = [1, 1]} : vector<2x256xf32> to vector<2x239xf32>
    %69 = vector.extract_strided_slice %22 {offsets = [0, 0], sizes = [2, 17], strides = [1, 1]} : vector<2x256xf32> to vector<2x17xf32>
    %70 = tpu.concatenate %68, %69 in 1 : vector<2x239xf32>, vector<2x17xf32> -> vector<2x256xf32>
    %71 = vector.extract_strided_slice %1 {offsets = [8, 0], sizes = [1, 256], strides = [1, 1]} : vector<9x256xf32> to vector<1x256xf32>
    %72 = vector.broadcast %71 : vector<1x256xf32> to vector<2x256xf32>
    %73 = arith.mulf %70, %72 : vector<2x256xf32>
    %74 = tpu.concatenate %31, %37, %43, %49, %22, %55, %61, %67, %73 in 0 : vector<2x256xf32>, vector<2x256xf32>, vector<2x256xf32>, vector<2x256xf32>, vector<2x256xf32>, vector<2x256xf32>, vector<2x256xf32>, vector<2x256xf32>, vector<2x256xf32> -> vector<18x256xf32>
    %cst_14 = arith.constant dense<0.000000e+00> : vector<32x256xf32>
    %75 = tpu.matmul %25, %74, %cst_14 {dimension_numbers = #tpu.dot_dimension_numbers<[1], [0], [0], [1], [0, 0, 1, 1], [], []>} : vector<32x18xf32>, vector<18x256xf32>, vector<32x256xf32> -> vector<32x256xf32>
    %76 = vector.broadcast %9 : vector<32x1xf32> to vector<32x256xf32>
    %77 = arith.addf %75, %76 : vector<32x256xf32>
    %cst_15 = arith.constant 0.000000e+00 : f32
    %78 = vector.broadcast %cst_15 : f32 to vector<32x256xf32>
    %79 = arith.maximumf %77, %78 : vector<32x256xf32>
    %c0_16 = arith.constant 0 : index
    %c0_17 = arith.constant 0 : index
    %c0_18 = arith.constant 0 : index
    %80 = vector.load %arg5[%c0_16, %c0_17, %c0_18] : memref<4x32x32xf32, #tpu.memory_space<vmem>>, vector<1x32x32xf32>
    %81 = vector.shape_cast %80 : vector<1x32x32xf32> to vector<32x32xf32>
    %cst_19 = arith.constant dense<0.000000e+00> : vector<32x256xf32>
    %82 = tpu.matmul %81, %79, %cst_19 {dimension_numbers = #tpu.dot_dimension_numbers<[1], [0], [0], [1], [0, 0, 1, 1], [], []>} : vector<32x32xf32>, vector<32x256xf32>, vector<32x256xf32> -> vector<32x256xf32>
    %83 = vector.broadcast %10 : vector<32x1xf32> to vector<32x256xf32>
    %84 = arith.addf %82, %83 : vector<32x256xf32>
    %cst_20 = arith.constant 0.000000e+00 : f32
    %85 = vector.broadcast %cst_20 : f32 to vector<32x256xf32>
    %86 = arith.maximumf %84, %85 : vector<32x256xf32>
    %c0_21 = arith.constant 0 : index
    %c0_22 = arith.constant 0 : index
    %c0_23 = arith.constant 0 : index
    %87 = vector.load %arg6[%c0_21, %c0_22, %c0_23] : memref<4x4x288xf32, #tpu.memory_space<vmem>>, vector<1x4x288xf32>
    %88 = vector.shape_cast %87 : vector<1x4x288xf32> to vector<4x288xf32>
    %89 = vector.extract_strided_slice %86 {offsets = [0, 239], sizes = [32, 17], strides = [1, 1]} : vector<32x256xf32> to vector<32x17xf32>
    %90 = vector.extract_strided_slice %86 {offsets = [0, 0], sizes = [32, 239], strides = [1, 1]} : vector<32x256xf32> to vector<32x239xf32>
    %91 = tpu.concatenate %89, %90 in 1 : vector<32x17xf32>, vector<32x239xf32> -> vector<32x256xf32>
    %92 = vector.extract_strided_slice %1 {offsets = [0, 0], sizes = [1, 256], strides = [1, 1]} : vector<9x256xf32> to vector<1x256xf32>
    %93 = vector.broadcast %92 : vector<1x256xf32> to vector<32x256xf32>
    %94 = arith.mulf %91, %93 : vector<32x256xf32>
    %95 = vector.extract_strided_slice %86 {offsets = [0, 240], sizes = [32, 16], strides = [1, 1]} : vector<32x256xf32> to vector<32x16xf32>
    %96 = vector.extract_strided_slice %86 {offsets = [0, 0], sizes = [32, 240], strides = [1, 1]} : vector<32x256xf32> to vector<32x240xf32>
    %97 = tpu.concatenate %95, %96 in 1 : vector<32x16xf32>, vector<32x240xf32> -> vector<32x256xf32>
    %98 = vector.extract_strided_slice %1 {offsets = [1, 0], sizes = [1, 256], strides = [1, 1]} : vector<9x256xf32> to vector<1x256xf32>
    %99 = vector.broadcast %98 : vector<1x256xf32> to vector<32x256xf32>
    %100 = arith.mulf %97, %99 : vector<32x256xf32>
    %101 = vector.extract_strided_slice %86 {offsets = [0, 241], sizes = [32, 15], strides = [1, 1]} : vector<32x256xf32> to vector<32x15xf32>
    %102 = vector.extract_strided_slice %86 {offsets = [0, 0], sizes = [32, 241], strides = [1, 1]} : vector<32x256xf32> to vector<32x241xf32>
    %103 = tpu.concatenate %101, %102 in 1 : vector<32x15xf32>, vector<32x241xf32> -> vector<32x256xf32>
    %104 = vector.extract_strided_slice %1 {offsets = [2, 0], sizes = [1, 256], strides = [1, 1]} : vector<9x256xf32> to vector<1x256xf32>
    %105 = vector.broadcast %104 : vector<1x256xf32> to vector<32x256xf32>
    %106 = arith.mulf %103, %105 : vector<32x256xf32>
    %107 = vector.extract_strided_slice %86 {offsets = [0, 255], sizes = [32, 1], strides = [1, 1]} : vector<32x256xf32> to vector<32x1xf32>
    %108 = vector.extract_strided_slice %86 {offsets = [0, 0], sizes = [32, 255], strides = [1, 1]} : vector<32x256xf32> to vector<32x255xf32>
    %109 = tpu.concatenate %107, %108 in 1 : vector<32x1xf32>, vector<32x255xf32> -> vector<32x256xf32>
    %110 = vector.extract_strided_slice %1 {offsets = [3, 0], sizes = [1, 256], strides = [1, 1]} : vector<9x256xf32> to vector<1x256xf32>
    %111 = vector.broadcast %110 : vector<1x256xf32> to vector<32x256xf32>
    %112 = arith.mulf %109, %111 : vector<32x256xf32>
    %113 = vector.extract_strided_slice %86 {offsets = [0, 1], sizes = [32, 255], strides = [1, 1]} : vector<32x256xf32> to vector<32x255xf32>
    %114 = vector.extract_strided_slice %86 {offsets = [0, 0], sizes = [32, 1], strides = [1, 1]} : vector<32x256xf32> to vector<32x1xf32>
    %115 = tpu.concatenate %113, %114 in 1 : vector<32x255xf32>, vector<32x1xf32> -> vector<32x256xf32>
    %116 = vector.extract_strided_slice %1 {offsets = [5, 0], sizes = [1, 256], strides = [1, 1]} : vector<9x256xf32> to vector<1x256xf32>
    %117 = vector.broadcast %116 : vector<1x256xf32> to vector<32x256xf32>
    %118 = arith.mulf %115, %117 : vector<32x256xf32>
    %119 = vector.extract_strided_slice %86 {offsets = [0, 15], sizes = [32, 241], strides = [1, 1]} : vector<32x256xf32> to vector<32x241xf32>
    %120 = vector.extract_strided_slice %86 {offsets = [0, 0], sizes = [32, 15], strides = [1, 1]} : vector<32x256xf32> to vector<32x15xf32>
    %121 = tpu.concatenate %119, %120 in 1 : vector<32x241xf32>, vector<32x15xf32> -> vector<32x256xf32>
    %122 = vector.extract_strided_slice %1 {offsets = [6, 0], sizes = [1, 256], strides = [1, 1]} : vector<9x256xf32> to vector<1x256xf32>
    %123 = vector.broadcast %122 : vector<1x256xf32> to vector<32x256xf32>
    %124 = arith.mulf %121, %123 : vector<32x256xf32>
    %125 = vector.extract_strided_slice %86 {offsets = [0, 16], sizes = [32, 240], strides = [1, 1]} : vector<32x256xf32> to vector<32x240xf32>
    %126 = vector.extract_strided_slice %86 {offsets = [0, 0], sizes = [32, 16], strides = [1, 1]} : vector<32x256xf32> to vector<32x16xf32>
    %127 = tpu.concatenate %125, %126 in 1 : vector<32x240xf32>, vector<32x16xf32> -> vector<32x256xf32>
    %128 = vector.extract_strided_slice %1 {offsets = [7, 0], sizes = [1, 256], strides = [1, 1]} : vector<9x256xf32> to vector<1x256xf32>
    %129 = vector.broadcast %128 : vector<1x256xf32> to vector<32x256xf32>
    %130 = arith.mulf %127, %129 : vector<32x256xf32>
    %131 = vector.extract_strided_slice %86 {offsets = [0, 17], sizes = [32, 239], strides = [1, 1]} : vector<32x256xf32> to vector<32x239xf32>
    %132 = vector.extract_strided_slice %86 {offsets = [0, 0], sizes = [32, 17], strides = [1, 1]} : vector<32x256xf32> to vector<32x17xf32>
    %133 = tpu.concatenate %131, %132 in 1 : vector<32x239xf32>, vector<32x17xf32> -> vector<32x256xf32>
    %134 = vector.extract_strided_slice %1 {offsets = [8, 0], sizes = [1, 256], strides = [1, 1]} : vector<9x256xf32> to vector<1x256xf32>
    %135 = vector.broadcast %134 : vector<1x256xf32> to vector<32x256xf32>
    %136 = arith.mulf %133, %135 : vector<32x256xf32>
    %137 = tpu.concatenate %94, %100, %106, %112, %86, %118, %124, %130, %136 in 0 : vector<32x256xf32>, vector<32x256xf32>, vector<32x256xf32>, vector<32x256xf32>, vector<32x256xf32>, vector<32x256xf32>, vector<32x256xf32>, vector<32x256xf32>, vector<32x256xf32> -> vector<288x256xf32>
    %cst_24 = arith.constant dense<0.000000e+00> : vector<4x256xf32>
    %138 = tpu.matmul %88, %137, %cst_24 {dimension_numbers = #tpu.dot_dimension_numbers<[1], [0], [0], [1], [0, 0, 1, 1], [], []>} : vector<4x288xf32>, vector<288x256xf32>, vector<4x256xf32> -> vector<4x256xf32>
    %139 = vector.broadcast %7 : vector<4x1xf32> to vector<4x256xf32>
    %140 = arith.addf %138, %139 : vector<4x256xf32>
    %cst_25 = arith.constant 3.000000e+00 : f32
    %141 = vector.broadcast %cst_25 : f32 to vector<4x1xf32>
    %142 = arith.mulf %8, %141 : vector<4x1xf32>
    %143 = math.exp %142 : vector<4x1xf32>
    %144 = vector.broadcast %143 : vector<4x1xf32> to vector<4x256xf32>
    %145 = arith.mulf %140, %144 : vector<4x256xf32>
    %146 = vector.extract_strided_slice %145 {offsets = [0, 0], sizes = [2, 256], strides = [1, 1]} : vector<4x256xf32> to vector<2x256xf32>
    %147 = vector.extract_strided_slice %145 {offsets = [2, 0], sizes = [2, 256], strides = [1, 1]} : vector<4x256xf32> to vector<2x256xf32>
    %cst_26 = arith.constant 2.000000e+00 : f32
    %148 = vector.broadcast %cst_26 : f32 to vector<2x256xf32>
    %149 = arith.addf %147, %148 : vector<2x256xf32>
    %cst_27 = arith.constant 0.000000e+00 : f32
    %150 = vector.broadcast %cst_27 : f32 to vector<2x256xf32>
    %151 = arith.subf %150, %149 : vector<2x256xf32>
    %cst_28 = arith.constant 0.000000e+00 : f32
    %152 = vector.broadcast %cst_28 : f32 to vector<2x256xf32>
    %153 = arith.maximumf %151, %152 : vector<2x256xf32>
    %cst_29 = arith.constant 0.000000e+00 : f32
    %154 = vector.broadcast %cst_29 : f32 to vector<2x256xf32>
    %155 = arith.subf %154, %153 : vector<2x256xf32>
    %156 = math.exp %155 : vector<2x256xf32>
    %cst_30 = arith.constant 0.000000e+00 : f32
    %157 = vector.broadcast %cst_30 : f32 to vector<2x256xf32>
    %158 = arith.subf %157, %149 : vector<2x256xf32>
    %159 = arith.subf %158, %153 : vector<2x256xf32>
    %160 = math.exp %159 : vector<2x256xf32>
    %161 = arith.addf %156, %160 : vector<2x256xf32>
    %162 = math.log %161 : vector<2x256xf32>
    %163 = arith.addf %153, %162 : vector<2x256xf32>
    %cst_31 = arith.constant 0.000000e+00 : f32
    %164 = vector.broadcast %cst_31 : f32 to vector<2x256xf32>
    %165 = arith.subf %164, %163 : vector<2x256xf32>
    %166 = arith.addf %23, %146 : vector<2x256xf32>
    %167 = math.exp %165 : vector<2x256xf32>
    %168 = arith.mulf %166, %167 : vector<2x256xf32>
    %169 = vector.shape_cast %165 : vector<2x256xf32> to vector<1x2x256xf32>
    %cst_32 = arith.constant dense<0.000000e+00> : vector<1xf32>
    %170 = vector.multi_reduction <add>, %169, %cst_32 [1, 2] : vector<1x2x256xf32> to vector<1xf32>
    %171 = vector.shape_cast %170 : vector<1xf32> to vector<1x1x1xf32>
    %172 = vector.extract %171[0, 0, 0] : f32 from vector<1x1x1xf32>
    %173 = vector.broadcast %172 : f32 to vector<1x1xf32>
    %174 = arith.addf %21, %173 : vector<1x1xf32>
    %175 = tpu.concatenate %22, %168 in 0 : vector<2x256xf32>, vector<2x256xf32> -> vector<4x256xf32>
    %c1 = arith.constant 1 : index
    %c0_33 = arith.constant 0 : index
    %c0_34 = arith.constant 0 : index
    %176 = vector.load %arg7[%c1, %c0_33, %c0_34] : memref<4x32x8xf32, #tpu.memory_space<vmem>>, vector<1x32x8xf32>
    %177 = vector.shape_cast %176 : vector<1x32x8xf32> to vector<32x8xf32>
    %178 = vector.extract_strided_slice %177 {offsets = [0, 0], sizes = [4, 1], strides = [1, 1]} : vector<32x8xf32> to vector<4x1xf32>
    %179 = vector.extract_strided_slice %177 {offsets = [0, 1], sizes = [4, 1], strides = [1, 1]} : vector<32x8xf32> to vector<4x1xf32>
    %180 = vector.extract_strided_slice %177 {offsets = [0, 2], sizes = [4, 1], strides = [1, 1]} : vector<32x8xf32> to vector<4x1xf32>
    %181 = vector.extract_strided_slice %177 {offsets = [0, 3], sizes = [4, 1], strides = [1, 1]} : vector<32x8xf32> to vector<4x1xf32>
    %182 = vector.extract_strided_slice %177 {offsets = [0, 4], sizes = [32, 1], strides = [1, 1]} : vector<32x8xf32> to vector<32x1xf32>
    %183 = vector.extract_strided_slice %177 {offsets = [0, 5], sizes = [32, 1], strides = [1, 1]} : vector<32x8xf32> to vector<32x1xf32>
    %184 = vector.broadcast %178 : vector<4x1xf32> to vector<4x256xf32>
    %185 = arith.addf %175, %184 : vector<4x256xf32>
    %186 = math.exp %179 : vector<4x1xf32>
    %187 = vector.broadcast %186 : vector<4x1xf32> to vector<4x256xf32>
    %188 = arith.mulf %185, %187 : vector<4x256xf32>
    %c1_35 = arith.constant 1 : index
    %c0_36 = arith.constant 0 : index
    %c0_37 = arith.constant 0 : index
    %189 = vector.load %arg3[%c1_35, %c0_36, %c0_37] : memref<4x4x4xf32, #tpu.memory_space<vmem>>, vector<1x4x4xf32>
    %190 = vector.shape_cast %189 : vector<1x4x4xf32> to vector<4x4xf32>
    %cst_38 = arith.constant dense<0.000000e+00> : vector<4x256xf32>
    %191 = tpu.matmul %190, %188, %cst_38 {dimension_numbers = #tpu.dot_dimension_numbers<[1], [0], [0], [1], [0, 0, 1, 1], [], []>} : vector<4x4xf32>, vector<4x256xf32>, vector<4x256xf32> -> vector<4x256xf32>
    %c1_39 = arith.constant 1 : index
    %192 = memref.load %arg1[%c1_39] : memref<4xf32, #tpu.memory_space<smem>>
    %193 = vector.broadcast %192 : f32 to vector<1x1xf32>
    %194 = arith.addf %174, %193 : vector<1x1xf32>
    %195 = vector.extract_strided_slice %191 {offsets = [0, 0], sizes = [2, 256], strides = [1, 1]} : vector<4x256xf32> to vector<2x256xf32>
    %196 = vector.extract_strided_slice %191 {offsets = [2, 0], sizes = [2, 256], strides = [1, 1]} : vector<4x256xf32> to vector<2x256xf32>
    %c1_40 = arith.constant 1 : index
    %c0_41 = arith.constant 0 : index
    %c0_42 = arith.constant 0 : index
    %197 = vector.load %arg4[%c1_40, %c0_41, %c0_42] : memref<4x32x18xf32, #tpu.memory_space<vmem>>, vector<1x32x18xf32>
    %198 = vector.shape_cast %197 : vector<1x32x18xf32> to vector<32x18xf32>
    %199 = vector.extract_strided_slice %195 {offsets = [0, 239], sizes = [2, 17], strides = [1, 1]} : vector<2x256xf32> to vector<2x17xf32>
    %200 = vector.extract_strided_slice %195 {offsets = [0, 0], sizes = [2, 239], strides = [1, 1]} : vector<2x256xf32> to vector<2x239xf32>
    %201 = tpu.concatenate %199, %200 in 1 : vector<2x17xf32>, vector<2x239xf32> -> vector<2x256xf32>
    %202 = vector.extract_strided_slice %1 {offsets = [0, 0], sizes = [1, 256], strides = [1, 1]} : vector<9x256xf32> to vector<1x256xf32>
    %203 = vector.broadcast %202 : vector<1x256xf32> to vector<2x256xf32>
    %204 = arith.mulf %201, %203 : vector<2x256xf32>
    %205 = vector.extract_strided_slice %195 {offsets = [0, 240], sizes = [2, 16], strides = [1, 1]} : vector<2x256xf32> to vector<2x16xf32>
    %206 = vector.extract_strided_slice %195 {offsets = [0, 0], sizes = [2, 240], strides = [1, 1]} : vector<2x256xf32> to vector<2x240xf32>
    %207 = tpu.concatenate %205, %206 in 1 : vector<2x16xf32>, vector<2x240xf32> -> vector<2x256xf32>
    %208 = vector.extract_strided_slice %1 {offsets = [1, 0], sizes = [1, 256], strides = [1, 1]} : vector<9x256xf32> to vector<1x256xf32>
    %209 = vector.broadcast %208 : vector<1x256xf32> to vector<2x256xf32>
    %210 = arith.mulf %207, %209 : vector<2x256xf32>
    %211 = vector.extract_strided_slice %195 {offsets = [0, 241], sizes = [2, 15], strides = [1, 1]} : vector<2x256xf32> to vector<2x15xf32>
    %212 = vector.extract_strided_slice %195 {offsets = [0, 0], sizes = [2, 241], strides = [1, 1]} : vector<2x256xf32> to vector<2x241xf32>
    %213 = tpu.concatenate %211, %212 in 1 : vector<2x15xf32>, vector<2x241xf32> -> vector<2x256xf32>
    %214 = vector.extract_strided_slice %1 {offsets = [2, 0], sizes = [1, 256], strides = [1, 1]} : vector<9x256xf32> to vector<1x256xf32>
    %215 = vector.broadcast %214 : vector<1x256xf32> to vector<2x256xf32>
    %216 = arith.mulf %213, %215 : vector<2x256xf32>
    %217 = vector.extract_strided_slice %195 {offsets = [0, 255], sizes = [2, 1], strides = [1, 1]} : vector<2x256xf32> to vector<2x1xf32>
    %218 = vector.extract_strided_slice %195 {offsets = [0, 0], sizes = [2, 255], strides = [1, 1]} : vector<2x256xf32> to vector<2x255xf32>
    %219 = tpu.concatenate %217, %218 in 1 : vector<2x1xf32>, vector<2x255xf32> -> vector<2x256xf32>
    %220 = vector.extract_strided_slice %1 {offsets = [3, 0], sizes = [1, 256], strides = [1, 1]} : vector<9x256xf32> to vector<1x256xf32>
    %221 = vector.broadcast %220 : vector<1x256xf32> to vector<2x256xf32>
    %222 = arith.mulf %219, %221 : vector<2x256xf32>
    %223 = vector.extract_strided_slice %195 {offsets = [0, 1], sizes = [2, 255], strides = [1, 1]} : vector<2x256xf32> to vector<2x255xf32>
    %224 = vector.extract_strided_slice %195 {offsets = [0, 0], sizes = [2, 1], strides = [1, 1]} : vector<2x256xf32> to vector<2x1xf32>
    %225 = tpu.concatenate %223, %224 in 1 : vector<2x255xf32>, vector<2x1xf32> -> vector<2x256xf32>
    %226 = vector.extract_strided_slice %1 {offsets = [5, 0], sizes = [1, 256], strides = [1, 1]} : vector<9x256xf32> to vector<1x256xf32>
    %227 = vector.broadcast %226 : vector<1x256xf32> to vector<2x256xf32>
    %228 = arith.mulf %225, %227 : vector<2x256xf32>
    %229 = vector.extract_strided_slice %195 {offsets = [0, 15], sizes = [2, 241], strides = [1, 1]} : vector<2x256xf32> to vector<2x241xf32>
    %230 = vector.extract_strided_slice %195 {offsets = [0, 0], sizes = [2, 15], strides = [1, 1]} : vector<2x256xf32> to vector<2x15xf32>
    %231 = tpu.concatenate %229, %230 in 1 : vector<2x241xf32>, vector<2x15xf32> -> vector<2x256xf32>
    %232 = vector.extract_strided_slice %1 {offsets = [6, 0], sizes = [1, 256], strides = [1, 1]} : vector<9x256xf32> to vector<1x256xf32>
    %233 = vector.broadcast %232 : vector<1x256xf32> to vector<2x256xf32>
    %234 = arith.mulf %231, %233 : vector<2x256xf32>
    %235 = vector.extract_strided_slice %195 {offsets = [0, 16], sizes = [2, 240], strides = [1, 1]} : vector<2x256xf32> to vector<2x240xf32>
    %236 = vector.extract_strided_slice %195 {offsets = [0, 0], sizes = [2, 16], strides = [1, 1]} : vector<2x256xf32> to vector<2x16xf32>
    %237 = tpu.concatenate %235, %236 in 1 : vector<2x240xf32>, vector<2x16xf32> -> vector<2x256xf32>
    %238 = vector.extract_strided_slice %1 {offsets = [7, 0], sizes = [1, 256], strides = [1, 1]} : vector<9x256xf32> to vector<1x256xf32>
    %239 = vector.broadcast %238 : vector<1x256xf32> to vector<2x256xf32>
    %240 = arith.mulf %237, %239 : vector<2x256xf32>
    %241 = vector.extract_strided_slice %195 {offsets = [0, 17], sizes = [2, 239], strides = [1, 1]} : vector<2x256xf32> to vector<2x239xf32>
    %242 = vector.extract_strided_slice %195 {offsets = [0, 0], sizes = [2, 17], strides = [1, 1]} : vector<2x256xf32> to vector<2x17xf32>
    %243 = tpu.concatenate %241, %242 in 1 : vector<2x239xf32>, vector<2x17xf32> -> vector<2x256xf32>
    %244 = vector.extract_strided_slice %1 {offsets = [8, 0], sizes = [1, 256], strides = [1, 1]} : vector<9x256xf32> to vector<1x256xf32>
    %245 = vector.broadcast %244 : vector<1x256xf32> to vector<2x256xf32>
    %246 = arith.mulf %243, %245 : vector<2x256xf32>
    %247 = tpu.concatenate %204, %210, %216, %222, %195, %228, %234, %240, %246 in 0 : vector<2x256xf32>, vector<2x256xf32>, vector<2x256xf32>, vector<2x256xf32>, vector<2x256xf32>, vector<2x256xf32>, vector<2x256xf32>, vector<2x256xf32>, vector<2x256xf32> -> vector<18x256xf32>
    %cst_43 = arith.constant dense<0.000000e+00> : vector<32x256xf32>
    %248 = tpu.matmul %198, %247, %cst_43 {dimension_numbers = #tpu.dot_dimension_numbers<[1], [0], [0], [1], [0, 0, 1, 1], [], []>} : vector<32x18xf32>, vector<18x256xf32>, vector<32x256xf32> -> vector<32x256xf32>
    %249 = vector.broadcast %182 : vector<32x1xf32> to vector<32x256xf32>
    %250 = arith.addf %248, %249 : vector<32x256xf32>
    %cst_44 = arith.constant 0.000000e+00 : f32
    %251 = vector.broadcast %cst_44 : f32 to vector<32x256xf32>
    %252 = arith.maximumf %250, %251 : vector<32x256xf32>
    %c1_45 = arith.constant 1 : index
    %c0_46 = arith.constant 0 : index
    %c0_47 = arith.constant 0 : index
    %253 = vector.load %arg5[%c1_45, %c0_46, %c0_47] : memref<4x32x32xf32, #tpu.memory_space<vmem>>, vector<1x32x32xf32>
    %254 = vector.shape_cast %253 : vector<1x32x32xf32> to vector<32x32xf32>
    %cst_48 = arith.constant dense<0.000000e+00> : vector<32x256xf32>
    %255 = tpu.matmul %254, %252, %cst_48 {dimension_numbers = #tpu.dot_dimension_numbers<[1], [0], [0], [1], [0, 0, 1, 1], [], []>} : vector<32x32xf32>, vector<32x256xf32>, vector<32x256xf32> -> vector<32x256xf32>
    %256 = vector.broadcast %183 : vector<32x1xf32> to vector<32x256xf32>
    %257 = arith.addf %255, %256 : vector<32x256xf32>
    %cst_49 = arith.constant 0.000000e+00 : f32
    %258 = vector.broadcast %cst_49 : f32 to vector<32x256xf32>
    %259 = arith.maximumf %257, %258 : vector<32x256xf32>
    %c1_50 = arith.constant 1 : index
    %c0_51 = arith.constant 0 : index
    %c0_52 = arith.constant 0 : index
    %260 = vector.load %arg6[%c1_50, %c0_51, %c0_52] : memref<4x4x288xf32, #tpu.memory_space<vmem>>, vector<1x4x288xf32>
    %261 = vector.shape_cast %260 : vector<1x4x288xf32> to vector<4x288xf32>
    %262 = vector.extract_strided_slice %259 {offsets = [0, 239], sizes = [32, 17], strides = [1, 1]} : vector<32x256xf32> to vector<32x17xf32>
    %263 = vector.extract_strided_slice %259 {offsets = [0, 0], sizes = [32, 239], strides = [1, 1]} : vector<32x256xf32> to vector<32x239xf32>
    %264 = tpu.concatenate %262, %263 in 1 : vector<32x17xf32>, vector<32x239xf32> -> vector<32x256xf32>
    %265 = vector.extract_strided_slice %1 {offsets = [0, 0], sizes = [1, 256], strides = [1, 1]} : vector<9x256xf32> to vector<1x256xf32>
    %266 = vector.broadcast %265 : vector<1x256xf32> to vector<32x256xf32>
    %267 = arith.mulf %264, %266 : vector<32x256xf32>
    %268 = vector.extract_strided_slice %259 {offsets = [0, 240], sizes = [32, 16], strides = [1, 1]} : vector<32x256xf32> to vector<32x16xf32>
    %269 = vector.extract_strided_slice %259 {offsets = [0, 0], sizes = [32, 240], strides = [1, 1]} : vector<32x256xf32> to vector<32x240xf32>
    %270 = tpu.concatenate %268, %269 in 1 : vector<32x16xf32>, vector<32x240xf32> -> vector<32x256xf32>
    %271 = vector.extract_strided_slice %1 {offsets = [1, 0], sizes = [1, 256], strides = [1, 1]} : vector<9x256xf32> to vector<1x256xf32>
    %272 = vector.broadcast %271 : vector<1x256xf32> to vector<32x256xf32>
    %273 = arith.mulf %270, %272 : vector<32x256xf32>
    %274 = vector.extract_strided_slice %259 {offsets = [0, 241], sizes = [32, 15], strides = [1, 1]} : vector<32x256xf32> to vector<32x15xf32>
    %275 = vector.extract_strided_slice %259 {offsets = [0, 0], sizes = [32, 241], strides = [1, 1]} : vector<32x256xf32> to vector<32x241xf32>
    %276 = tpu.concatenate %274, %275 in 1 : vector<32x15xf32>, vector<32x241xf32> -> vector<32x256xf32>
    %277 = vector.extract_strided_slice %1 {offsets = [2, 0], sizes = [1, 256], strides = [1, 1]} : vector<9x256xf32> to vector<1x256xf32>
    %278 = vector.broadcast %277 : vector<1x256xf32> to vector<32x256xf32>
    %279 = arith.mulf %276, %278 : vector<32x256xf32>
    %280 = vector.extract_strided_slice %259 {offsets = [0, 255], sizes = [32, 1], strides = [1, 1]} : vector<32x256xf32> to vector<32x1xf32>
    %281 = vector.extract_strided_slice %259 {offsets = [0, 0], sizes = [32, 255], strides = [1, 1]} : vector<32x256xf32> to vector<32x255xf32>
    %282 = tpu.concatenate %280, %281 in 1 : vector<32x1xf32>, vector<32x255xf32> -> vector<32x256xf32>
    %283 = vector.extract_strided_slice %1 {offsets = [3, 0], sizes = [1, 256], strides = [1, 1]} : vector<9x256xf32> to vector<1x256xf32>
    %284 = vector.broadcast %283 : vector<1x256xf32> to vector<32x256xf32>
    %285 = arith.mulf %282, %284 : vector<32x256xf32>
    %286 = vector.extract_strided_slice %259 {offsets = [0, 1], sizes = [32, 255], strides = [1, 1]} : vector<32x256xf32> to vector<32x255xf32>
    %287 = vector.extract_strided_slice %259 {offsets = [0, 0], sizes = [32, 1], strides = [1, 1]} : vector<32x256xf32> to vector<32x1xf32>
    %288 = tpu.concatenate %286, %287 in 1 : vector<32x255xf32>, vector<32x1xf32> -> vector<32x256xf32>
    %289 = vector.extract_strided_slice %1 {offsets = [5, 0], sizes = [1, 256], strides = [1, 1]} : vector<9x256xf32> to vector<1x256xf32>
    %290 = vector.broadcast %289 : vector<1x256xf32> to vector<32x256xf32>
    %291 = arith.mulf %288, %290 : vector<32x256xf32>
    %292 = vector.extract_strided_slice %259 {offsets = [0, 15], sizes = [32, 241], strides = [1, 1]} : vector<32x256xf32> to vector<32x241xf32>
    %293 = vector.extract_strided_slice %259 {offsets = [0, 0], sizes = [32, 15], strides = [1, 1]} : vector<32x256xf32> to vector<32x15xf32>
    %294 = tpu.concatenate %292, %293 in 1 : vector<32x241xf32>, vector<32x15xf32> -> vector<32x256xf32>
    %295 = vector.extract_strided_slice %1 {offsets = [6, 0], sizes = [1, 256], strides = [1, 1]} : vector<9x256xf32> to vector<1x256xf32>
    %296 = vector.broadcast %295 : vector<1x256xf32> to vector<32x256xf32>
    %297 = arith.mulf %294, %296 : vector<32x256xf32>
    %298 = vector.extract_strided_slice %259 {offsets = [0, 16], sizes = [32, 240], strides = [1, 1]} : vector<32x256xf32> to vector<32x240xf32>
    %299 = vector.extract_strided_slice %259 {offsets = [0, 0], sizes = [32, 16], strides = [1, 1]} : vector<32x256xf32> to vector<32x16xf32>
    %300 = tpu.concatenate %298, %299 in 1 : vector<32x240xf32>, vector<32x16xf32> -> vector<32x256xf32>
    %301 = vector.extract_strided_slice %1 {offsets = [7, 0], sizes = [1, 256], strides = [1, 1]} : vector<9x256xf32> to vector<1x256xf32>
    %302 = vector.broadcast %301 : vector<1x256xf32> to vector<32x256xf32>
    %303 = arith.mulf %300, %302 : vector<32x256xf32>
    %304 = vector.extract_strided_slice %259 {offsets = [0, 17], sizes = [32, 239], strides = [1, 1]} : vector<32x256xf32> to vector<32x239xf32>
    %305 = vector.extract_strided_slice %259 {offsets = [0, 0], sizes = [32, 17], strides = [1, 1]} : vector<32x256xf32> to vector<32x17xf32>
    %306 = tpu.concatenate %304, %305 in 1 : vector<32x239xf32>, vector<32x17xf32> -> vector<32x256xf32>
    %307 = vector.extract_strided_slice %1 {offsets = [8, 0], sizes = [1, 256], strides = [1, 1]} : vector<9x256xf32> to vector<1x256xf32>
    %308 = vector.broadcast %307 : vector<1x256xf32> to vector<32x256xf32>
    %309 = arith.mulf %306, %308 : vector<32x256xf32>
    %310 = tpu.concatenate %267, %273, %279, %285, %259, %291, %297, %303, %309 in 0 : vector<32x256xf32>, vector<32x256xf32>, vector<32x256xf32>, vector<32x256xf32>, vector<32x256xf32>, vector<32x256xf32>, vector<32x256xf32>, vector<32x256xf32>, vector<32x256xf32> -> vector<288x256xf32>
    %cst_53 = arith.constant dense<0.000000e+00> : vector<4x256xf32>
    %311 = tpu.matmul %261, %310, %cst_53 {dimension_numbers = #tpu.dot_dimension_numbers<[1], [0], [0], [1], [0, 0, 1, 1], [], []>} : vector<4x288xf32>, vector<288x256xf32>, vector<4x256xf32> -> vector<4x256xf32>
    %312 = vector.broadcast %180 : vector<4x1xf32> to vector<4x256xf32>
    %313 = arith.addf %311, %312 : vector<4x256xf32>
    %cst_54 = arith.constant 3.000000e+00 : f32
    %314 = vector.broadcast %cst_54 : f32 to vector<4x1xf32>
    %315 = arith.mulf %181, %314 : vector<4x1xf32>
    %316 = math.exp %315 : vector<4x1xf32>
    %317 = vector.broadcast %316 : vector<4x1xf32> to vector<4x256xf32>
    %318 = arith.mulf %313, %317 : vector<4x256xf32>
    %319 = vector.extract_strided_slice %318 {offsets = [0, 0], sizes = [2, 256], strides = [1, 1]} : vector<4x256xf32> to vector<2x256xf32>
    %320 = vector.extract_strided_slice %318 {offsets = [2, 0], sizes = [2, 256], strides = [1, 1]} : vector<4x256xf32> to vector<2x256xf32>
    %cst_55 = arith.constant 2.000000e+00 : f32
    %321 = vector.broadcast %cst_55 : f32 to vector<2x256xf32>
    %322 = arith.addf %320, %321 : vector<2x256xf32>
    %cst_56 = arith.constant 0.000000e+00 : f32
    %323 = vector.broadcast %cst_56 : f32 to vector<2x256xf32>
    %324 = arith.subf %323, %322 : vector<2x256xf32>
    %cst_57 = arith.constant 0.000000e+00 : f32
    %325 = vector.broadcast %cst_57 : f32 to vector<2x256xf32>
    %326 = arith.maximumf %324, %325 : vector<2x256xf32>
    %cst_58 = arith.constant 0.000000e+00 : f32
    %327 = vector.broadcast %cst_58 : f32 to vector<2x256xf32>
    %328 = arith.subf %327, %326 : vector<2x256xf32>
    %329 = math.exp %328 : vector<2x256xf32>
    %cst_59 = arith.constant 0.000000e+00 : f32
    %330 = vector.broadcast %cst_59 : f32 to vector<2x256xf32>
    %331 = arith.subf %330, %322 : vector<2x256xf32>
    %332 = arith.subf %331, %326 : vector<2x256xf32>
    %333 = math.exp %332 : vector<2x256xf32>
    %334 = arith.addf %329, %333 : vector<2x256xf32>
    %335 = math.log %334 : vector<2x256xf32>
    %336 = arith.addf %326, %335 : vector<2x256xf32>
    %cst_60 = arith.constant 0.000000e+00 : f32
    %337 = vector.broadcast %cst_60 : f32 to vector<2x256xf32>
    %338 = arith.subf %337, %336 : vector<2x256xf32>
    %339 = arith.addf %196, %319 : vector<2x256xf32>
    %340 = math.exp %338 : vector<2x256xf32>
    %341 = arith.mulf %339, %340 : vector<2x256xf32>
    %342 = vector.shape_cast %338 : vector<2x256xf32> to vector<1x2x256xf32>
    %cst_61 = arith.constant dense<0.000000e+00> : vector<1xf32>
    %343 = vector.multi_reduction <add>, %342, %cst_61 [1, 2] : vector<1x2x256xf32> to vector<1xf32>
    %344 = vector.shape_cast %343 : vector<1xf32> to vector<1x1x1xf32>
    %345 = vector.extract %344[0, 0, 0] : f32 from vector<1x1x1xf32>
    %346 = vector.broadcast %345 : f32 to vector<1x1xf32>
    %347 = arith.addf %194, %346 : vector<1x1xf32>
    %348 = tpu.concatenate %195, %341 in 0 : vector<2x256xf32>, vector<2x256xf32> -> vector<4x256xf32>
    %c2 = arith.constant 2 : index
    %c0_62 = arith.constant 0 : index
    %c0_63 = arith.constant 0 : index
    %349 = vector.load %arg7[%c2, %c0_62, %c0_63] : memref<4x32x8xf32, #tpu.memory_space<vmem>>, vector<1x32x8xf32>
    %350 = vector.shape_cast %349 : vector<1x32x8xf32> to vector<32x8xf32>
    %351 = vector.extract_strided_slice %350 {offsets = [0, 0], sizes = [4, 1], strides = [1, 1]} : vector<32x8xf32> to vector<4x1xf32>
    %352 = vector.extract_strided_slice %350 {offsets = [0, 1], sizes = [4, 1], strides = [1, 1]} : vector<32x8xf32> to vector<4x1xf32>
    %353 = vector.extract_strided_slice %350 {offsets = [0, 2], sizes = [4, 1], strides = [1, 1]} : vector<32x8xf32> to vector<4x1xf32>
    %354 = vector.extract_strided_slice %350 {offsets = [0, 3], sizes = [4, 1], strides = [1, 1]} : vector<32x8xf32> to vector<4x1xf32>
    %355 = vector.extract_strided_slice %350 {offsets = [0, 4], sizes = [32, 1], strides = [1, 1]} : vector<32x8xf32> to vector<32x1xf32>
    %356 = vector.extract_strided_slice %350 {offsets = [0, 5], sizes = [32, 1], strides = [1, 1]} : vector<32x8xf32> to vector<32x1xf32>
    %357 = vector.broadcast %351 : vector<4x1xf32> to vector<4x256xf32>
    %358 = arith.addf %348, %357 : vector<4x256xf32>
    %359 = math.exp %352 : vector<4x1xf32>
    %360 = vector.broadcast %359 : vector<4x1xf32> to vector<4x256xf32>
    %361 = arith.mulf %358, %360 : vector<4x256xf32>
    %c2_64 = arith.constant 2 : index
    %c0_65 = arith.constant 0 : index
    %c0_66 = arith.constant 0 : index
    %362 = vector.load %arg3[%c2_64, %c0_65, %c0_66] : memref<4x4x4xf32, #tpu.memory_space<vmem>>, vector<1x4x4xf32>
    %363 = vector.shape_cast %362 : vector<1x4x4xf32> to vector<4x4xf32>
    %cst_67 = arith.constant dense<0.000000e+00> : vector<4x256xf32>
    %364 = tpu.matmul %363, %361, %cst_67 {dimension_numbers = #tpu.dot_dimension_numbers<[1], [0], [0], [1], [0, 0, 1, 1], [], []>} : vector<4x4xf32>, vector<4x256xf32>, vector<4x256xf32> -> vector<4x256xf32>
    %c2_68 = arith.constant 2 : index
    %365 = memref.load %arg1[%c2_68] : memref<4xf32, #tpu.memory_space<smem>>
    %366 = vector.broadcast %365 : f32 to vector<1x1xf32>
    %367 = arith.addf %347, %366 : vector<1x1xf32>
    %368 = vector.extract_strided_slice %364 {offsets = [0, 0], sizes = [2, 256], strides = [1, 1]} : vector<4x256xf32> to vector<2x256xf32>
    %369 = vector.extract_strided_slice %364 {offsets = [2, 0], sizes = [2, 256], strides = [1, 1]} : vector<4x256xf32> to vector<2x256xf32>
    %c2_69 = arith.constant 2 : index
    %c0_70 = arith.constant 0 : index
    %c0_71 = arith.constant 0 : index
    %370 = vector.load %arg4[%c2_69, %c0_70, %c0_71] : memref<4x32x18xf32, #tpu.memory_space<vmem>>, vector<1x32x18xf32>
    %371 = vector.shape_cast %370 : vector<1x32x18xf32> to vector<32x18xf32>
    %372 = vector.extract_strided_slice %368 {offsets = [0, 239], sizes = [2, 17], strides = [1, 1]} : vector<2x256xf32> to vector<2x17xf32>
    %373 = vector.extract_strided_slice %368 {offsets = [0, 0], sizes = [2, 239], strides = [1, 1]} : vector<2x256xf32> to vector<2x239xf32>
    %374 = tpu.concatenate %372, %373 in 1 : vector<2x17xf32>, vector<2x239xf32> -> vector<2x256xf32>
    %375 = vector.extract_strided_slice %1 {offsets = [0, 0], sizes = [1, 256], strides = [1, 1]} : vector<9x256xf32> to vector<1x256xf32>
    %376 = vector.broadcast %375 : vector<1x256xf32> to vector<2x256xf32>
    %377 = arith.mulf %374, %376 : vector<2x256xf32>
    %378 = vector.extract_strided_slice %368 {offsets = [0, 240], sizes = [2, 16], strides = [1, 1]} : vector<2x256xf32> to vector<2x16xf32>
    %379 = vector.extract_strided_slice %368 {offsets = [0, 0], sizes = [2, 240], strides = [1, 1]} : vector<2x256xf32> to vector<2x240xf32>
    %380 = tpu.concatenate %378, %379 in 1 : vector<2x16xf32>, vector<2x240xf32> -> vector<2x256xf32>
    %381 = vector.extract_strided_slice %1 {offsets = [1, 0], sizes = [1, 256], strides = [1, 1]} : vector<9x256xf32> to vector<1x256xf32>
    %382 = vector.broadcast %381 : vector<1x256xf32> to vector<2x256xf32>
    %383 = arith.mulf %380, %382 : vector<2x256xf32>
    %384 = vector.extract_strided_slice %368 {offsets = [0, 241], sizes = [2, 15], strides = [1, 1]} : vector<2x256xf32> to vector<2x15xf32>
    %385 = vector.extract_strided_slice %368 {offsets = [0, 0], sizes = [2, 241], strides = [1, 1]} : vector<2x256xf32> to vector<2x241xf32>
    %386 = tpu.concatenate %384, %385 in 1 : vector<2x15xf32>, vector<2x241xf32> -> vector<2x256xf32>
    %387 = vector.extract_strided_slice %1 {offsets = [2, 0], sizes = [1, 256], strides = [1, 1]} : vector<9x256xf32> to vector<1x256xf32>
    %388 = vector.broadcast %387 : vector<1x256xf32> to vector<2x256xf32>
    %389 = arith.mulf %386, %388 : vector<2x256xf32>
    %390 = vector.extract_strided_slice %368 {offsets = [0, 255], sizes = [2, 1], strides = [1, 1]} : vector<2x256xf32> to vector<2x1xf32>
    %391 = vector.extract_strided_slice %368 {offsets = [0, 0], sizes = [2, 255], strides = [1, 1]} : vector<2x256xf32> to vector<2x255xf32>
    %392 = tpu.concatenate %390, %391 in 1 : vector<2x1xf32>, vector<2x255xf32> -> vector<2x256xf32>
    %393 = vector.extract_strided_slice %1 {offsets = [3, 0], sizes = [1, 256], strides = [1, 1]} : vector<9x256xf32> to vector<1x256xf32>
    %394 = vector.broadcast %393 : vector<1x256xf32> to vector<2x256xf32>
    %395 = arith.mulf %392, %394 : vector<2x256xf32>
    %396 = vector.extract_strided_slice %368 {offsets = [0, 1], sizes = [2, 255], strides = [1, 1]} : vector<2x256xf32> to vector<2x255xf32>
    %397 = vector.extract_strided_slice %368 {offsets = [0, 0], sizes = [2, 1], strides = [1, 1]} : vector<2x256xf32> to vector<2x1xf32>
    %398 = tpu.concatenate %396, %397 in 1 : vector<2x255xf32>, vector<2x1xf32> -> vector<2x256xf32>
    %399 = vector.extract_strided_slice %1 {offsets = [5, 0], sizes = [1, 256], strides = [1, 1]} : vector<9x256xf32> to vector<1x256xf32>
    %400 = vector.broadcast %399 : vector<1x256xf32> to vector<2x256xf32>
    %401 = arith.mulf %398, %400 : vector<2x256xf32>
    %402 = vector.extract_strided_slice %368 {offsets = [0, 15], sizes = [2, 241], strides = [1, 1]} : vector<2x256xf32> to vector<2x241xf32>
    %403 = vector.extract_strided_slice %368 {offsets = [0, 0], sizes = [2, 15], strides = [1, 1]} : vector<2x256xf32> to vector<2x15xf32>
    %404 = tpu.concatenate %402, %403 in 1 : vector<2x241xf32>, vector<2x15xf32> -> vector<2x256xf32>
    %405 = vector.extract_strided_slice %1 {offsets = [6, 0], sizes = [1, 256], strides = [1, 1]} : vector<9x256xf32> to vector<1x256xf32>
    %406 = vector.broadcast %405 : vector<1x256xf32> to vector<2x256xf32>
    %407 = arith.mulf %404, %406 : vector<2x256xf32>
    %408 = vector.extract_strided_slice %368 {offsets = [0, 16], sizes = [2, 240], strides = [1, 1]} : vector<2x256xf32> to vector<2x240xf32>
    %409 = vector.extract_strided_slice %368 {offsets = [0, 0], sizes = [2, 16], strides = [1, 1]} : vector<2x256xf32> to vector<2x16xf32>
    %410 = tpu.concatenate %408, %409 in 1 : vector<2x240xf32>, vector<2x16xf32> -> vector<2x256xf32>
    %411 = vector.extract_strided_slice %1 {offsets = [7, 0], sizes = [1, 256], strides = [1, 1]} : vector<9x256xf32> to vector<1x256xf32>
    %412 = vector.broadcast %411 : vector<1x256xf32> to vector<2x256xf32>
    %413 = arith.mulf %410, %412 : vector<2x256xf32>
    %414 = vector.extract_strided_slice %368 {offsets = [0, 17], sizes = [2, 239], strides = [1, 1]} : vector<2x256xf32> to vector<2x239xf32>
    %415 = vector.extract_strided_slice %368 {offsets = [0, 0], sizes = [2, 17], strides = [1, 1]} : vector<2x256xf32> to vector<2x17xf32>
    %416 = tpu.concatenate %414, %415 in 1 : vector<2x239xf32>, vector<2x17xf32> -> vector<2x256xf32>
    %417 = vector.extract_strided_slice %1 {offsets = [8, 0], sizes = [1, 256], strides = [1, 1]} : vector<9x256xf32> to vector<1x256xf32>
    %418 = vector.broadcast %417 : vector<1x256xf32> to vector<2x256xf32>
    %419 = arith.mulf %416, %418 : vector<2x256xf32>
    %420 = tpu.concatenate %377, %383, %389, %395, %368, %401, %407, %413, %419 in 0 : vector<2x256xf32>, vector<2x256xf32>, vector<2x256xf32>, vector<2x256xf32>, vector<2x256xf32>, vector<2x256xf32>, vector<2x256xf32>, vector<2x256xf32>, vector<2x256xf32> -> vector<18x256xf32>
    %cst_72 = arith.constant dense<0.000000e+00> : vector<32x256xf32>
    %421 = tpu.matmul %371, %420, %cst_72 {dimension_numbers = #tpu.dot_dimension_numbers<[1], [0], [0], [1], [0, 0, 1, 1], [], []>} : vector<32x18xf32>, vector<18x256xf32>, vector<32x256xf32> -> vector<32x256xf32>
    %422 = vector.broadcast %355 : vector<32x1xf32> to vector<32x256xf32>
    %423 = arith.addf %421, %422 : vector<32x256xf32>
    %cst_73 = arith.constant 0.000000e+00 : f32
    %424 = vector.broadcast %cst_73 : f32 to vector<32x256xf32>
    %425 = arith.maximumf %423, %424 : vector<32x256xf32>
    %c2_74 = arith.constant 2 : index
    %c0_75 = arith.constant 0 : index
    %c0_76 = arith.constant 0 : index
    %426 = vector.load %arg5[%c2_74, %c0_75, %c0_76] : memref<4x32x32xf32, #tpu.memory_space<vmem>>, vector<1x32x32xf32>
    %427 = vector.shape_cast %426 : vector<1x32x32xf32> to vector<32x32xf32>
    %cst_77 = arith.constant dense<0.000000e+00> : vector<32x256xf32>
    %428 = tpu.matmul %427, %425, %cst_77 {dimension_numbers = #tpu.dot_dimension_numbers<[1], [0], [0], [1], [0, 0, 1, 1], [], []>} : vector<32x32xf32>, vector<32x256xf32>, vector<32x256xf32> -> vector<32x256xf32>
    %429 = vector.broadcast %356 : vector<32x1xf32> to vector<32x256xf32>
    %430 = arith.addf %428, %429 : vector<32x256xf32>
    %cst_78 = arith.constant 0.000000e+00 : f32
    %431 = vector.broadcast %cst_78 : f32 to vector<32x256xf32>
    %432 = arith.maximumf %430, %431 : vector<32x256xf32>
    %c2_79 = arith.constant 2 : index
    %c0_80 = arith.constant 0 : index
    %c0_81 = arith.constant 0 : index
    %433 = vector.load %arg6[%c2_79, %c0_80, %c0_81] : memref<4x4x288xf32, #tpu.memory_space<vmem>>, vector<1x4x288xf32>
    %434 = vector.shape_cast %433 : vector<1x4x288xf32> to vector<4x288xf32>
    %435 = vector.extract_strided_slice %432 {offsets = [0, 239], sizes = [32, 17], strides = [1, 1]} : vector<32x256xf32> to vector<32x17xf32>
    %436 = vector.extract_strided_slice %432 {offsets = [0, 0], sizes = [32, 239], strides = [1, 1]} : vector<32x256xf32> to vector<32x239xf32>
    %437 = tpu.concatenate %435, %436 in 1 : vector<32x17xf32>, vector<32x239xf32> -> vector<32x256xf32>
    %438 = vector.extract_strided_slice %1 {offsets = [0, 0], sizes = [1, 256], strides = [1, 1]} : vector<9x256xf32> to vector<1x256xf32>
    %439 = vector.broadcast %438 : vector<1x256xf32> to vector<32x256xf32>
    %440 = arith.mulf %437, %439 : vector<32x256xf32>
    %441 = vector.extract_strided_slice %432 {offsets = [0, 240], sizes = [32, 16], strides = [1, 1]} : vector<32x256xf32> to vector<32x16xf32>
    %442 = vector.extract_strided_slice %432 {offsets = [0, 0], sizes = [32, 240], strides = [1, 1]} : vector<32x256xf32> to vector<32x240xf32>
    %443 = tpu.concatenate %441, %442 in 1 : vector<32x16xf32>, vector<32x240xf32> -> vector<32x256xf32>
    %444 = vector.extract_strided_slice %1 {offsets = [1, 0], sizes = [1, 256], strides = [1, 1]} : vector<9x256xf32> to vector<1x256xf32>
    %445 = vector.broadcast %444 : vector<1x256xf32> to vector<32x256xf32>
    %446 = arith.mulf %443, %445 : vector<32x256xf32>
    %447 = vector.extract_strided_slice %432 {offsets = [0, 241], sizes = [32, 15], strides = [1, 1]} : vector<32x256xf32> to vector<32x15xf32>
    %448 = vector.extract_strided_slice %432 {offsets = [0, 0], sizes = [32, 241], strides = [1, 1]} : vector<32x256xf32> to vector<32x241xf32>
    %449 = tpu.concatenate %447, %448 in 1 : vector<32x15xf32>, vector<32x241xf32> -> vector<32x256xf32>
    %450 = vector.extract_strided_slice %1 {offsets = [2, 0], sizes = [1, 256], strides = [1, 1]} : vector<9x256xf32> to vector<1x256xf32>
    %451 = vector.broadcast %450 : vector<1x256xf32> to vector<32x256xf32>
    %452 = arith.mulf %449, %451 : vector<32x256xf32>
    %453 = vector.extract_strided_slice %432 {offsets = [0, 255], sizes = [32, 1], strides = [1, 1]} : vector<32x256xf32> to vector<32x1xf32>
    %454 = vector.extract_strided_slice %432 {offsets = [0, 0], sizes = [32, 255], strides = [1, 1]} : vector<32x256xf32> to vector<32x255xf32>
    %455 = tpu.concatenate %453, %454 in 1 : vector<32x1xf32>, vector<32x255xf32> -> vector<32x256xf32>
    %456 = vector.extract_strided_slice %1 {offsets = [3, 0], sizes = [1, 256], strides = [1, 1]} : vector<9x256xf32> to vector<1x256xf32>
    %457 = vector.broadcast %456 : vector<1x256xf32> to vector<32x256xf32>
    %458 = arith.mulf %455, %457 : vector<32x256xf32>
    %459 = vector.extract_strided_slice %432 {offsets = [0, 1], sizes = [32, 255], strides = [1, 1]} : vector<32x256xf32> to vector<32x255xf32>
    %460 = vector.extract_strided_slice %432 {offsets = [0, 0], sizes = [32, 1], strides = [1, 1]} : vector<32x256xf32> to vector<32x1xf32>
    %461 = tpu.concatenate %459, %460 in 1 : vector<32x255xf32>, vector<32x1xf32> -> vector<32x256xf32>
    %462 = vector.extract_strided_slice %1 {offsets = [5, 0], sizes = [1, 256], strides = [1, 1]} : vector<9x256xf32> to vector<1x256xf32>
    %463 = vector.broadcast %462 : vector<1x256xf32> to vector<32x256xf32>
    %464 = arith.mulf %461, %463 : vector<32x256xf32>
    %465 = vector.extract_strided_slice %432 {offsets = [0, 15], sizes = [32, 241], strides = [1, 1]} : vector<32x256xf32> to vector<32x241xf32>
    %466 = vector.extract_strided_slice %432 {offsets = [0, 0], sizes = [32, 15], strides = [1, 1]} : vector<32x256xf32> to vector<32x15xf32>
    %467 = tpu.concatenate %465, %466 in 1 : vector<32x241xf32>, vector<32x15xf32> -> vector<32x256xf32>
    %468 = vector.extract_strided_slice %1 {offsets = [6, 0], sizes = [1, 256], strides = [1, 1]} : vector<9x256xf32> to vector<1x256xf32>
    %469 = vector.broadcast %468 : vector<1x256xf32> to vector<32x256xf32>
    %470 = arith.mulf %467, %469 : vector<32x256xf32>
    %471 = vector.extract_strided_slice %432 {offsets = [0, 16], sizes = [32, 240], strides = [1, 1]} : vector<32x256xf32> to vector<32x240xf32>
    %472 = vector.extract_strided_slice %432 {offsets = [0, 0], sizes = [32, 16], strides = [1, 1]} : vector<32x256xf32> to vector<32x16xf32>
    %473 = tpu.concatenate %471, %472 in 1 : vector<32x240xf32>, vector<32x16xf32> -> vector<32x256xf32>
    %474 = vector.extract_strided_slice %1 {offsets = [7, 0], sizes = [1, 256], strides = [1, 1]} : vector<9x256xf32> to vector<1x256xf32>
    %475 = vector.broadcast %474 : vector<1x256xf32> to vector<32x256xf32>
    %476 = arith.mulf %473, %475 : vector<32x256xf32>
    %477 = vector.extract_strided_slice %432 {offsets = [0, 17], sizes = [32, 239], strides = [1, 1]} : vector<32x256xf32> to vector<32x239xf32>
    %478 = vector.extract_strided_slice %432 {offsets = [0, 0], sizes = [32, 17], strides = [1, 1]} : vector<32x256xf32> to vector<32x17xf32>
    %479 = tpu.concatenate %477, %478 in 1 : vector<32x239xf32>, vector<32x17xf32> -> vector<32x256xf32>
    %480 = vector.extract_strided_slice %1 {offsets = [8, 0], sizes = [1, 256], strides = [1, 1]} : vector<9x256xf32> to vector<1x256xf32>
    %481 = vector.broadcast %480 : vector<1x256xf32> to vector<32x256xf32>
    %482 = arith.mulf %479, %481 : vector<32x256xf32>
    %483 = tpu.concatenate %440, %446, %452, %458, %432, %464, %470, %476, %482 in 0 : vector<32x256xf32>, vector<32x256xf32>, vector<32x256xf32>, vector<32x256xf32>, vector<32x256xf32>, vector<32x256xf32>, vector<32x256xf32>, vector<32x256xf32>, vector<32x256xf32> -> vector<288x256xf32>
    %cst_82 = arith.constant dense<0.000000e+00> : vector<4x256xf32>
    %484 = tpu.matmul %434, %483, %cst_82 {dimension_numbers = #tpu.dot_dimension_numbers<[1], [0], [0], [1], [0, 0, 1, 1], [], []>} : vector<4x288xf32>, vector<288x256xf32>, vector<4x256xf32> -> vector<4x256xf32>
    %485 = vector.broadcast %353 : vector<4x1xf32> to vector<4x256xf32>
    %486 = arith.addf %484, %485 : vector<4x256xf32>
    %cst_83 = arith.constant 3.000000e+00 : f32
    %487 = vector.broadcast %cst_83 : f32 to vector<4x1xf32>
    %488 = arith.mulf %354, %487 : vector<4x1xf32>
    %489 = math.exp %488 : vector<4x1xf32>
    %490 = vector.broadcast %489 : vector<4x1xf32> to vector<4x256xf32>
    %491 = arith.mulf %486, %490 : vector<4x256xf32>
    %492 = vector.extract_strided_slice %491 {offsets = [0, 0], sizes = [2, 256], strides = [1, 1]} : vector<4x256xf32> to vector<2x256xf32>
    %493 = vector.extract_strided_slice %491 {offsets = [2, 0], sizes = [2, 256], strides = [1, 1]} : vector<4x256xf32> to vector<2x256xf32>
    %cst_84 = arith.constant 2.000000e+00 : f32
    %494 = vector.broadcast %cst_84 : f32 to vector<2x256xf32>
    %495 = arith.addf %493, %494 : vector<2x256xf32>
    %cst_85 = arith.constant 0.000000e+00 : f32
    %496 = vector.broadcast %cst_85 : f32 to vector<2x256xf32>
    %497 = arith.subf %496, %495 : vector<2x256xf32>
    %cst_86 = arith.constant 0.000000e+00 : f32
    %498 = vector.broadcast %cst_86 : f32 to vector<2x256xf32>
    %499 = arith.maximumf %497, %498 : vector<2x256xf32>
    %cst_87 = arith.constant 0.000000e+00 : f32
    %500 = vector.broadcast %cst_87 : f32 to vector<2x256xf32>
    %501 = arith.subf %500, %499 : vector<2x256xf32>
    %502 = math.exp %501 : vector<2x256xf32>
    %cst_88 = arith.constant 0.000000e+00 : f32
    %503 = vector.broadcast %cst_88 : f32 to vector<2x256xf32>
    %504 = arith.subf %503, %495 : vector<2x256xf32>
    %505 = arith.subf %504, %499 : vector<2x256xf32>
    %506 = math.exp %505 : vector<2x256xf32>
    %507 = arith.addf %502, %506 : vector<2x256xf32>
    %508 = math.log %507 : vector<2x256xf32>
    %509 = arith.addf %499, %508 : vector<2x256xf32>
    %cst_89 = arith.constant 0.000000e+00 : f32
    %510 = vector.broadcast %cst_89 : f32 to vector<2x256xf32>
    %511 = arith.subf %510, %509 : vector<2x256xf32>
    %512 = arith.addf %369, %492 : vector<2x256xf32>
    %513 = math.exp %511 : vector<2x256xf32>
    %514 = arith.mulf %512, %513 : vector<2x256xf32>
    %515 = vector.shape_cast %511 : vector<2x256xf32> to vector<1x2x256xf32>
    %cst_90 = arith.constant dense<0.000000e+00> : vector<1xf32>
    %516 = vector.multi_reduction <add>, %515, %cst_90 [1, 2] : vector<1x2x256xf32> to vector<1xf32>
    %517 = vector.shape_cast %516 : vector<1xf32> to vector<1x1x1xf32>
    %518 = vector.extract %517[0, 0, 0] : f32 from vector<1x1x1xf32>
    %519 = vector.broadcast %518 : f32 to vector<1x1xf32>
    %520 = arith.addf %367, %519 : vector<1x1xf32>
    %521 = tpu.concatenate %368, %514 in 0 : vector<2x256xf32>, vector<2x256xf32> -> vector<4x256xf32>
    %c3 = arith.constant 3 : index
    %c0_91 = arith.constant 0 : index
    %c0_92 = arith.constant 0 : index
    %522 = vector.load %arg7[%c3, %c0_91, %c0_92] : memref<4x32x8xf32, #tpu.memory_space<vmem>>, vector<1x32x8xf32>
    %523 = vector.shape_cast %522 : vector<1x32x8xf32> to vector<32x8xf32>
    %524 = vector.extract_strided_slice %523 {offsets = [0, 0], sizes = [4, 1], strides = [1, 1]} : vector<32x8xf32> to vector<4x1xf32>
    %525 = vector.extract_strided_slice %523 {offsets = [0, 1], sizes = [4, 1], strides = [1, 1]} : vector<32x8xf32> to vector<4x1xf32>
    %526 = vector.extract_strided_slice %523 {offsets = [0, 2], sizes = [4, 1], strides = [1, 1]} : vector<32x8xf32> to vector<4x1xf32>
    %527 = vector.extract_strided_slice %523 {offsets = [0, 3], sizes = [4, 1], strides = [1, 1]} : vector<32x8xf32> to vector<4x1xf32>
    %528 = vector.extract_strided_slice %523 {offsets = [0, 4], sizes = [32, 1], strides = [1, 1]} : vector<32x8xf32> to vector<32x1xf32>
    %529 = vector.extract_strided_slice %523 {offsets = [0, 5], sizes = [32, 1], strides = [1, 1]} : vector<32x8xf32> to vector<32x1xf32>
    %530 = vector.broadcast %524 : vector<4x1xf32> to vector<4x256xf32>
    %531 = arith.addf %521, %530 : vector<4x256xf32>
    %532 = math.exp %525 : vector<4x1xf32>
    %533 = vector.broadcast %532 : vector<4x1xf32> to vector<4x256xf32>
    %534 = arith.mulf %531, %533 : vector<4x256xf32>
    %c3_93 = arith.constant 3 : index
    %c0_94 = arith.constant 0 : index
    %c0_95 = arith.constant 0 : index
    %535 = vector.load %arg3[%c3_93, %c0_94, %c0_95] : memref<4x4x4xf32, #tpu.memory_space<vmem>>, vector<1x4x4xf32>
    %536 = vector.shape_cast %535 : vector<1x4x4xf32> to vector<4x4xf32>
    %cst_96 = arith.constant dense<0.000000e+00> : vector<4x256xf32>
    %537 = tpu.matmul %536, %534, %cst_96 {dimension_numbers = #tpu.dot_dimension_numbers<[1], [0], [0], [1], [0, 0, 1, 1], [], []>} : vector<4x4xf32>, vector<4x256xf32>, vector<4x256xf32> -> vector<4x256xf32>
    %c3_97 = arith.constant 3 : index
    %538 = memref.load %arg1[%c3_97] : memref<4xf32, #tpu.memory_space<smem>>
    %539 = vector.broadcast %538 : f32 to vector<1x1xf32>
    %540 = arith.addf %520, %539 : vector<1x1xf32>
    %541 = vector.extract_strided_slice %537 {offsets = [0, 0], sizes = [2, 256], strides = [1, 1]} : vector<4x256xf32> to vector<2x256xf32>
    %542 = vector.extract_strided_slice %537 {offsets = [2, 0], sizes = [2, 256], strides = [1, 1]} : vector<4x256xf32> to vector<2x256xf32>
    %c3_98 = arith.constant 3 : index
    %c0_99 = arith.constant 0 : index
    %c0_100 = arith.constant 0 : index
    %543 = vector.load %arg4[%c3_98, %c0_99, %c0_100] : memref<4x32x18xf32, #tpu.memory_space<vmem>>, vector<1x32x18xf32>
    %544 = vector.shape_cast %543 : vector<1x32x18xf32> to vector<32x18xf32>
    %545 = vector.extract_strided_slice %541 {offsets = [0, 239], sizes = [2, 17], strides = [1, 1]} : vector<2x256xf32> to vector<2x17xf32>
    %546 = vector.extract_strided_slice %541 {offsets = [0, 0], sizes = [2, 239], strides = [1, 1]} : vector<2x256xf32> to vector<2x239xf32>
    %547 = tpu.concatenate %545, %546 in 1 : vector<2x17xf32>, vector<2x239xf32> -> vector<2x256xf32>
    %548 = vector.extract_strided_slice %1 {offsets = [0, 0], sizes = [1, 256], strides = [1, 1]} : vector<9x256xf32> to vector<1x256xf32>
    %549 = vector.broadcast %548 : vector<1x256xf32> to vector<2x256xf32>
    %550 = arith.mulf %547, %549 : vector<2x256xf32>
    %551 = vector.extract_strided_slice %541 {offsets = [0, 240], sizes = [2, 16], strides = [1, 1]} : vector<2x256xf32> to vector<2x16xf32>
    %552 = vector.extract_strided_slice %541 {offsets = [0, 0], sizes = [2, 240], strides = [1, 1]} : vector<2x256xf32> to vector<2x240xf32>
    %553 = tpu.concatenate %551, %552 in 1 : vector<2x16xf32>, vector<2x240xf32> -> vector<2x256xf32>
    %554 = vector.extract_strided_slice %1 {offsets = [1, 0], sizes = [1, 256], strides = [1, 1]} : vector<9x256xf32> to vector<1x256xf32>
    %555 = vector.broadcast %554 : vector<1x256xf32> to vector<2x256xf32>
    %556 = arith.mulf %553, %555 : vector<2x256xf32>
    %557 = vector.extract_strided_slice %541 {offsets = [0, 241], sizes = [2, 15], strides = [1, 1]} : vector<2x256xf32> to vector<2x15xf32>
    %558 = vector.extract_strided_slice %541 {offsets = [0, 0], sizes = [2, 241], strides = [1, 1]} : vector<2x256xf32> to vector<2x241xf32>
    %559 = tpu.concatenate %557, %558 in 1 : vector<2x15xf32>, vector<2x241xf32> -> vector<2x256xf32>
    %560 = vector.extract_strided_slice %1 {offsets = [2, 0], sizes = [1, 256], strides = [1, 1]} : vector<9x256xf32> to vector<1x256xf32>
    %561 = vector.broadcast %560 : vector<1x256xf32> to vector<2x256xf32>
    %562 = arith.mulf %559, %561 : vector<2x256xf32>
    %563 = vector.extract_strided_slice %541 {offsets = [0, 255], sizes = [2, 1], strides = [1, 1]} : vector<2x256xf32> to vector<2x1xf32>
    %564 = vector.extract_strided_slice %541 {offsets = [0, 0], sizes = [2, 255], strides = [1, 1]} : vector<2x256xf32> to vector<2x255xf32>
    %565 = tpu.concatenate %563, %564 in 1 : vector<2x1xf32>, vector<2x255xf32> -> vector<2x256xf32>
    %566 = vector.extract_strided_slice %1 {offsets = [3, 0], sizes = [1, 256], strides = [1, 1]} : vector<9x256xf32> to vector<1x256xf32>
    %567 = vector.broadcast %566 : vector<1x256xf32> to vector<2x256xf32>
    %568 = arith.mulf %565, %567 : vector<2x256xf32>
    %569 = vector.extract_strided_slice %541 {offsets = [0, 1], sizes = [2, 255], strides = [1, 1]} : vector<2x256xf32> to vector<2x255xf32>
    %570 = vector.extract_strided_slice %541 {offsets = [0, 0], sizes = [2, 1], strides = [1, 1]} : vector<2x256xf32> to vector<2x1xf32>
    %571 = tpu.concatenate %569, %570 in 1 : vector<2x255xf32>, vector<2x1xf32> -> vector<2x256xf32>
    %572 = vector.extract_strided_slice %1 {offsets = [5, 0], sizes = [1, 256], strides = [1, 1]} : vector<9x256xf32> to vector<1x256xf32>
    %573 = vector.broadcast %572 : vector<1x256xf32> to vector<2x256xf32>
    %574 = arith.mulf %571, %573 : vector<2x256xf32>
    %575 = vector.extract_strided_slice %541 {offsets = [0, 15], sizes = [2, 241], strides = [1, 1]} : vector<2x256xf32> to vector<2x241xf32>
    %576 = vector.extract_strided_slice %541 {offsets = [0, 0], sizes = [2, 15], strides = [1, 1]} : vector<2x256xf32> to vector<2x15xf32>
    %577 = tpu.concatenate %575, %576 in 1 : vector<2x241xf32>, vector<2x15xf32> -> vector<2x256xf32>
    %578 = vector.extract_strided_slice %1 {offsets = [6, 0], sizes = [1, 256], strides = [1, 1]} : vector<9x256xf32> to vector<1x256xf32>
    %579 = vector.broadcast %578 : vector<1x256xf32> to vector<2x256xf32>
    %580 = arith.mulf %577, %579 : vector<2x256xf32>
    %581 = vector.extract_strided_slice %541 {offsets = [0, 16], sizes = [2, 240], strides = [1, 1]} : vector<2x256xf32> to vector<2x240xf32>
    %582 = vector.extract_strided_slice %541 {offsets = [0, 0], sizes = [2, 16], strides = [1, 1]} : vector<2x256xf32> to vector<2x16xf32>
    %583 = tpu.concatenate %581, %582 in 1 : vector<2x240xf32>, vector<2x16xf32> -> vector<2x256xf32>
    %584 = vector.extract_strided_slice %1 {offsets = [7, 0], sizes = [1, 256], strides = [1, 1]} : vector<9x256xf32> to vector<1x256xf32>
    %585 = vector.broadcast %584 : vector<1x256xf32> to vector<2x256xf32>
    %586 = arith.mulf %583, %585 : vector<2x256xf32>
    %587 = vector.extract_strided_slice %541 {offsets = [0, 17], sizes = [2, 239], strides = [1, 1]} : vector<2x256xf32> to vector<2x239xf32>
    %588 = vector.extract_strided_slice %541 {offsets = [0, 0], sizes = [2, 17], strides = [1, 1]} : vector<2x256xf32> to vector<2x17xf32>
    %589 = tpu.concatenate %587, %588 in 1 : vector<2x239xf32>, vector<2x17xf32> -> vector<2x256xf32>
    %590 = vector.extract_strided_slice %1 {offsets = [8, 0], sizes = [1, 256], strides = [1, 1]} : vector<9x256xf32> to vector<1x256xf32>
    %591 = vector.broadcast %590 : vector<1x256xf32> to vector<2x256xf32>
    %592 = arith.mulf %589, %591 : vector<2x256xf32>
    %593 = tpu.concatenate %550, %556, %562, %568, %541, %574, %580, %586, %592 in 0 : vector<2x256xf32>, vector<2x256xf32>, vector<2x256xf32>, vector<2x256xf32>, vector<2x256xf32>, vector<2x256xf32>, vector<2x256xf32>, vector<2x256xf32>, vector<2x256xf32> -> vector<18x256xf32>
    %cst_101 = arith.constant dense<0.000000e+00> : vector<32x256xf32>
    %594 = tpu.matmul %544, %593, %cst_101 {dimension_numbers = #tpu.dot_dimension_numbers<[1], [0], [0], [1], [0, 0, 1, 1], [], []>} : vector<32x18xf32>, vector<18x256xf32>, vector<32x256xf32> -> vector<32x256xf32>
    %595 = vector.broadcast %528 : vector<32x1xf32> to vector<32x256xf32>
    %596 = arith.addf %594, %595 : vector<32x256xf32>
    %cst_102 = arith.constant 0.000000e+00 : f32
    %597 = vector.broadcast %cst_102 : f32 to vector<32x256xf32>
    %598 = arith.maximumf %596, %597 : vector<32x256xf32>
    %c3_103 = arith.constant 3 : index
    %c0_104 = arith.constant 0 : index
    %c0_105 = arith.constant 0 : index
    %599 = vector.load %arg5[%c3_103, %c0_104, %c0_105] : memref<4x32x32xf32, #tpu.memory_space<vmem>>, vector<1x32x32xf32>
    %600 = vector.shape_cast %599 : vector<1x32x32xf32> to vector<32x32xf32>
    %cst_106 = arith.constant dense<0.000000e+00> : vector<32x256xf32>
    %601 = tpu.matmul %600, %598, %cst_106 {dimension_numbers = #tpu.dot_dimension_numbers<[1], [0], [0], [1], [0, 0, 1, 1], [], []>} : vector<32x32xf32>, vector<32x256xf32>, vector<32x256xf32> -> vector<32x256xf32>
    %602 = vector.broadcast %529 : vector<32x1xf32> to vector<32x256xf32>
    %603 = arith.addf %601, %602 : vector<32x256xf32>
    %cst_107 = arith.constant 0.000000e+00 : f32
    %604 = vector.broadcast %cst_107 : f32 to vector<32x256xf32>
    %605 = arith.maximumf %603, %604 : vector<32x256xf32>
    %c3_108 = arith.constant 3 : index
    %c0_109 = arith.constant 0 : index
    %c0_110 = arith.constant 0 : index
    %606 = vector.load %arg6[%c3_108, %c0_109, %c0_110] : memref<4x4x288xf32, #tpu.memory_space<vmem>>, vector<1x4x288xf32>
    %607 = vector.shape_cast %606 : vector<1x4x288xf32> to vector<4x288xf32>
    %608 = vector.extract_strided_slice %605 {offsets = [0, 239], sizes = [32, 17], strides = [1, 1]} : vector<32x256xf32> to vector<32x17xf32>
    %609 = vector.extract_strided_slice %605 {offsets = [0, 0], sizes = [32, 239], strides = [1, 1]} : vector<32x256xf32> to vector<32x239xf32>
    %610 = tpu.concatenate %608, %609 in 1 : vector<32x17xf32>, vector<32x239xf32> -> vector<32x256xf32>
    %611 = vector.extract_strided_slice %1 {offsets = [0, 0], sizes = [1, 256], strides = [1, 1]} : vector<9x256xf32> to vector<1x256xf32>
    %612 = vector.broadcast %611 : vector<1x256xf32> to vector<32x256xf32>
    %613 = arith.mulf %610, %612 : vector<32x256xf32>
    %614 = vector.extract_strided_slice %605 {offsets = [0, 240], sizes = [32, 16], strides = [1, 1]} : vector<32x256xf32> to vector<32x16xf32>
    %615 = vector.extract_strided_slice %605 {offsets = [0, 0], sizes = [32, 240], strides = [1, 1]} : vector<32x256xf32> to vector<32x240xf32>
    %616 = tpu.concatenate %614, %615 in 1 : vector<32x16xf32>, vector<32x240xf32> -> vector<32x256xf32>
    %617 = vector.extract_strided_slice %1 {offsets = [1, 0], sizes = [1, 256], strides = [1, 1]} : vector<9x256xf32> to vector<1x256xf32>
    %618 = vector.broadcast %617 : vector<1x256xf32> to vector<32x256xf32>
    %619 = arith.mulf %616, %618 : vector<32x256xf32>
    %620 = vector.extract_strided_slice %605 {offsets = [0, 241], sizes = [32, 15], strides = [1, 1]} : vector<32x256xf32> to vector<32x15xf32>
    %621 = vector.extract_strided_slice %605 {offsets = [0, 0], sizes = [32, 241], strides = [1, 1]} : vector<32x256xf32> to vector<32x241xf32>
    %622 = tpu.concatenate %620, %621 in 1 : vector<32x15xf32>, vector<32x241xf32> -> vector<32x256xf32>
    %623 = vector.extract_strided_slice %1 {offsets = [2, 0], sizes = [1, 256], strides = [1, 1]} : vector<9x256xf32> to vector<1x256xf32>
    %624 = vector.broadcast %623 : vector<1x256xf32> to vector<32x256xf32>
    %625 = arith.mulf %622, %624 : vector<32x256xf32>
    %626 = vector.extract_strided_slice %605 {offsets = [0, 255], sizes = [32, 1], strides = [1, 1]} : vector<32x256xf32> to vector<32x1xf32>
    %627 = vector.extract_strided_slice %605 {offsets = [0, 0], sizes = [32, 255], strides = [1, 1]} : vector<32x256xf32> to vector<32x255xf32>
    %628 = tpu.concatenate %626, %627 in 1 : vector<32x1xf32>, vector<32x255xf32> -> vector<32x256xf32>
    %629 = vector.extract_strided_slice %1 {offsets = [3, 0], sizes = [1, 256], strides = [1, 1]} : vector<9x256xf32> to vector<1x256xf32>
    %630 = vector.broadcast %629 : vector<1x256xf32> to vector<32x256xf32>
    %631 = arith.mulf %628, %630 : vector<32x256xf32>
    %632 = vector.extract_strided_slice %605 {offsets = [0, 1], sizes = [32, 255], strides = [1, 1]} : vector<32x256xf32> to vector<32x255xf32>
    %633 = vector.extract_strided_slice %605 {offsets = [0, 0], sizes = [32, 1], strides = [1, 1]} : vector<32x256xf32> to vector<32x1xf32>
    %634 = tpu.concatenate %632, %633 in 1 : vector<32x255xf32>, vector<32x1xf32> -> vector<32x256xf32>
    %635 = vector.extract_strided_slice %1 {offsets = [5, 0], sizes = [1, 256], strides = [1, 1]} : vector<9x256xf32> to vector<1x256xf32>
    %636 = vector.broadcast %635 : vector<1x256xf32> to vector<32x256xf32>
    %637 = arith.mulf %634, %636 : vector<32x256xf32>
    %638 = vector.extract_strided_slice %605 {offsets = [0, 15], sizes = [32, 241], strides = [1, 1]} : vector<32x256xf32> to vector<32x241xf32>
    %639 = vector.extract_strided_slice %605 {offsets = [0, 0], sizes = [32, 15], strides = [1, 1]} : vector<32x256xf32> to vector<32x15xf32>
    %640 = tpu.concatenate %638, %639 in 1 : vector<32x241xf32>, vector<32x15xf32> -> vector<32x256xf32>
    %641 = vector.extract_strided_slice %1 {offsets = [6, 0], sizes = [1, 256], strides = [1, 1]} : vector<9x256xf32> to vector<1x256xf32>
    %642 = vector.broadcast %641 : vector<1x256xf32> to vector<32x256xf32>
    %643 = arith.mulf %640, %642 : vector<32x256xf32>
    %644 = vector.extract_strided_slice %605 {offsets = [0, 16], sizes = [32, 240], strides = [1, 1]} : vector<32x256xf32> to vector<32x240xf32>
    %645 = vector.extract_strided_slice %605 {offsets = [0, 0], sizes = [32, 16], strides = [1, 1]} : vector<32x256xf32> to vector<32x16xf32>
    %646 = tpu.concatenate %644, %645 in 1 : vector<32x240xf32>, vector<32x16xf32> -> vector<32x256xf32>
    %647 = vector.extract_strided_slice %1 {offsets = [7, 0], sizes = [1, 256], strides = [1, 1]} : vector<9x256xf32> to vector<1x256xf32>
    %648 = vector.broadcast %647 : vector<1x256xf32> to vector<32x256xf32>
    %649 = arith.mulf %646, %648 : vector<32x256xf32>
    %650 = vector.extract_strided_slice %605 {offsets = [0, 17], sizes = [32, 239], strides = [1, 1]} : vector<32x256xf32> to vector<32x239xf32>
    %651 = vector.extract_strided_slice %605 {offsets = [0, 0], sizes = [32, 17], strides = [1, 1]} : vector<32x256xf32> to vector<32x17xf32>
    %652 = tpu.concatenate %650, %651 in 1 : vector<32x239xf32>, vector<32x17xf32> -> vector<32x256xf32>
    %653 = vector.extract_strided_slice %1 {offsets = [8, 0], sizes = [1, 256], strides = [1, 1]} : vector<9x256xf32> to vector<1x256xf32>
    %654 = vector.broadcast %653 : vector<1x256xf32> to vector<32x256xf32>
    %655 = arith.mulf %652, %654 : vector<32x256xf32>
    %656 = tpu.concatenate %613, %619, %625, %631, %605, %637, %643, %649, %655 in 0 : vector<32x256xf32>, vector<32x256xf32>, vector<32x256xf32>, vector<32x256xf32>, vector<32x256xf32>, vector<32x256xf32>, vector<32x256xf32>, vector<32x256xf32>, vector<32x256xf32> -> vector<288x256xf32>
    %cst_111 = arith.constant dense<0.000000e+00> : vector<4x256xf32>
    %657 = tpu.matmul %607, %656, %cst_111 {dimension_numbers = #tpu.dot_dimension_numbers<[1], [0], [0], [1], [0, 0, 1, 1], [], []>} : vector<4x288xf32>, vector<288x256xf32>, vector<4x256xf32> -> vector<4x256xf32>
    %658 = vector.broadcast %526 : vector<4x1xf32> to vector<4x256xf32>
    %659 = arith.addf %657, %658 : vector<4x256xf32>
    %cst_112 = arith.constant 3.000000e+00 : f32
    %660 = vector.broadcast %cst_112 : f32 to vector<4x1xf32>
    %661 = arith.mulf %527, %660 : vector<4x1xf32>
    %662 = math.exp %661 : vector<4x1xf32>
    %663 = vector.broadcast %662 : vector<4x1xf32> to vector<4x256xf32>
    %664 = arith.mulf %659, %663 : vector<4x256xf32>
    %665 = vector.extract_strided_slice %664 {offsets = [0, 0], sizes = [2, 256], strides = [1, 1]} : vector<4x256xf32> to vector<2x256xf32>
    %666 = vector.extract_strided_slice %664 {offsets = [2, 0], sizes = [2, 256], strides = [1, 1]} : vector<4x256xf32> to vector<2x256xf32>
    %cst_113 = arith.constant 2.000000e+00 : f32
    %667 = vector.broadcast %cst_113 : f32 to vector<2x256xf32>
    %668 = arith.addf %666, %667 : vector<2x256xf32>
    %cst_114 = arith.constant 0.000000e+00 : f32
    %669 = vector.broadcast %cst_114 : f32 to vector<2x256xf32>
    %670 = arith.subf %669, %668 : vector<2x256xf32>
    %cst_115 = arith.constant 0.000000e+00 : f32
    %671 = vector.broadcast %cst_115 : f32 to vector<2x256xf32>
    %672 = arith.maximumf %670, %671 : vector<2x256xf32>
    %cst_116 = arith.constant 0.000000e+00 : f32
    %673 = vector.broadcast %cst_116 : f32 to vector<2x256xf32>
    %674 = arith.subf %673, %672 : vector<2x256xf32>
    %675 = math.exp %674 : vector<2x256xf32>
    %cst_117 = arith.constant 0.000000e+00 : f32
    %676 = vector.broadcast %cst_117 : f32 to vector<2x256xf32>
    %677 = arith.subf %676, %668 : vector<2x256xf32>
    %678 = arith.subf %677, %672 : vector<2x256xf32>
    %679 = math.exp %678 : vector<2x256xf32>
    %680 = arith.addf %675, %679 : vector<2x256xf32>
    %681 = math.log %680 : vector<2x256xf32>
    %682 = arith.addf %672, %681 : vector<2x256xf32>
    %cst_118 = arith.constant 0.000000e+00 : f32
    %683 = vector.broadcast %cst_118 : f32 to vector<2x256xf32>
    %684 = arith.subf %683, %682 : vector<2x256xf32>
    %685 = arith.addf %542, %665 : vector<2x256xf32>
    %686 = math.exp %684 : vector<2x256xf32>
    %687 = arith.mulf %685, %686 : vector<2x256xf32>
    %688 = vector.shape_cast %684 : vector<2x256xf32> to vector<1x2x256xf32>
    %cst_119 = arith.constant dense<0.000000e+00> : vector<1xf32>
    %689 = vector.multi_reduction <add>, %688, %cst_119 [1, 2] : vector<1x2x256xf32> to vector<1xf32>
    %690 = vector.shape_cast %689 : vector<1xf32> to vector<1x1x1xf32>
    %691 = vector.extract %690[0, 0, 0] : f32 from vector<1x1x1xf32>
    %692 = vector.broadcast %691 : f32 to vector<1x1xf32>
    %693 = arith.addf %540, %692 : vector<1x1xf32>
    %694 = tpu.concatenate %541, %687 in 0 : vector<2x256xf32>, vector<2x256xf32> -> vector<4x256xf32>
    %c0_120 = arith.constant 0 : index
    %c0_121 = arith.constant 0 : index
    %695 = vector.load %arg9[%c0_120, %c0_121] : memref<4x256xf32, #tpu.memory_space<vmem>>, vector<4x256xf32>
    tpu.vector_store %arg9[%c0_120, %c0_121], %694 {strides = array<i32>} : memref<4x256xf32, #tpu.memory_space<vmem>>, vector<4x256xf32>,
    %696 = arith.mulf %694, %694 : vector<4x256xf32>
    %cst_122 = arith.constant 1.83787704 : f32
    %697 = vector.broadcast %cst_122 : f32 to vector<4x256xf32>
    %698 = arith.addf %697, %696 : vector<4x256xf32>
    %cst_123 = arith.constant -5.000000e-01 : f32
    %699 = vector.broadcast %cst_123 : f32 to vector<4x256xf32>
    %700 = arith.mulf %699, %698 : vector<4x256xf32>
    %701 = vector.shape_cast %700 : vector<4x256xf32> to vector<1x4x256xf32>
    %cst_124 = arith.constant dense<0.000000e+00> : vector<1xf32>
    %702 = vector.multi_reduction <add>, %701, %cst_124 [1, 2] : vector<1x4x256xf32> to vector<1xf32>
    %703 = vector.shape_cast %702 : vector<1xf32> to vector<1x1x1xf32>
    %704 = vector.extract %703[0, 0, 0] : f32 from vector<1x1x1xf32>
    %705 = vector.broadcast %704 : f32 to vector<1x1xf32>
    %706 = arith.addf %693, %705 : vector<1x1xf32>
    %cst_125 = arith.constant 0.000000e+00 : f32
    %707 = vector.broadcast %cst_125 : f32 to vector<1x1xf32>
    %708 = arith.subf %707, %706 : vector<1x1xf32>
    %c0_126 = arith.constant 0 : index
    %c0_127 = arith.constant 0 : index
    %c0_128 = arith.constant 0 : index
    %709 = vector.load %arg10[%c0_126, %c0_127, %c0_128] : memref<1x1x1xf32, #tpu.memory_space<vmem>>, vector<1x1x1xf32>
    %710 = vector.shape_cast %709 : vector<1x1x1xf32> to vector<1x1xf32>
    %711 = vector.shape_cast %708 : vector<1x1xf32> to vector<1x1x1xf32>
    tpu.vector_store %arg10[%c0_126, %c0_127, %c0_128], %711 {strides = array<i32>} : memref<1x1x1xf32, #tpu.memory_space<vmem>>, vector<1x1x1xf32>,
    return
  }
  func.func @transform_0(%arg0: i32, %arg1: memref<4xf32, #tpu.memory_space<smem>>) -> (i32, i32) {
    %c0_i32 = arith.constant 0 : i32
    %c0_i32_0 = arith.constant 0 : i32
    return %c0_i32, %arg0 : i32, i32
  }
  func.func @transform_1(%arg0: i32, %arg1: memref<4xf32, #tpu.memory_space<smem>>) -> (i32, i32, i32) {
    %c0_i32 = arith.constant 0 : i32
    %c0_i32_0 = arith.constant 0 : i32
    %c0_i32_1 = arith.constant 0 : i32
    %c0_i32_2 = arith.constant 0 : i32
    return %c0_i32, %c0_i32_0, %c0_i32_1 : i32, i32, i32
  }
  func.func @transform_2(%arg0: i32, %arg1: memref<4xf32, #tpu.memory_space<smem>>) -> (i32, i32, i32) {
    %c0_i32 = arith.constant 0 : i32
    %c0_i32_0 = arith.constant 0 : i32
    %c0_i32_1 = arith.constant 0 : i32
    %c0_i32_2 = arith.constant 0 : i32
    return %c0_i32, %c0_i32_0, %c0_i32_1 : i32, i32, i32
  }
  func.func @transform_3(%arg0: i32, %arg1: memref<4xf32, #tpu.memory_space<smem>>) -> (i32, i32, i32) {
    %c0_i32 = arith.constant 0 : i32
    %c0_i32_0 = arith.constant 0 : i32
    %c0_i32_1 = arith.constant 0 : i32
    %c0_i32_2 = arith.constant 0 : i32
    return %c0_i32, %c0_i32_0, %c0_i32_1 : i32, i32, i32
  }
  func.func @transform_4(%arg0: i32, %arg1: memref<4xf32, #tpu.memory_space<smem>>) -> (i32, i32, i32) {
    %c0_i32 = arith.constant 0 : i32
    %c0_i32_0 = arith.constant 0 : i32
    %c0_i32_1 = arith.constant 0 : i32
    %c0_i32_2 = arith.constant 0 : i32
    return %c0_i32, %c0_i32_0, %c0_i32_1 : i32, i32, i32
  }
  func.func @transform_5(%arg0: i32, %arg1: memref<4xf32, #tpu.memory_space<smem>>) -> (i32, i32, i32) {
    %c0_i32 = arith.constant 0 : i32
    %c0_i32_0 = arith.constant 0 : i32
    %c0_i32_1 = arith.constant 0 : i32
    %c0_i32_2 = arith.constant 0 : i32
    return %c0_i32, %c0_i32_0, %c0_i32_1 : i32, i32, i32
  }
  func.func @transform_6(%arg0: i32, %arg1: memref<4xf32, #tpu.memory_space<smem>>) -> (i32, i32) {
    %c0_i32 = arith.constant 0 : i32
    %c0_i32_0 = arith.constant 0 : i32
    %c0_i32_1 = arith.constant 0 : i32
    return %c0_i32, %c0_i32_0 : i32, i32
  }
  func.func @transform_7(%arg0: i32, %arg1: memref<4xf32, #tpu.memory_space<smem>>) -> (i32, i32) {
    %c0_i32 = arith.constant 0 : i32
    %c0_i32_0 = arith.constant 0 : i32
    return %c0_i32, %arg0 : i32, i32
  }
  func.func @transform_8(%arg0: i32, %arg1: memref<4xf32, #tpu.memory_space<smem>>) -> (i32, i32, i32) {
    %c0_i32 = arith.constant 0 : i32
    %c0_i32_0 = arith.constant 0 : i32
    %c0_i32_1 = arith.constant 0 : i32
    return %arg0, %c0_i32, %c0_i32_0 : i32, i32, i32
  }
}

</mosaic_0001>

<bundles_post_ra>
// kernel: glow_forward_pallas.1
= control target key start
LH: loop header
LB: loop body
LE: loop exit
PB: predicated region body
PF: predicated region fallthrough
CT: control target
= control target key end

     0   :  { %s7972_s0 = inlined_call_operand.vmem [shape: f32[4], index: 0, kind: input, shape index: {}]   ;;  %s7973_s1 = inlined_call_operand.vmem [shape: f32[4,512], index: 1, kind: input, shape index: {}]   ;;  %s7974_s2 = inlined_call_operand.vmem [shape: f32[4,4,4], index: 2, kind: input, shape index: {}]   ;;  %s7975_s3 = inlined_call_operand.vmem [shape: f32[4,32,18], index: 3, kind: input, shape index: {}]   ;;  %s7976_s4 = inlined_call_operand.vmem [shape: f32[4,32,32], index: 4, kind: input, shape index: {}]   ;;  %s7977_s5 = inlined_call_operand.vmem [shape: f32[4,4,288], index: 5, kind: input, shape index: {}]   ;;  %s7978_s6 = inlined_call_operand.vmem [shape: f32[4,32,8], index: 6, kind: input, shape index: {}]   ;;  %s7979_s7 = inlined_call_operand.vmem [shape: f32[9,256], index: 7, kind: input, shape index: {}]   ;;  %s7980_s8 = inlined_call_operand.vmem [shape: f32[4,512], index: 8, kind: output, shape index: {0}]   ;;  %s7981_s9 = inlined_call_operand.vmem [shape: f32[2,1,1], index: 9, kind: output, shape index: {1}]  }
   0x1   :  { %s15_s11 = sshll.u32 %s7972_s0, 4  ;;  %s16_s11 = int_to_ptr.vmem [resolvable:$true] %s15_s11 }
   0x2   :  { %s5562_s12 = scalar_lea.vmem %s16_s11, 16  ;;  %p5567_p1 = scmp.lt.s32.totalorder %s16_s11, %s16_s11 }
   0x3   :  { %p5563_p0 = scmp.ne.s32.totalorder %s16_s11, %s5562_s12  ;;  %p5568_p2 = scmp.lt.s32.totalorder %s5562_s12, %s5562_s12 }
   0x5   :  { %p5569_p3 = por %p5568_p2, %p5567_p1 }
   0x7   :  { %p5570_p4 = pnand %p5569_p3, %p5563_p0 }
   0x9   :  { %5573 = shalt.err (!%p5570_p4)  }
   0xa   :  { %s5584_s13 = smov [#allocation3]  }
   0xb   :  { %18 = dma.vmem_to_smem %s16_s11, 16, %s5584_s13, [#allocation2] }
   0xc   :  { %5578 = dma.done.wait [#allocation2], 16 }
   0xd   :  { %5579 = vsyncadd [#allocation2], 4294967280 }
   0xe   :  { %20 = sfence }
   0xf   :  { %s5654_s14 = smov 0  }
  0x10 LB: > { %s5660_s0 = sadd.s32 4294967295, %s5582_s14   ;;  %p4936_p5 = scmp.ge.s32.totalorder %s5582_s14, 1  ;;  %s5582_s14 = sphi %s5654_s14, %s26_s14  }
  0x11   : > { %p273_p6 = scmp.lt.s32.totalorder %s5582_s14, 3 }
  0x13   : > { %p274_p7 = pnand %p4936_p5, %p273_p6 }
  0x15   : > { %277 = sbr.rel (%p274_p7) target bundleno = 5787 (0x169b), region = 48 }
  0x1c   : > { %v5667_v0 = vld [vmem:[%s7978_s6] sm:$0xff]  ;;  %v7984_v1 = vmov 0   ;;  %v7986_v3 = vmov 1   ;;  %v7994_v5 = vmov 0.0   ;;  %s4937_s17 = sshll.u32 %s5660_s0, 1  ;;  %v341_v8 = vlaneseq  ;;  %s5589_s24 = smov 15  }
  0x1d   : > { %5436 = vset.pattern.permute.xlu0 %v7984_v1  ;;  %v347_v2 = vmul.f32 1.442695, %v5667_v0  ;;  %438 = vmatprep.mubr.f32.mxu1 %v7994_v5  ;;  %p311_p8 = scmp.lt.s32.totalorder %s4937_s17, 3  ;;  %v5588_v6 = vmov 839922192   ;;  %vm369_vm0 = vcmask 1043456  }
  0x1e   : > { %336 = vperm.xlu0 %5436, %v5667_v0   ;;  %1613 = vmatprep.mubr.f32.mxu0 %v7994_v5  ;;  %v339_v7 = vunpack.c.l.s4 %v5588_v6  ;;  %v5678_v10 = vshrl.u32 %v341_v8, 7  ;;  %v362_v20 = vld [vmem:[%s7974_s2] sm:$0xf]  ;;  %vm365_vm1 = vcmask 31744   ;;  %s5590_s25 = smov 16   ;;  %s5591_s26 = smov 17  }
  0x1f   : > { %5473 = vpow2.f32 %v347_v2  ;;  %s8091_s17 = smov (!%p311_p8, %s4937_s17), 3  ;;  %s5592_s27 = smov 127   ;;  %v5733_v23 = vld [vmem:[%s7978_s6 + $0x8] sm:$0xff]  ;;  %v7982_v24 = vmov 4   ;;  %v5742_v25 = vld [vmem:[%s7978_s6 + $0x10] sm:$0xff]  ;;  %v5748_v26 = vld [vmem:[%s7978_s6 + $0x18] sm:$0xff] }
  0x20   : > { %v340_v9 = vunpack.c.0.s8 %v339_v7  ;;  %s4938_s18 = sshll.u32 %s8091_s17, 2  ;;  %s5593_s28 = smov 1   ;;  %5438 = vset.pattern.permute.xlu1 %v7982_v24  ;;  %v466_v33 = vsub.s32 0, %v5678_v10  ;;  %v486_v34 = vsub.s32 1, %v5678_v10  ;;  %v506_v35 = vsub.s32 2, %v5678_v10  ;;  %v326_v39 = vld [vmem:[%s7979_s7] sm:$0xff] }
  0x21   : > { %s314_s21 = scalar_lea.vmem %s7973_s1, %s4938_s18  ;;  %s5594_s29 = smov 113   ;;  %v526_v38 = vsub.s32 3, %v5678_v10  ;;  %v327_v40 = vld [vmem:[%s7979_s7 + $0x8] sm:$0xff]  ;;  %v546_v41 = vsub.s32 5, %v5678_v10  ;;  %v566_v42 = vsub.s32 6, %v5678_v10  ;;  %v586_v43 = vsub.s32 7, %v5678_v10 }
  0x22   : > { %5437 = vset.pattern.permute.xlu0 %v7986_v3  ;;  %v343_v11 = vsub.s32 %v340_v9, %v5678_v10  ;;  %v325_v14 = vld [vmem:[%s314_s21] sm:$0xff]  ;;  %s5595_s30 = smov 112   ;;  %s5596_s10 = smov 111   ;;  %v5764_v44 = vrot.slane %v326_v39, %v466_v33  ;;  %v5766_v45 = vrot.slane %v327_v40, %v466_v33  ;;  %v5768_v46 = vrot.slane %v326_v39, %v486_v34 }
  0x23   : > { %v5770_v47 = vrot.slane %v327_v40, %v486_v34  ;;  %v5772_v48 = vrot.slane %v326_v39, %v506_v35  ;;  %vm538_vm2 = vcmask 1039360   ;;  %v5774_v50 = vrot.slane %v327_v40, %v506_v35  ;;  %s320_s20 = scalar_lea.vmem %s7980_s8, %s4938_s18  ;;  %s445_s17 = sld [smem:[#allocation3]] }
  0x24   : > { %v5776_v51 = vrot.slane %v326_v39, %v526_v38  ;;  %v5778_v52 = vrot.slane %v327_v40, %v526_v38  ;;  %vm479_vm3 = vcmask 130048   ;;  %v5780_v53 = vrot.slane %v326_v39, %v546_v41  ;;  %s4965_s18 = sld [smem:[#allocation3 + $0x1]]  ;;  %s4995_s22 = sld [smem:[#allocation3 + $0x2]] }
  0x25   : > { %v5782_v54 = vrot.slane %v327_v40, %v546_v41  ;;  %vm558_vm4 = vcmask 924672   ;;  %vm499_vm5 = vcmask 121856   ;;  %v5784_v56 = vrot.slane %v326_v39, %v566_v42  ;;  %s5025_s11 = sld [smem:[#allocation3 + $0x3]]  ;;  %p322_p9 = scmp.lt.s32.totalorder %s5660_s0, 1 }
  0x26   : > { %v5786_v57 = vrot.slane %v327_v40, %v566_v42  ;;  %vm459_vm6 = vcmask 138240   ;;  %v5789_v59 = vrot.slane %v326_v39, %v586_v43  ;;  %v5794_v2 = vrot.slane %v327_v40, %v586_v43 }
  0x27   : > { %vm650_vm7 = vcmask 1041408   ;;  %vm519_vm8 = vcmask 7168   ;;  %vm578_vm9 = vcmask 916480   ;;  %vm655_vm10 = vcmask 1045504   ;;  %s8093_s0 = smov (!%p322_p9, %s5660_s0), 1 }
  0x28   : > { %vm598_vm11 = vcmask 908288   ;;  %vm683_vm12 = vcmask 146432   ;;  %vm819_vm13 = vcmask 261120   ;;  %vm4849_vm14 = vcmask 0  }
  0x29   : > { %v5474_v4 = vpop.eup %5473 }
  0x2a   : > { %351 = vperm.xlu0 %5437, %v5474_v4  }
  0x2e   : > { %5439 = vset.pattern.permute.xlu0 %v7982_v24 }
  0x9d   : > { %v337_v12 = vpop.permute.xlu0 %336 }
  0x9e   : > { %v344_v13 = vrot.slane %v337_v12, %v343_v11 }
  0xa0   : > { %v346_v16 = vadd.f32 %v344_v13, %v325_v14 }
  0xa9   : > { %v352_v15 = vpop.permute.xlu0 %351 }
  0xaa   : > { %v359_v17 = vrot.slane %v352_v15, %v343_v11 }
  0xac   : > { %v361_v18 = vmul.f32 %v359_v17, %v346_v16 }
  0xae   : > { %v364_v19 = vcombine.high %v361_v18, %v361_v18 }
  0xb0   : > { %4941 = vmatprep.subr.msk.mxu1 %vm369_vm0, %v364_v19 }
  0xb1   : > { %4942 = vmatpush1.msk.msra.mxu1 %vm369_vm0, %v361_v18 }
  0xb2   : > { %4943 = vmatmul.mubr.msk.f32.vlgmr.msra.gmra.mrb[0].mxu1 %vm365_vm1, %v362_v20 }
  0xb3   : > { %766 = vmatprep.mubr.f32.mxu1 %v7994_v5 }
 0x185   : > { %v5694_v21 = vpop.f32.mrb[0].mxu1 }
 0x186   : > { %8032 = vst [vmem:[#allocation5_spill] sm:$0xff] %v5694_v21  ;;  %497 = vrot.lane.b32.xlu0 %v5694_v21, %s5589_s24  ;;  %477 = vrot.lane.b32.xlu1 %v5694_v21, %s5590_s25  ;;  %v5700_v22 = vpop.f32.mrb[1].mxu1 }
 0x187   : > { %8033 = vst [vmem:[#allocation6_spill] sm:$0xff] %v5700_v22 }
 0x18a   : > { %457 = vrot.lane.b32.xlu0 %v5694_v21, %s5591_s26  ;;  %534 = vrot.lane.b32.xlu1 %v5694_v21, %s5592_s27 }
 0x18e   : > { %517 = vrot.lane.b32.xlu0 %v5694_v21, %s5593_s28  ;;  %554 = vrot.lane.b32.xlu1 %v5694_v21, %s5594_s29 }
 0x192   : > { %536 = vrot.lane.b32.xlu0 %v5700_v22, %s5592_s27  ;;  %474 = vrot.lane.b32.xlu1 %v5700_v22, %s5590_s25 }
 0x196   : > { %556 = vrot.lane.b32.xlu0 %v5700_v22, %s5594_s29  ;;  %494 = vrot.lane.b32.xlu1 %v5700_v22, %s5589_s24 }
 0x19a   : > { %576 = vrot.lane.b32.xlu0 %v5700_v22, %s5595_s30  ;;  %453 = vrot.lane.b32.xlu1 %v5700_v22, %s5591_s26 }
 0x19e   : > { %596 = vrot.lane.b32.xlu0 %v5700_v22, %s5596_s10  ;;  %514 = vrot.lane.b32.xlu1 %v5700_v22, %s5593_s28 }
 0x1a2   : > { %574 = vrot.lane.b32.xlu1 %v5694_v21, %s5595_s30  ;;  %670 = vperm.xlu0 %5439, %v5733_v23  }
 0x1a6   : > { %594 = vrot.lane.b32.xlu1 %v5694_v21, %s5596_s10 }
 0x1aa   : > { %665 = vperm.xlu1 %5438, %v5667_v0  }
 0x1ae   : > { %675 = vperm.xlu1 %5438, %v5742_v25  }
 0x1b2   : > { %680 = vperm.xlu1 %5438, %v5748_v26  }
 0x1f8   : > { %v498_v27 = vpop.permute.xlu0 %497  ;;  %v478_v28 = vpop.permute.xlu1 %477 }
 0x1fc   : > { %v458_v29 = vpop.permute.xlu0 %457  ;;  %v535_v30 = vpop.permute.xlu1 %534 }
 0x200   : > { %v518_v31 = vpop.permute.xlu0 %517  ;;  %v555_v32 = vpop.permute.xlu1 %554 }
 0x204   : > { %v537_v36 = vpop.permute.xlu0 %536  ;;  %v475_v37 = vpop.permute.xlu1 %474 }
 0x205   : > { %v539_v58 = vsel %vm538_vm2, %v535_v30, %v537_v36  ;;  %v543_v60 = vsel %vm538_vm2, %v537_v36, %v535_v30  ;;  %v480_v61 = vsel %vm479_vm3, %v478_v28, %v475_v37  ;;  %v483_v62 = vsel %vm479_vm3, %v475_v37, %v478_v28 }
 0x206   : > { %v552_v8 = vmul.f32 %v5780_v53, %v539_v58  ;;  %v553_v10 = vmul.f32 %v5782_v54, %v543_v60  ;;  %v492_v11 = vmul.f32 %v5768_v46, %v483_v62  ;;  %v493_v12 = vmul.f32 %v5770_v47, %v480_v61 }
 0x208   : > { %v495_v49 = vpop.permute.xlu1 %494  ;;  %v557_v55 = vpop.permute.xlu0 %556  ;;  %v634_v33 = vrot.slane %v552_v8, 6  ;;  %v635_v34 = vrot.slane %v553_v10, 6  ;;  %v616_v37 = vrot.slane %v492_v11, 6 }
 0x209   : > { %v559_v4 = vsel %vm558_vm4, %v555_v32, %v557_v55  ;;  %v563_v6 = vsel %vm558_vm4, %v557_v55, %v555_v32  ;;  %v500_v7 = vsel %vm499_vm5, %v498_v27, %v495_v49  ;;  %v503_v16 = vsel %vm499_vm5, %v495_v49, %v498_v27 }
 0x20a   : > { %v572_v14 = vmul.f32 %v5784_v56, %v559_v4  ;;  %v573_v15 = vmul.f32 %v5786_v57, %v563_v6  ;;  %v513_v17 = vmul.f32 %v5774_v50, %v500_v7  ;;  %v617_v27 = vrot.slane %v493_v12, 6 }
 0x20b   : > { %v512_v35 = vmul.f32 %v5772_v48, %v503_v16  ;;  %v658_v62 = vsel %vm650_vm7, %v5694_v21, %v634_v33 }
 0x20c   : > { %v454_v63 = vpop.permute.xlu1 %453  ;;  %v577_v36 = vpop.permute.xlu0 %576  ;;  %v640_v38 = vrot.slane %v572_v14, 4  ;;  %v641_v39 = vrot.slane %v573_v15, 4  ;;  %v623_v40 = vrot.slane %v513_v17, 4  ;;  %v5834_v15 = vld [vmem:[%s7979_s7 + $0x18] ss:$0 sm:$0xff] }
 0x20d   : > { %v460_v9 = vsel %vm459_vm6, %v458_v29, %v454_v63  ;;  %v463_v13 = vsel %vm459_vm6, %v454_v63, %v458_v29  ;;  %v622_v63 = vrot.slane %v512_v35, 4  ;;  %v450_v35 = vld [vmem:[%s7975_s3 + $0x10] sm:$0xff] }
 0x20e   : > { %v473_v19 = vmul.f32 %v5766_v45, %v460_v9  ;;  %v472_v30 = vmul.f32 %v5764_v44, %v463_v13  ;;  %v659_v9 = vsel %vm650_vm7, %v5700_v22, %v635_v34  ;;  %v660_v10 = vsel %vm369_vm0, %v658_v62, %v640_v38  ;;  %v448_v34 = vld [vmem:[%s7975_s3] sm:$0xff] }
 0x20f   : > { %v661_v13 = vsel %vm369_vm0, %v659_v9, %v641_v39 }
 0x210   : > { %v515_v18 = vpop.permute.xlu1 %514  ;;  %v651_v55 = vsel %vm650_vm7, %v472_v30, %v616_v37  ;;  %v597_v11 = vpop.permute.xlu0 %596  ;;  %v5843_v30 = vld [vmem:[%s7979_s7 + $0x10] ss:$0 sm:$0xff]  ;;  %v7992_v37 = vmov 5  }
 0x211   : > { %v520_v20 = vsel %vm519_vm8, %v518_v31, %v515_v18  ;;  %v523_v28 = vsel %vm519_vm8, %v515_v18, %v518_v31  ;;  %v652_v31 = vsel %vm650_vm7, %v473_v19, %v617_v27  ;;  %v653_v14 = vsel %vm369_vm0, %v651_v55, %v622_v63  ;;  %v449_v27 = vld [vmem:[%s7975_s3 + $0x8] sm:$0xff]  ;;  %5440 = vset.pattern.permute.xlu0 %v7992_v37 }
 0x212   : > { %v532_v29 = vmul.f32 %v5776_v51, %v523_v28  ;;  %v533_v32 = vmul.f32 %v5778_v52, %v520_v20  ;;  %v654_v8 = vsel %vm369_vm0, %v652_v31, %v623_v40  ;;  %5441 = vset.pattern.permute.xlu1 %v7992_v37  ;;  %804 = vperm.xlu0 %5440, %v5667_v0  }
 0x213   : > { %808 = vperm.xlu1 %5441, %v5733_v23  }
 0x214   : > { %v575_v41 = vpop.permute.xlu1 %574  ;;  %v629_v42 = vrot.slane %v533_v32, 2  ;;  %v628_v58 = vrot.slane %v532_v29, 2 }
 0x215   : > { %v579_v43 = vsel %vm578_vm9, %v575_v41, %v577_v36  ;;  %v583_v49 = vsel %vm578_vm9, %v577_v36, %v575_v41  ;;  %v451_v36 = vld [vmem:[%s7975_s3 + $0x18] sm:$0xff] }
 0x216   : > { %v592_v60 = vmul.f32 %v5789_v59, %v579_v43  ;;  %v593_v61 = vmul.f32 %v5794_v2, %v583_v49  ;;  %v657_v12 = vsel %vm655_vm10, %v654_v8, %v629_v42  ;;  %v656_v18 = vsel %vm655_vm10, %v653_v14, %v628_v58  ;;  %816 = vperm.xlu0 %5440, %v5748_v26  }
 0x217   : > { %812 = vperm.xlu1 %5441, %v5742_v25  }
 0x218   : > { %v646_v4 = vrot.slane %v592_v60, 2  ;;  %v647_v6 = vrot.slane %v593_v61, 2  ;;  %v595_v7 = vpop.permute.xlu1 %594 }
 0x219   : > { %v603_v16 = vsel %vm598_vm11, %v597_v11, %v595_v7  ;;  %v599_v29 = vsel %vm598_vm11, %v595_v7, %v597_v11 }
 0x21a   : > { %v663_v17 = vsel %vm655_vm10, %v661_v13, %v647_v6  ;;  %v662_v19 = vsel %vm655_vm10, %v660_v10, %v646_v4  ;;  %v613_v32 = vmul.f32 %v5834_v15, %v603_v16  ;;  %v612_v33 = vmul.f32 %v5843_v30, %v599_v29  ;;  %v800_v29 = vld [vmem:[%s7976_s4 + $0x8] sm:$0xff] }
 0x21b   : > { %v5049_v20 = vpack.c.bf16 %v663_v17, %v657_v12  ;;  %v5051_v28 = vpack.c.bf16 %v662_v19, %v656_v18 }
 0x21d   : > { %5050 = vmatprep.subr.bf16.mxu1 %v5049_v20 }
 0x21e   : > { %5052 = vmatpush1.bf16.msra.mxu1 %v5051_v28  ;;  %v799_v28 = vld [vmem:[%s7976_s4] sm:$0xff] }
 0x21f   : > { %4946 = vmatprep.subr.msk.mxu1 %vm650_vm7, %v613_v32  ;;  %v801_v32 = vld [vmem:[%s7976_s4 + $0x10] sm:$0xff] }
 0x221   : > { %v671_v41 = vpop.permute.xlu0 %670 }
 0x222   : > { %4947 = vmatpush1.msk.msra.mxu1 %vm650_vm7, %v612_v33  ;;  %v802_v33 = vld [vmem:[%s7976_s4 + $0x18] sm:$0xff] }
 0x223   : > { %4948 = vmatmul.mubr.msk.f32.vlgmr.msra.gmra.mrb[2].mxu1 %vm683_vm12, %v448_v34 }
 0x224   : > { %772 = vmatprep.mubr.f32.mxu1 %v7994_v5 }
 0x227   : > { %4949 = vmatmul.mubr.msk.f32.gmra.mrb[4].mxu1 %vm683_vm12, %v449_v27 }
 0x228   : > { %778 = vmatprep.mubr.f32.mxu1 %v7994_v5 }
 0x229   : > { %v666_v38 = vpop.permute.xlu1 %665 }
 0x22b   : > { %4950 = vmatmul.mubr.msk.f32.gmra.mrb[6].mxu1 %vm683_vm12, %v450_v35 }
 0x22c   : > { %784 = vmatprep.mubr.f32.mxu1 %v7994_v5 }
 0x22d   : > { %v676_v58 = vpop.permute.xlu1 %675 }
 0x22f   : > { %4951 = vmatmul.mubr.msk.f32.gmra.mrb[8].mxu1 %vm683_vm12, %v451_v36 }
 0x230   : > { %896 = vmatprep.mubr.f32.mxu1 %v7994_v5 }
 0x231   : > { %v681_v8 = vpop.permute.xlu1 %680 }
 0x291   : > { %v805_v34 = vpop.permute.xlu0 %804 }
 0x2f6   : > { %v768_v39 = vpop.f32.mrb[2].mxu1 }
 0x2f7   : > { %v770_v40 = vpop.f32.mrb[3].mxu1  ;;  %v769_v31 = vadd.f32 %v768_v39, %v666_v38 }
 0x2f8   : > { %v771_v42 = vadd.f32 %v770_v40, %v666_v38 }
 0x2f9   : > { %v791_v61 = vmax.f32 %v769_v31, 0.0 }
 0x2fa   : > { %v774_v43 = vpop.f32.mrb[4].mxu1  ;;  %v792_v63 = vmax.f32 %v771_v42, 0.0 }
 0x2fb   : > { %v775_v49 = vadd.f32 %v774_v43, %v671_v41  ;;  %v776_v55 = vpop.f32.mrb[5].mxu1 }
 0x2fc   : > { %v777_v60 = vadd.f32 %v776_v55, %v671_v41  ;;  %v809_v41 = vpop.permute.xlu1 %808 }
 0x2fd   : > { %v793_v62 = vmax.f32 %v775_v49, 0.0 }
 0x2fe   : > { %v794_v4 = vmax.f32 %v777_v60, 0.0  ;;  %v780_v23 = vpop.f32.mrb[6].mxu1 }
 0x2ff   : > { %v5055_v6 = vpack.c.bf16 %v793_v62, %v791_v61  ;;  %v782_v26 = vpop.f32.mrb[7].mxu1  ;;  %v781_v25 = vadd.f32 %v780_v23, %v676_v58 }
 0x300   : > { %v5053_v7 = vpack.c.bf16 %v794_v4, %v792_v63  ;;  %v783_v9 = vadd.f32 %v782_v26, %v676_v58  ;;  %v813_v4 = vpop.permute.xlu1 %812  ;;  %v817_v26 = vpop.permute.xlu0 %816 }
 0x301   : > { %v795_v14 = vmax.f32 %v781_v25, 0.0 }
 0x302   : > { %v786_v10 = vpop.f32.mrb[8].mxu1  ;;  %5054 = vmatprep.subr.bf16.mxu1 %v5053_v7  ;;  %v796_v17 = vmax.f32 %v783_v9, 0.0 }
 0x303   : > { %v787_v11 = vadd.f32 %v786_v10, %v681_v8  ;;  %v788_v12 = vpop.f32.mrb[9].mxu1  ;;  %5056 = vmatpush1.bf16.msra.mxu1 %v5055_v6 }
 0x304   : > { %v789_v13 = vadd.f32 %v788_v12, %v681_v8  ;;  %v1443_v12 = vmul.f32 3.0, %v5667_v0 }
 0x305   : > { %v797_v16 = vmax.f32 %v787_v11, 0.0 }
 0x306   : > { %v798_v18 = vmax.f32 %v789_v13, 0.0  ;;  %v6027_v13 = vld [vmem:[%s7977_s5] sm:$0xff] }
 0x307   : > { %v5059_v19 = vpack.c.bf16 %v797_v16, %v795_v14  ;;  %8034 = vst [vmem:[#allocation7_spill] sm:$0xff] %v6027_v13  ;;  %v1297_v14 = vcombine.high %v6027_v13, %v6027_v13  ;;  %v1444_v16 = vmul.f32 1.442695, %v1443_v12 }
 0x308   : > { %v5057_v20 = vpack.c.bf16 %v798_v18, %v796_v17 }
 0x309   : > { %5475 = vpow2.f32 %v1444_v16 }
 0x30a   : > { %5058 = vmatprep.subr.bf16.mxu1 %v5057_v20 }
 0x30b   : > { %5060 = vmatpush1.bf16.msra.mxu1 %v5059_v19 }
 0x30e   : > { %4952 = vmatmul.mubr.msk.f32.vlgmr.msra.gmra.mrb[10].mxu1 %vm819_vm13, %v799_v28  ;;  %v6050_v28 = vld [vmem:[%s7978_s6 + $0x20] sm:$0xff] }
 0x30f   : > { %902 = vmatprep.mubr.f32.mxu1 %v7994_v5  ;;  %8035 = vst [vmem:[#allocation8_spill] sm:$0xff] %v6050_v28 }
 0x312   : > { %4953 = vmatmul.mubr.msk.f32.gmra.mrb[12].mxu1 %vm819_vm13, %v800_v29 }
 0x313   : > { %908 = vmatprep.mubr.f32.mxu1 %v7994_v5 }
 0x316   : > { %4954 = vmatmul.mubr.msk.f32.gmra.mrb[14].mxu1 %vm819_vm13, %v801_v32  ;;  %v7990_v32 = vmov 2  }
 0x317   : > { %914 = vmatprep.mubr.f32.mxu1 %v7994_v5  ;;  %5442 = vset.pattern.permute.xlu1 %v7990_v32 }
 0x31a   : > { %4955 = vmatmul.mubr.msk.f32.gmra.mrb[16].mxu1 %vm819_vm13, %v802_v33  ;;  %v7988_v33 = vmov 3  }
 0x31b   : > { %1365 = vmatprep.mubr.f32.mxu1 %v1297_v14  ;;  %5443 = vset.pattern.permute.xlu0 %v7988_v33 }
 0x3e1   : > { %v898_v27 = vpop.f32.mrb[10].mxu1 }
 0x3e2   : > { %v899_v35 = vadd.f32 %v898_v27, %v805_v34  ;;  %v900_v36 = vpop.f32.mrb[11].mxu1 }
 0x3e3   : > { %v901_v38 = vadd.f32 %v900_v36, %v805_v34  ;;  %v1529_v34 = vmul.f32 1.442695, %v6050_v28 }
 0x3e4   : > { %v5895_v39 = vmax.f32 %v899_v35, 0.0  ;;  %v5476_v35 = vpop.eup %5475 }
 0x3e5   : > { %v5897_v40 = vmax.f32 %v901_v38, 0.0  ;;  %v904_v31 = vpop.f32.mrb[12].mxu1  ;;  %5477 = vpow2.f32 %v1529_v34 }
 0x3e6   : > { %v905_v42 = vadd.f32 %v904_v31, %v809_v41  ;;  %v906_v43 = vpop.f32.mrb[13].mxu1  ;;  %951 = vrot.lane.b32.xlu1 %v5895_v39, %s5591_s26 }
 0x3e7   : > { %1117 = vrot.lane.b32.xlu0 %v5897_v40, %s5592_s27  ;;  %v907_v62 = vadd.f32 %v906_v43, %v809_v41 }
 0x3e8   : > { %v5903_v49 = vmax.f32 %v905_v42, 0.0 }
 0x3e9   : > { %v910_v55 = vpop.f32.mrb[14].mxu1  ;;  %v5921_v63 = vmax.f32 %v907_v62, 0.0 }
 0x3ea   : > { %v912_v58 = vpop.f32.mrb[15].mxu1  ;;  %995 = vrot.lane.b32.xlu1 %v5895_v39, %s5590_s25  ;;  %v911_v23 = vadd.f32 %v910_v55, %v813_v4 }
 0x3eb   : > { %953 = vrot.lane.b32.xlu0 %v5903_v49, %s5591_s26  ;;  %v913_v6 = vadd.f32 %v912_v58, %v813_v4 }
 0x3ec   : > { %v5943_v7 = vmax.f32 %v911_v23, 0.0 }
 0x3ed   : > { %v916_v60 = vpop.f32.mrb[16].mxu1  ;;  %v5945_v25 = vmax.f32 %v913_v6, 0.0 }
 0x3ee   : > { %v918_v61 = vpop.f32.mrb[17].mxu1  ;;  %1039 = vrot.lane.b32.xlu1 %v5895_v39, %s5589_s24  ;;  %v917_v8 = vadd.f32 %v916_v60, %v817_v26 }
 0x3ef   : > { %997 = vrot.lane.b32.xlu0 %v5903_v49, %s5590_s25  ;;  %v919_v10 = vadd.f32 %v918_v61, %v817_v26  ;;  %v5478_v43 = vpop.eup %5477 }
 0x3f0   : > { %v5951_v9 = vmax.f32 %v917_v8, 0.0 }
 0x3f1   : > { %v5969_v11 = vmax.f32 %v919_v10, 0.0 }
 0x3f2   : > { %1083 = vrot.lane.b32.xlu1 %v5895_v39, %s5593_s28 }
 0x3f3   : > { %1041 = vrot.lane.b32.xlu0 %v5903_v49, %s5589_s24 }
 0x3f6   : > { %1115 = vrot.lane.b32.xlu1 %v5895_v39, %s5592_s27 }
 0x3f7   : > { %1085 = vrot.lane.b32.xlu0 %v5903_v49, %s5593_s28 }
 0x3fa   : > { %935 = vrot.lane.b32.xlu1 %v5897_v40, %s5591_s26 }
 0x3fb   : > { %937 = vrot.lane.b32.xlu0 %v5921_v63, %s5591_s26 }
 0x3fe   : > { %983 = vrot.lane.b32.xlu1 %v5897_v40, %s5590_s25 }
 0x3ff   : > { %985 = vrot.lane.b32.xlu0 %v5921_v63, %s5590_s25 }
 0x402   : > { %1027 = vrot.lane.b32.xlu1 %v5897_v40, %s5589_s24 }
 0x403   : > { %1029 = vrot.lane.b32.xlu0 %v5921_v63, %s5589_s24 }
 0x406   : > { %1071 = vrot.lane.b32.xlu1 %v5897_v40, %s5593_s28 }
 0x407   : > { %1073 = vrot.lane.b32.xlu0 %v5921_v63, %s5593_s28 }
 0x40a   : > { %1119 = vrot.lane.b32.xlu1 %v5903_v49, %s5592_s27 }
 0x40b   : > { %1121 = vrot.lane.b32.xlu0 %v5921_v63, %s5592_s27 }
 0x40e   : > { %955 = vrot.lane.b32.xlu1 %v5943_v7, %s5591_s26 }
 0x40f   : > { %1125 = vrot.lane.b32.xlu0 %v5945_v25, %s5592_s27 }
 0x412   : > { %999 = vrot.lane.b32.xlu1 %v5943_v7, %s5590_s25 }
 0x413   : > { %957 = vrot.lane.b32.xlu0 %v5951_v9, %s5591_s26 }
 0x416   : > { %1043 = vrot.lane.b32.xlu1 %v5943_v7, %s5589_s24 }
 0x417   : > { %1001 = vrot.lane.b32.xlu0 %v5951_v9, %s5590_s25 }
 0x41a   : > { %1087 = vrot.lane.b32.xlu1 %v5943_v7, %s5593_s28 }
 0x41b   : > { %1045 = vrot.lane.b32.xlu0 %v5951_v9, %s5589_s24 }
 0x41e   : > { %1123 = vrot.lane.b32.xlu1 %v5943_v7, %s5592_s27 }
 0x41f   : > { %1089 = vrot.lane.b32.xlu0 %v5951_v9, %s5593_s28 }
 0x422   : > { %939 = vrot.lane.b32.xlu1 %v5945_v25, %s5591_s26 }
 0x423   : > { %941 = vrot.lane.b32.xlu0 %v5969_v11, %s5591_s26 }
 0x426   : > { %1159 = vrot.lane.b32.xlu1 %v5895_v39, %s5594_s29 }
 0x427   : > { %1161 = vrot.lane.b32.xlu0 %v5897_v40, %s5594_s29 }
 0x42a   : > { %987 = vrot.lane.b32.xlu1 %v5945_v25, %s5590_s25 }
 0x42b   : > { %989 = vrot.lane.b32.xlu0 %v5969_v11, %s5590_s25 }
 0x42e   : > { %1031 = vrot.lane.b32.xlu1 %v5945_v25, %s5589_s24 }
 0x42f   : > { %1165 = vrot.lane.b32.xlu0 %v5921_v63, %s5594_s29 }
 0x432   : > { %1075 = vrot.lane.b32.xlu1 %v5945_v25, %s5593_s28 }
 0x433   : > { %1033 = vrot.lane.b32.xlu0 %v5969_v11, %s5589_s24 }
 0x436   : > { %1127 = vrot.lane.b32.xlu1 %v5951_v9, %s5592_s27 }
 0x437   : > { %1169 = vrot.lane.b32.xlu0 %v5945_v25, %s5594_s29 }
 0x43a   : > { %1163 = vrot.lane.b32.xlu1 %v5903_v49, %s5594_s29 }
 0x43b   : > { %1077 = vrot.lane.b32.xlu0 %v5969_v11, %s5593_s28 }
 0x43e   : > { %1167 = vrot.lane.b32.xlu1 %v5943_v7, %s5594_s29 }
 0x43f   : > { %1205 = vrot.lane.b32.xlu0 %v5897_v40, %s5595_s30 }
 0x442   : > { %1171 = vrot.lane.b32.xlu1 %v5951_v9, %s5594_s29 }
 0x443   : > { %1209 = vrot.lane.b32.xlu0 %v5921_v63, %s5595_s30 }
 0x446   : > { %1203 = vrot.lane.b32.xlu1 %v5895_v39, %s5595_s30 }
 0x447   : > { %1213 = vrot.lane.b32.xlu0 %v5945_v25, %s5595_s30 }
 0x44a   : > { %1207 = vrot.lane.b32.xlu1 %v5903_v49, %s5595_s30 }
 0x44b   : > { %1129 = vrot.lane.b32.xlu0 %v5969_v11, %s5592_s27 }
 0x44e   : > { %1211 = vrot.lane.b32.xlu1 %v5943_v7, %s5595_s30 }
 0x44f   : > { %1249 = vrot.lane.b32.xlu0 %v5897_v40, %s5596_s10 }
 0x452   : > { %1215 = vrot.lane.b32.xlu1 %v5951_v9, %s5595_s30 }
 0x453   : > { %1173 = vrot.lane.b32.xlu0 %v5969_v11, %s5594_s29 }
 0x456   : > { %1247 = vrot.lane.b32.xlu1 %v5895_v39, %s5596_s10 }
 0x457   : > { %1253 = vrot.lane.b32.xlu0 %v5921_v63, %s5596_s10 }
 0x458   : > { %v952_v17 = vpop.permute.xlu1 %951 }
 0x459   : > { %v6035_v18 = vpop.permute.xlu0 %1117 }
 0x45a   : > { %1251 = vrot.lane.b32.xlu1 %v5903_v49, %s5596_s10 }
 0x45b   : > { %1217 = vrot.lane.b32.xlu0 %v5969_v11, %s5595_s30 }
 0x45c   : > { %v6041_v19 = vpop.permute.xlu1 %995 }
 0x45d   : > { %v954_v20 = vpop.permute.xlu0 %953 }
 0x45e   : > { %1255 = vrot.lane.b32.xlu1 %v5943_v7, %s5596_s10 }
 0x45f   : > { %1257 = vrot.lane.b32.xlu0 %v5945_v25, %s5596_s10 }
 0x460   : > { %v6052_v29 = vpop.permute.xlu1 %1039 }
 0x461   : > { %v998_v27 = vpop.permute.xlu0 %997 }
 0x462   : > { %1259 = vrot.lane.b32.xlu1 %v5951_v9, %s5596_s10 }
 0x463   : > { %1261 = vrot.lane.b32.xlu0 %v5969_v11, %s5596_s10 }
 0x464   : > { %v6061_v36 = vpop.permute.xlu1 %1083 }
 0x465   : > { %v6063_v38 = vpop.permute.xlu0 %1041 }
 0x466   : > { %1292 = vperm.xlu1 %5442, %v5667_v0  }
 0x467   : > { %1448 = vperm.xlu0 %5443, %v5476_v35  }
 0x468   : > { %v6066_v41 = vpop.permute.xlu1 %1115 }
 0x469   : > { %v6068_v31 = vpop.permute.xlu0 %1085 }
 0x46a   : > { %5444 = vset.pattern.permute.xlu1 %v7984_v1 }
 0x46b   : > { %1524 = vperm.xlu1 %5444, %v6050_v28   ;;  %5446 = vset.pattern.permute.xlu0 %v7982_v24 }
 0x46c   : > { %v936_v42 = vpop.permute.xlu1 %935 }
 0x46d   : > { %v959_v55 = vsel %vm459_vm6, %v952_v17, %v936_v42  ;;  %v971_v58 = vsel %vm459_vm6, %v936_v42, %v952_v17  ;;  %v938_v60 = vpop.permute.xlu0 %937 }
 0x46e   : > { %v975_v0 = vmul.f32 %v971_v58, %v5764_v44  ;;  %v976_v61 = vmul.f32 %v959_v55, %v5766_v45  ;;  %v960_v62 = vsel %vm459_vm6, %v954_v20, %v938_v60  ;;  %v972_v4 = vsel %vm459_vm6, %v938_v60, %v954_v20 }
 0x46f   : > { %v977_v23 = vmul.f32 %v972_v4, %v5764_v44  ;;  %v978_v6 = vmul.f32 %v960_v62, %v5766_v45  ;;  %5445 = vset.pattern.permute.xlu1 %v7986_v3 }
 0x470   : > { %v984_v26 = vpop.permute.xlu1 %983  ;;  %1533 = vperm.xlu1 %5445, %v5478_v43  }
 0x471   : > { %v5063_v8 = vpack.c.bf16 %v977_v23, %v975_v0  ;;  %v986_v10 = vpop.permute.xlu0 %985  ;;  %v5061_v12 = vpack.c.bf16 %v978_v6, %v976_v61  ;;  %v1003_v6 = vsel %vm479_vm3, %v6041_v19, %v984_v26 }
 0x472   : > { %v1016_v1 = vsel %vm479_vm3, %v986_v10, %v998_v27  ;;  %v1020_v21 = vmul.f32 %v1003_v6, %v5770_v47 }
 0x473   : > { %5062 = vmatprep.subr.bf16.mxu1 %v5061_v12 }
 0x474   : > { %5064 = vmatpush1.bf16.msra.mxu1 %v5063_v8  ;;  %v1028_v14 = vpop.permute.xlu1 %1027  ;;  %5447 = vset.pattern.permute.xlu1 %v7982_v24  ;;  %v1004_v8 = vsel %vm479_vm3, %v998_v27, %v986_v10  ;;  %v1015_v24 = vsel %vm479_vm3, %v984_v26, %v6041_v19  ;;  %v1021_v10 = vmul.f32 %v1016_v1, %v5768_v46 }
 0x475   : > { %v1030_v16 = vpop.permute.xlu0 %1029  ;;  %v1022_v13 = vmul.f32 %v1004_v8, %v5770_v47  ;;  %v1019_v26 = vmul.f32 %v1015_v24, %v5768_v46  ;;  %v1047_v6 = vsel %vm499_vm5, %v6052_v29, %v1028_v14  ;;  %v1059_v1 = vsel %vm499_vm5, %v1028_v14, %v6052_v29 }
 0x476   : > { %v1060_v24 = vsel %vm499_vm5, %v1030_v16, %v6063_v38 }
 0x478   : > { %v6083_v17 = vpop.permute.xlu1 %1071 }
 0x479   : > { %v6085_v20 = vpop.permute.xlu0 %1073 }
 0x47c   : > { %v6087_v34 = vpop.permute.xlu1 %1119 }
 0x47d   : > { %v6089_v35 = vpop.permute.xlu0 %1121 }
 0x480   : > { %v956_v42 = vpop.permute.xlu1 %955 }
 0x481   : > { %v6091_v55 = vpop.permute.xlu0 %1125 }
 0x484   : > { %v1000_v43 = vpop.permute.xlu1 %999 }
 0x485   : > { %v958_v58 = vpop.permute.xlu0 %957 }
 0x488   : > { %v1044_v60 = vpop.permute.xlu1 %1043 }
 0x489   : > { %v1002_v0 = vpop.permute.xlu0 %1001 }
 0x48c   : > { %v6093_v61 = vpop.permute.xlu1 %1087 }
 0x48d   : > { %v6095_v62 = vpop.permute.xlu0 %1045 }
 0x490   : > { %v6097_v4 = vpop.permute.xlu1 %1123 }
 0x491   : > { %v6099_v23 = vpop.permute.xlu0 %1089 }
 0x494   : > { %v940_v12 = vpop.permute.xlu1 %939 }
 0x495   : > { %v961_v3 = vsel %vm459_vm6, %v956_v42, %v940_v12  ;;  %v973_v33 = vsel %vm459_vm6, %v940_v12, %v956_v42  ;;  %v942_v32 = vpop.permute.xlu0 %941 }
 0x496   : > { %v979_v37 = vmul.f32 %v973_v33, %v5764_v44  ;;  %v980_v5 = vmul.f32 %v961_v3, %v5766_v45  ;;  %v962_v28 = vsel %vm459_vm6, %v958_v58, %v942_v32  ;;  %v974_v22 = vsel %vm459_vm6, %v942_v32, %v958_v58 }
 0x497   : > { %v981_v19 = vmul.f32 %v974_v22, %v5764_v44  ;;  %v982_v27 = vmul.f32 %v962_v28, %v5766_v45  ;;  %v5069_v32 = vpack.c.bf16 %v1022_v13, %v1020_v21  ;;  %v5071_v58 = vpack.c.bf16 %v1021_v10, %v1019_v26 }
 0x498   : > { %v6119_v42 = vpop.permute.xlu1 %1159  ;;  %v1048_v22 = vsel %vm499_vm5, %v6063_v38, %v1030_v16  ;;  %v1064_v26 = vmul.f32 %v1047_v6, %v5774_v50  ;;  %v1065_v10 = vmul.f32 %v1060_v24, %v5772_v48  ;;  %v1092_v6 = vsel %vm519_vm8, %v6068_v31, %v6085_v20 }
 0x499   : > { %v5067_v33 = vpack.c.bf16 %v981_v19, %v979_v37  ;;  %v6121_v3 = vpop.permute.xlu0 %1161  ;;  %v5065_v12 = vpack.c.bf16 %v982_v27, %v980_v5  ;;  %v1066_v29 = vmul.f32 %v1048_v22, %v5774_v50 }
 0x49b   : > { %5066 = vmatprep.subr.bf16.mxu1 %v5065_v12  ;;  %v5077_v22 = vpack.c.bf16 %v1066_v29, %v1064_v26 }
 0x49c   : > { %5068 = vmatpush1.bf16.msra.mxu1 %v5067_v33  ;;  %v988_v28 = vpop.permute.xlu1 %987 }
 0x49d   : > { %v1005_v37 = vsel %vm479_vm3, %v1000_v43, %v988_v28  ;;  %v1017_v5 = vsel %vm479_vm3, %v988_v28, %v1000_v43  ;;  %v990_v21 = vpop.permute.xlu0 %989  ;;  %5070 = vmatprep.subr.bf16.mxu1 %v5069_v32  ;;  %v1063_v43 = vmul.f32 %v1059_v1, %v5772_v48 }
 0x49e   : > { %v1023_v13 = vmul.f32 %v1017_v5, %v5768_v46  ;;  %v1024_v8 = vmul.f32 %v1005_v37, %v5770_v47  ;;  %v1006_v19 = vsel %vm479_vm3, %v1002_v0, %v990_v21  ;;  %v1018_v27 = vsel %vm479_vm3, %v990_v21, %v1002_v0 }
 0x49f   : > { %v1025_v38 = vmul.f32 %v1018_v27, %v5768_v46  ;;  %v1026_v14 = vmul.f32 %v1006_v19, %v5770_v47  ;;  %v1091_v0 = vsel %vm519_vm8, %v6061_v36, %v6083_v17  ;;  %v5079_v24 = vpack.c.bf16 %v1065_v10, %v1063_v43 }
 0x4a0   : > { %5072 = vmatpush1.bf16.msra.mxu1 %v5071_v58  ;;  %v1032_v16 = vpop.permute.xlu1 %1031  ;;  %v1103_v37 = vsel %vm519_vm8, %v6083_v17, %v6061_v36  ;;  %v1108_v5 = vmul.f32 %v1091_v0, %v5778_v52 }
 0x4a1   : > { %v5075_v33 = vpack.c.bf16 %v1025_v38, %v1023_v13  ;;  %v6143_v12 = vpop.permute.xlu0 %1165  ;;  %v5073_v32 = vpack.c.bf16 %v1026_v14, %v1024_v8  ;;  %v1049_v58 = vsel %vm499_vm5, %v1044_v60, %v1032_v16  ;;  %v1061_v28 = vsel %vm499_vm5, %v1032_v16, %v1044_v60 }
 0x4a2   : > { %v1104_v13 = vsel %vm519_vm8, %v6085_v20, %v6068_v31  ;;  %v1110_v8 = vmul.f32 %v1092_v6, %v5778_v52  ;;  %v1067_v27 = vmul.f32 %v1061_v28, %v5772_v48  ;;  %v1068_v36 = vmul.f32 %v1049_v58, %v5774_v50 }
 0x4a3   : > { %5074 = vmatprep.subr.bf16.mxu1 %v5073_v32  ;;  %v1107_v14 = vmul.f32 %v1103_v37, %v5776_v51  ;;  %v1109_v16 = vmul.f32 %v1104_v13, %v5776_v51  ;;  %v5093_v13 = vpack.c.bf16 %v5921_v63, %v5897_v40  ;;  %v5097_v63 = vpack.c.bf16 %v5969_v11, %v5945_v25 }
 0x4a4   : > { %5076 = vmatpush1.bf16.msra.mxu1 %v5075_v33  ;;  %v1076_v1 = vpop.permute.xlu1 %1075 }
 0x4a5   : > { %v1034_v21 = vpop.permute.xlu0 %1033  ;;  %5078 = vmatprep.subr.bf16.mxu1 %v5077_v22  ;;  %v1093_v43 = vsel %vm519_vm8, %v6093_v61, %v1076_v1  ;;  %v1105_v10 = vsel %vm519_vm8, %v1076_v1, %v6093_v61  ;;  %v5087_v0 = vpack.c.bf16 %v1109_v16, %v1107_v14 }
 0x4a6   : > { %v1050_v60 = vsel %vm499_vm5, %v6095_v62, %v1034_v21  ;;  %v1062_v19 = vsel %vm499_vm5, %v1034_v21, %v6095_v62  ;;  %v5085_v62 = vpack.c.bf16 %v1110_v8, %v1108_v5  ;;  %v1111_v58 = vmul.f32 %v1105_v10, %v5776_v51 }
 0x4a7   : > { %v1069_v17 = vmul.f32 %v1062_v19, %v5772_v48  ;;  %v1070_v26 = vmul.f32 %v1050_v60, %v5774_v50  ;;  %v1112_v28 = vmul.f32 %v1093_v43, %v5778_v52  ;;  %v1147_v19 = vsel %vm538_vm2, %v6035_v18, %v6066_v41 }
 0x4a8   : > { %5080 = vmatpush1.bf16.msra.mxu1 %v5079_v24  ;;  %v1128_v29 = vpop.permute.xlu1 %1127 }
 0x4a9   : > { %v5083_v38 = vpack.c.bf16 %v1069_v17, %v1067_v27  ;;  %v6169_v31 = vpop.permute.xlu0 %1169  ;;  %v5081_v20 = vpack.c.bf16 %v1070_v26, %v1068_v36  ;;  %v1132_v27 = vsel %vm538_vm2, %v6087_v34, %v6089_v35  ;;  %v5095_v36 = vpack.c.bf16 %v5903_v49, %v5895_v39 }
 0x4aa   : > { %v1131_v17 = vsel %vm538_vm2, %v6066_v41, %v6035_v18  ;;  %v1133_v39 = vsel %vm538_vm2, %v6097_v4, %v6091_v55  ;;  %v5099_v49 = vpack.c.bf16 %v5951_v9, %v5943_v7  ;;  %v1149_v18 = vsel %vm538_vm2, %v6091_v55, %v6097_v4 }
 0x4ab   : > { %5082 = vmatprep.subr.bf16.mxu1 %v5081_v20  ;;  %v1153_v20 = vmul.f32 %v1132_v27, %v5780_v53  ;;  %v1151_v25 = vmul.f32 %v1131_v17, %v5780_v53  ;;  %v1155_v16 = vmul.f32 %v1133_v39, %v5780_v53  ;;  %v1191_v7 = vsel %vm558_vm4, %v6121_v3, %v6119_v42 }
 0x4ac   : > { %5084 = vmatpush1.bf16.msra.mxu1 %v5083_v38  ;;  %v1164_v33 = vpop.permute.xlu1 %1163  ;;  %v1152_v38 = vmul.f32 %v1147_v19, %v5782_v54  ;;  %v1156_v4 = vmul.f32 %v1149_v18, %v5782_v54 }
 0x4ad   : > { %v1078_v32 = vpop.permute.xlu0 %1077  ;;  %5086 = vmatprep.subr.bf16.mxu1 %v5085_v62  ;;  %v1192_v41 = vsel %vm558_vm4, %v6143_v12, %v1164_v33  ;;  %v1176_v9 = vsel %vm558_vm4, %v1164_v33, %v6143_v12  ;;  %v1196_v12 = vmul.f32 %v1191_v7, %v5786_v57 }
 0x4ae   : > { %v1094_v6 = vsel %vm519_vm8, %v6099_v23, %v1078_v32  ;;  %v1106_v22 = vsel %vm519_vm8, %v1078_v32, %v6099_v23  ;;  %v1148_v23 = vsel %vm538_vm2, %v6089_v35, %v6087_v34  ;;  %v5103_v35 = vpack.c.bf16 %v1153_v20, %v1151_v25 }
 0x4af   : > { %v1113_v24 = vmul.f32 %v1106_v22, %v5776_v51  ;;  %v1114_v37 = vmul.f32 %v1094_v6, %v5778_v52  ;;  %v1154_v40 = vmul.f32 %v1148_v23, %v5782_v54  ;;  %v1198_v10 = vmul.f32 %v1192_v41, %v5786_v57 }
 0x4b0   : > { %5088 = vmatpush1.bf16.msra.mxu1 %v5087_v0  ;;  %v1168_v61 = vpop.permute.xlu1 %1167  ;;  %v1175_v6 = vsel %vm558_vm4, %v6119_v42, %v6121_v3  ;;  %v1197_v33 = vmul.f32 %v1176_v9, %v5784_v56 }
 0x4b1   : > { %v5091_v1 = vpack.c.bf16 %v1113_v24, %v1111_v58  ;;  %v6185_v5 = vpop.permute.xlu0 %1205  ;;  %v5089_v21 = vpack.c.bf16 %v1114_v37, %v1112_v28  ;;  %v5101_v11 = vpack.c.bf16 %v1154_v40, %v1152_v38  ;;  %v1177_v24 = vsel %vm558_vm4, %v1168_v61, %v6169_v31 }
 0x4b2   : > { %v1195_v37 = vmul.f32 %v1175_v6, %v5784_v56  ;;  %v1199_v23 = vmul.f32 %v1177_v24, %v5784_v56 }
 0x4b3   : > { %5090 = vmatprep.subr.bf16.mxu1 %v5089_v21  ;;  %v1193_v21 = vsel %vm558_vm4, %v6169_v31, %v1168_v61 }
 0x4b4   : > { %5092 = vmatpush1.bf16.msra.mxu1 %v5091_v1  ;;  %v1172_v8 = vpop.permute.xlu1 %1171  ;;  %v5109_v1 = vpack.c.bf16 %v1198_v10, %v1196_v12  ;;  %v1200_v31 = vmul.f32 %v1193_v21, %v5786_v57 }
 0x4b5   : > { %v1210_v60 = vpop.permute.xlu0 %1209  ;;  %5094 = vmatprep.subr.bf16.mxu1 %v5093_v13  ;;  %v5111_v13 = vpack.c.bf16 %v1197_v33, %v1195_v37 }
 0x4b8   : > { %5096 = vmatpush1.bf16.msra.mxu1 %v5095_v36  ;;  %v1204_v26 = vpop.permute.xlu1 %1203 }
 0x4b9   : > { %v1214_v14 = vpop.permute.xlu0 %1213  ;;  %5098 = vmatprep.subr.bf16.mxu1 %v5097_v63  ;;  %v1235_v27 = vsel %vm578_vm9, %v6185_v5, %v1204_v26  ;;  %v1219_v20 = vsel %vm578_vm9, %v1204_v26, %v6185_v5 }
 0x4ba   : > { %v1239_v41 = vmul.f32 %v1219_v20, %v5789_v59  ;;  %v930_v20 = vld [vmem:[%s7977_s5 + $0x8] sm:$0xf] }
 0x4bc   : > { %5100 = vmatpush1.bf16.msra.mxu1 %v5099_v49  ;;  %v1208_v34 = vpop.permute.xlu1 %1207  ;;  %v1240_v49 = vmul.f32 %v1235_v27, %v5794_v2 }
 0x4bd   : > { %v1130_v62 = vpop.permute.xlu0 %1129  ;;  %5102 = vmatprep.subr.bf16.mxu1 %v5101_v11  ;;  %v1236_v42 = vsel %vm578_vm9, %v1210_v60, %v1208_v34  ;;  %v1220_v36 = vsel %vm578_vm9, %v1208_v34, %v1210_v60 }
 0x4be   : > { %v1134_v43 = vsel %vm538_vm2, %v1128_v29, %v1130_v62  ;;  %v1150_v55 = vsel %vm538_vm2, %v1130_v62, %v1128_v29  ;;  %v1242_v61 = vmul.f32 %v1236_v42, %v5794_v2  ;;  %v1241_v60 = vmul.f32 %v1220_v36, %v5789_v59 }
 0x4bf   : > { %v1157_v32 = vmul.f32 %v1134_v43, %v5780_v53  ;;  %v1158_v0 = vmul.f32 %v1150_v55, %v5782_v54 }
 0x4c0   : > { %5104 = vmatpush1.bf16.msra.mxu1 %v5103_v35  ;;  %v1212_v22 = vpop.permute.xlu1 %1211  ;;  %v5117_v35 = vpack.c.bf16 %v1242_v61, %v1240_v49  ;;  %v5119_v5 = vpack.c.bf16 %v1241_v60, %v1239_v41  ;;  %v8037_v61 = vmov 0.0  }
 0x4c1   : > { %v5107_v58 = vpack.c.bf16 %v1157_v32, %v1155_v16  ;;  %v1250_v29 = vpop.permute.xlu0 %1249  ;;  %v5105_v28 = vpack.c.bf16 %v1158_v0, %v1156_v4  ;;  %v1221_v18 = vsel %vm578_vm9, %v1212_v22, %v1214_v14  ;;  %v1237_v34 = vsel %vm578_vm9, %v1214_v14, %v1212_v22 }
 0x4c2   : > { %v1243_v26 = vmul.f32 %v1221_v18, %v5789_v59  ;;  %v1244_v9 = vmul.f32 %v1237_v34, %v5794_v2 }
 0x4c3   : > { %5106 = vmatprep.subr.bf16.mxu1 %v5105_v28 }
 0x4c4   : > { %5108 = vmatpush1.bf16.msra.mxu1 %v5107_v58  ;;  %v1216_v3 = vpop.permute.xlu1 %1215 }
 0x4c5   : > { %v1174_v19 = vpop.permute.xlu0 %1173  ;;  %5110 = vmatprep.subr.bf16.mxu1 %v5109_v1 }
 0x4c6   : > { %v1178_v40 = vsel %vm558_vm4, %v1172_v8, %v1174_v19  ;;  %v1194_v63 = vsel %vm558_vm4, %v1174_v19, %v1172_v8 }
 0x4c7   : > { %v1201_v17 = vmul.f32 %v1178_v40, %v5784_v56  ;;  %v1202_v38 = vmul.f32 %v1194_v63, %v5786_v57 }
 0x4c8   : > { %5112 = vmatpush1.bf16.msra.mxu1 %v5111_v13  ;;  %v1248_v39 = vpop.permute.xlu1 %1247 }
 0x4c9   : > { %v5115_v25 = vpack.c.bf16 %v1201_v17, %v1199_v23  ;;  %v1254_v11 = vpop.permute.xlu0 %1253  ;;  %v5113_v8 = vpack.c.bf16 %v1202_v38, %v1200_v31  ;;  %v1279_v43 = vsel %vm598_vm11, %v1250_v29, %v1248_v39  ;;  %v1263_v22 = vsel %vm598_vm11, %v1248_v39, %v1250_v29  ;;  %v8036_v31 = vld [vmem:[#allocation7_spill] sm:$0xff] }
 0x4ca   : > { %v1284_v12 = vmul.f32 %v5834_v15, %v1279_v43  ;;  %v1283_v1 = vmul.f32 %v5843_v30, %v1263_v22 }
 0x4cb   : > { %5114 = vmatprep.subr.bf16.mxu1 %v5113_v8 }
 0x4cc   : > { %5116 = vmatpush1.bf16.msra.mxu1 %v5115_v25  ;;  %v1252_v16 = vpop.permute.xlu1 %1251 }
 0x4cd   : > { %v1280_v62 = vsel %vm598_vm11, %v1254_v11, %v1252_v16  ;;  %v1218_v7 = vpop.permute.xlu0 %1217  ;;  %5118 = vmatprep.subr.bf16.mxu1 %v5117_v35  ;;  %v1264_v14 = vsel %vm598_vm11, %v1252_v16, %v1254_v11 }
 0x4ce   : > { %v1222_v55 = vsel %vm578_vm9, %v1216_v3, %v1218_v7  ;;  %v1238_v4 = vsel %vm578_vm9, %v1218_v7, %v1216_v3  ;;  %v1286_v10 = vmul.f32 %v5834_v15, %v1280_v62  ;;  %v1285_v24 = vmul.f32 %v5843_v30, %v1264_v14  ;;  %v8039_v7 = vld [vmem:[#allocation6_spill] sm:$0xff] }
 0x4cf   : > { %v1245_v32 = vmul.f32 %v1222_v55, %v5789_v59  ;;  %v1246_v0 = vmul.f32 %v1238_v4, %v5794_v2 }
 0x4d0   : > { %5120 = vmatpush1.bf16.msra.mxu1 %v5119_v5  ;;  %v1256_v6 = vpop.permute.xlu1 %1255  ;;  %v5125_v37 = vpack.c.bf16 %v1286_v10, %v1284_v12  ;;  %v5127_v29 = vpack.c.bf16 %v1285_v24, %v1283_v1  ;;  %v8038_v5 = vld [vmem:[#allocation5_spill] sm:$0xff] }
 0x4d1   : > { %v5123_v33 = vpack.c.bf16 %v1245_v32, %v1243_v26  ;;  %v1258_v58 = vpop.permute.xlu0 %1257  ;;  %v5121_v28 = vpack.c.bf16 %v1246_v0, %v1244_v9 }
 0x4d2   : > { %v1265_v21 = vsel %vm598_vm11, %v1256_v6, %v1258_v58  ;;  %v1281_v42 = vsel %vm598_vm11, %v1258_v58, %v1256_v6 }
 0x4d3   : > { %5122 = vmatprep.subr.bf16.mxu1 %v5121_v28  ;;  %v1287_v27 = vmul.f32 %v5843_v30, %v1265_v21  ;;  %v1288_v36 = vmul.f32 %v5834_v15, %v1281_v42 }
 0x4d4   : > { %5124 = vmatpush1.bf16.msra.mxu1 %v5123_v33  ;;  %v1260_v3 = vpop.permute.xlu1 %1259 }
 0x4d5   : > { %v1262_v13 = vpop.permute.xlu0 %1261  ;;  %5126 = vmatprep.subr.bf16.mxu1 %v5125_v37 }
 0x4d6   : > { %v1266_v23 = vsel %vm598_vm11, %v1260_v3, %v1262_v13  ;;  %v1282_v19 = vsel %vm598_vm11, %v1262_v13, %v1260_v3 }
 0x4d7   : > { %v1289_v40 = vmul.f32 %v5843_v30, %v1266_v23  ;;  %v1290_v63 = vmul.f32 %v5834_v15, %v1282_v19  ;;  %1366 = vmatmul.mubr.f32.vlgmr.msra.gmra.mrb[18].mxu1 %v8036_v31 }
 0x4d8   : > { %5128 = vmatpush1.bf16.msra.mxu1 %v5127_v29  ;;  %1436 = vmatprep.mubr.f32.mxu1 %v8037_v61 }
 0x4d9   : > { %v5131_v17 = vpack.c.bf16 %v1289_v40, %v1287_v27  ;;  %v5129_v38 = vpack.c.bf16 %v1290_v63, %v1288_v36 }
 0x4db   : > { %5130 = vmatprep.subr.bf16.mxu1 %v5129_v38 }
 0x4dc   : > { %5132 = vmatpush1.bf16.msra.mxu1 %v5131_v17 }
 0x4df   : > { %4956 = vmatmul.mubr.msk.f32.vlgmr.msra.gmra.mrb[18].mxu1 %vm819_vm13, %v930_v20 }
 0x4e0   : > { %2715 = vmatprep.mubr.f32.mxu1 %v8037_v61 }
 0x4e5   : > { %v1293_v30 = vpop.permute.xlu1 %1292 }
 0x4e6   : > { %v1449_v15 = vpop.permute.xlu0 %1448 }
 0x5b2   : > { %v1438_v39 = vpop.f32.mrb[18].mxu1 }
 0x5b3   : > { %v5385_v49 = vadd.f32 %v1438_v39, %v1293_v30  ;;  %v1440_v60 = vpop.f32.mrb[19].mxu1 }
 0x5b4   : > { %v5386_v25 = vadd.f32 %v1440_v60, %v1293_v30  ;;  %v1525_v30 = vpop.permute.xlu1 %1524 }
 0x5b5   : > { %v1451_v11 = vmul.f32 %v5385_v49, %v1449_v15 }
 0x5b6   : > { %v1452_v8 = vmul.f32 %v5386_v25, %v1449_v15 }
 0x5b7   : > { %v1453_v18 = vadd.f32 2.0, %v1451_v11  ;;  %v1483_v41 = vrot.slane %v1451_v11, 6 }
 0x5b8   : > { %v1454_v34 = vadd.f32 2.0, %v1452_v8  ;;  %v1484_v35 = vrot.slane %v1452_v8, 6  ;;  %v1534_v8 = vpop.permute.xlu1 %1533 }
 0x5b9   : > { %v1455_v16 = vsub.f32 0.0, %v1453_v18  ;;  %v1487_v26 = vadd.f32 %v1483_v41, %v8038_v5 }
 0x5ba   : > { %v1456_v62 = vsub.f32 0.0, %v1454_v34  ;;  %v1488_v9 = vadd.f32 %v1484_v35, %v8039_v7 }
 0x5bb   : > { %v1457_v43 = vmax.f32 %v1455_v16, 0.0 }
 0x5bc   : > { %v1458_v55 = vmax.f32 %v1456_v62, 0.0 }
 0x5bd   : > { %v1459_v4 = vsub.f32 0.0, %v1457_v43  ;;  %v1465_v14 = vsub.f32 %v1455_v16, %v1457_v43  ;;  %v4961_v16 = vld [vmem:[%s7974_s2 + $0x4] sm:$0xf] }
 0x5be   : > { %v1460_v10 = vsub.f32 0.0, %v1458_v55  ;;  %v1466_v32 = vsub.f32 %v1456_v62, %v1458_v55  ;;  %v8043_v62 = vld [vmem:[#allocation8_spill] sm:$0xff] }
 0x5bf   : > { %v1461_v0 = vmul.f32 1.442695, %v1459_v4  ;;  %v1467_v6 = vmul.f32 1.442695, %v1465_v14  ;;  %v8045_v4 = vmov 2   ;;  %v8046_v14 = vmov 3  }
 0x5c0   : > { %v1463_v22 = vmul.f32 1.442695, %v1460_v10  ;;  %v1469_v12 = vmul.f32 1.442695, %v1466_v32 }
 0x5c1   : > { %5479 = vpow2.f32 %v1461_v0 }
 0x5c2   : > { %5481 = vpow2.f32 %v1463_v22 }
 0x5c3   : > { %5483 = vpow2.f32 %v1467_v6 }
 0x5c4   : > { %5485 = vpow2.f32 %v1469_v12 }
 0x5cb   : > { %v5480_v33 = vpop.eup %5479 }
 0x5cc   : > { %v5482_v58 = vpop.eup %5481 }
 0x5cd   : > { %v5484_v28 = vpop.eup %5483 }
 0x5ce   : > { %v5486_v24 = vpop.eup %5485  ;;  %v1471_v37 = vadd.f32 %v5484_v28, %v5480_v33 }
 0x5cf   : > { %v1472_v1 = vadd.f32 %v5486_v24, %v5482_v58 }
 0x5d0   : > { %5487 = vlog2.f32 %v1471_v37 }
 0x5d1   : > { %5489 = vlog2.f32 %v1472_v1 }
 0x5da   : > { %v5488_v21 = vpop.eup %5487 }
 0x5db   : > { %v5490_v42 = vpop.eup %5489  ;;  %v1474_v3 = vmul.f32 0.6931472, %v5488_v21 }
 0x5dc   : > { %v1476_v13 = vmul.f32 0.6931472, %v5490_v42 }
 0x5dd   : > { %v1477_v29 = vadd.f32 %v1474_v3, %v1457_v43  ;;  %v4959_v43 = vld [vmem:[%s7978_s6 + $0x30] sm:$0xff] }
 0x5de   : > { %v1478_v23 = vadd.f32 %v1476_v13, %v1458_v55  ;;  %v8044_v55 = vmov 5  }
 0x5df   : > { %v1479_v19 = vsub.f32 0.0, %v1477_v29 }
 0x5e0   : > { %v1480_v27 = vsub.f32 0.0, %v1478_v23 }
 0x5e1   : > { %v1489_v36 = vmul.f32 1.442695, %v1479_v19  ;;  %v1497_v40 = vrot.slane %v1479_v19, 2 }
 0x5e2   : > { %v1491_v63 = vmul.f32 1.442695, %v1480_v27  ;;  %v1498_v31 = vrot.slane %v1480_v27, 2 }
 0x5e3   : > { %5491 = vpow2.f32 %v1489_v36  ;;  %v1501_v17 = vsel %vm650_vm7, %v1497_v40, 0.0 }
 0x5e4   : > { %5493 = vpow2.f32 %v1491_v63  ;;  %v1502_v38 = vsel %vm650_vm7, %v1498_v31, 0.0 }
 0x5e5   : > { %v6292_v20 = vadd.f32 %v1502_v38, %v1501_v17 }
 0x5e7   : > { %8040 = vst [vmem:[#allocation7_spill] sm:$0xff] %v6292_v20 }
 0x5ed   : > { %v5492_v39 = vpop.eup %5491 }
 0x5ee   : > { %v5494_v15 = vpop.eup %5493  ;;  %v1493_v49 = vmul.f32 %v5492_v39, %v1487_v26 }
 0x5ef   : > { %v1494_v60 = vmul.f32 %v5494_v15, %v1488_v9  ;;  %v4960_v9 = vld [vmem:[%s7978_s6 + $0x38] sm:$0xff] }
 0x5f0   : > { %v1515_v25 = vsel %vm650_vm7, %v8038_v5, %v1493_v49 }
 0x5f1   : > { %v1527_v11 = vadd.f32 %v1525_v30, %v1515_v25  ;;  %v1516_v18 = vsel %vm650_vm7, %v8039_v7, %v1494_v60  ;;  %v4958_v7 = vld [vmem:[%s7978_s6 + $0x28] sm:$0xff] }
 0x5f2   : > { %v1528_v41 = vadd.f32 %v1525_v30, %v1516_v18 }
 0x5f3   : > { %v1536_v35 = vmul.f32 %v1534_v8, %v1527_v11 }
 0x5f4   : > { %v1537_v34 = vmul.f32 %v1534_v8, %v1528_v41 }
 0x5f6   : > { %4962 = vmatprep.subr.msk.mxu0 %vm369_vm0, %v1537_v34 }
 0x5f7   : > { %4963 = vmatpush1.msk.msra.mxu0 %vm369_vm0, %v1536_v35 }
 0x5f8   : > { %4964 = vmatmul.mubr.msk.f32.vlgmr.msra.gmra.mrb[0].mxu0 %vm365_vm1, %v4961_v16 }
 0x5f9   : > { %1867 = vmatprep.mubr.f32.mxu0 %v8037_v61 }
 0x6cb   : > { %v6305_v5 = vpop.f32.mrb[0].mxu0 }
 0x6cc   : > { %8041 = vst [vmem:[#allocation5_spill] sm:$0xff] %v6305_v5  ;;  %1674 = vrot.lane.b32.xlu0 %v6305_v5, %s5592_s27  ;;  %1644 = vrot.lane.b32.xlu1 %v6305_v5, %s5590_s25  ;;  %v6311_v26 = vpop.f32.mrb[1].mxu0 }
 0x6cd   : > { %8042 = vst [vmem:[#allocation6_spill] sm:$0xff] %v6311_v26 }
 0x6d0   : > { %1685 = vrot.lane.b32.xlu0 %v6305_v5, %s5594_s29  ;;  %1655 = vrot.lane.b32.xlu1 %v6305_v5, %s5589_s24 }
 0x6d4   : > { %1633 = vrot.lane.b32.xlu1 %v6305_v5, %s5591_s26  ;;  %1641 = vrot.lane.b32.xlu0 %v6311_v26, %s5590_s25 }
 0x6d8   : > { %1666 = vrot.lane.b32.xlu1 %v6305_v5, %s5593_s28  ;;  %1652 = vrot.lane.b32.xlu0 %v6311_v26, %s5589_s24 }
 0x6dc   : > { %1676 = vrot.lane.b32.xlu1 %v6311_v26, %s5592_s27  ;;  %1629 = vrot.lane.b32.xlu0 %v6311_v26, %s5591_s26 }
 0x6e0   : > { %1687 = vrot.lane.b32.xlu1 %v6311_v26, %s5594_s29  ;;  %1663 = vrot.lane.b32.xlu0 %v6311_v26, %s5593_s28 }
 0x6e4   : > { %1698 = vrot.lane.b32.xlu1 %v6311_v26, %s5595_s30  ;;  %1696 = vrot.lane.b32.xlu0 %v6305_v5, %s5595_s30 }
 0x6e8   : > { %1709 = vrot.lane.b32.xlu1 %v6311_v26, %s5596_s10  ;;  %1707 = vrot.lane.b32.xlu0 %v6305_v5, %s5596_s10 }
 0x6ec   : > { %1767 = vperm.xlu0 %5446, %v8043_v62   ;;  %1772 = vperm.xlu1 %5447, %v4958_v7  }
 0x6f0   : > { %1782 = vperm.xlu0 %5446, %v4960_v9   ;;  %1777 = vperm.xlu1 %5447, %v4959_v43  }
 0x6f4   : > { %5449 = vset.pattern.permute.xlu0 %v8044_v55  ;;  %5448 = vset.pattern.permute.xlu1 %v8044_v55 }
 0x6f5   : > { %1910 = vperm.xlu0 %5449, %v4958_v7   ;;  %1906 = vperm.xlu1 %5448, %v8043_v62  }
 0x6f9   : > { %5450 = vset.pattern.permute.xlu0 %v8045_v4  ;;  %1914 = vperm.xlu1 %5448, %v4959_v43  }
 0x6fd   : > { %1918 = vperm.xlu1 %5448, %v4960_v9  }
 0x701   : > { %5451 = vset.pattern.permute.xlu1 %v8046_v14 }
 0x73e   : > { %v1675_v10 = vpop.permute.xlu0 %1674  ;;  %v1645_v32 = vpop.permute.xlu1 %1644 }
 0x742   : > { %v1686_v0 = vpop.permute.xlu0 %1685  ;;  %v1656_v6 = vpop.permute.xlu1 %1655 }
 0x746   : > { %v1634_v22 = vpop.permute.xlu1 %1633  ;;  %v1642_v12 = vpop.permute.xlu0 %1641 }
 0x747   : > { %v1646_v33 = vsel %vm479_vm3, %v1645_v32, %v1642_v12  ;;  %v1649_v37 = vsel %vm479_vm3, %v1642_v12, %v1645_v32 }
 0x748   : > { %v1651_v24 = vmul.f32 %v1646_v33, %v5770_v47  ;;  %v1650_v23 = vmul.f32 %v1649_v37, %v5768_v46 }
 0x74a   : > { %v1667_v58 = vpop.permute.xlu1 %1666  ;;  %v1653_v28 = vpop.permute.xlu0 %1652  ;;  %v1721_v19 = vrot.slane %v1651_v24, 6  ;;  %v1720_v41 = vrot.slane %v1650_v23, 6 }
 0x74b   : > { %v1657_v42 = vsel %vm499_vm5, %v1656_v6, %v1653_v28  ;;  %v1660_v40 = vsel %vm499_vm5, %v1653_v28, %v1656_v6 }
 0x74c   : > { %v1662_v63 = vmul.f32 %v1657_v42, %v5774_v50  ;;  %v1661_v34 = vmul.f32 %v1660_v40, %v5772_v48 }
 0x74e   : > { %v1677_v1 = vpop.permute.xlu1 %1676  ;;  %v1630_v21 = vpop.permute.xlu0 %1629  ;;  %v1727_v62 = vrot.slane %v1662_v63, 4  ;;  %v1726_v37 = vrot.slane %v1661_v34, 4  ;;  %v4969_v34 = vld [vmem:[%s7975_s3 + $0x38] sm:$0xff] }
 0x74f   : > { %v1678_v3 = vsel %vm538_vm2, %v1675_v10, %v1677_v1  ;;  %v1682_v13 = vsel %vm538_vm2, %v1677_v1, %v1675_v10  ;;  %v1635_v29 = vsel %vm459_vm6, %v1634_v22, %v1630_v21  ;;  %v1638_v36 = vsel %vm459_vm6, %v1630_v21, %v1634_v22 }
 0x750   : > { %v1683_v27 = vmul.f32 %v1678_v3, %v5780_v53  ;;  %v1684_v31 = vmul.f32 %v1682_v13, %v5782_v54  ;;  %v1640_v17 = vmul.f32 %v1635_v29, %v5766_v45  ;;  %v1639_v25 = vmul.f32 %v1638_v36, %v5764_v44 }
 0x752   : > { %v1688_v38 = vpop.permute.xlu1 %1687  ;;  %v1664_v30 = vpop.permute.xlu0 %1663  ;;  %v1738_v35 = vrot.slane %v1683_v27, 6  ;;  %v1739_v7 = vrot.slane %v1684_v31, 6  ;;  %v1755_v9 = vsel %vm650_vm7, %v1640_v17, %v1721_v19  ;;  %v1754_v33 = vsel %vm650_vm7, %v1639_v25, %v1720_v41  ;;  %v6410_v25 = vld [vmem:[%s7979_s7 + $0x10] ss:$0 sm:$0xff] }
 0x753   : > { %v1689_v39 = vsel %vm558_vm4, %v1686_v0, %v1688_v38  ;;  %v1693_v15 = vsel %vm558_vm4, %v1688_v38, %v1686_v0  ;;  %v1668_v49 = vsel %vm519_vm8, %v1667_v58, %v1664_v30  ;;  %v1671_v60 = vsel %vm519_vm8, %v1664_v30, %v1667_v58  ;;  %v4968_v41 = vld [vmem:[%s7975_s3 + $0x30] sm:$0xff] }
 0x754   : > { %v1694_v11 = vmul.f32 %v1689_v39, %v5784_v56  ;;  %v1695_v8 = vmul.f32 %v1693_v15, %v5786_v57  ;;  %v1672_v18 = vmul.f32 %v1671_v60, %v5776_v51  ;;  %v1673_v16 = vmul.f32 %v1668_v49, %v5778_v52  ;;  %v6403_v49 = vld [vmem:[%s7979_s7 + $0x18] ss:$0 sm:$0xff] }
 0x755   : > { %v1760_v1 = vsel %vm650_vm7, %v6305_v5, %v1738_v35  ;;  %v1757_v29 = vsel %vm369_vm0, %v1755_v9, %v1727_v62  ;;  %v1761_v23 = vsel %vm650_vm7, %v6311_v26, %v1739_v7  ;;  %v1756_v40 = vsel %vm369_vm0, %v1754_v33, %v1726_v37 }
 0x756   : > { %v1744_v43 = vrot.slane %v1694_v11, 4  ;;  %v1699_v10 = vpop.permute.xlu1 %1698  ;;  %v1697_v32 = vpop.permute.xlu0 %1696  ;;  %v1745_v0 = vrot.slane %v1695_v8, 4  ;;  %v1733_v6 = vrot.slane %v1673_v16, 2  ;;  %v1732_v58 = vrot.slane %v1672_v18, 2  ;;  %v4966_v8 = vld [vmem:[%s7975_s3 + $0x20] sm:$0xff]  ;;  %v4967_v18 = vld [vmem:[%s7975_s3 + $0x28] sm:$0xff] }
 0x757   : > { %v1700_v22 = vsel %vm578_vm9, %v1697_v32, %v1699_v10  ;;  %v1704_v12 = vsel %vm578_vm9, %v1699_v10, %v1697_v32 }
 0x758   : > { %v1705_v28 = vmul.f32 %v1700_v22, %v5789_v59  ;;  %v1706_v24 = vmul.f32 %v1704_v12, %v5794_v2  ;;  %v1762_v19 = vsel %vm369_vm0, %v1760_v1, %v1744_v43  ;;  %v1759_v27 = vsel %vm655_vm10, %v1757_v29, %v1733_v6 }
 0x759   : > { %v1763_v36 = vsel %vm369_vm0, %v1761_v23, %v1745_v0  ;;  %v1758_v17 = vsel %vm655_vm10, %v1756_v40, %v1732_v58 }
 0x75a   : > { %v1750_v21 = vrot.slane %v1705_v28, 2  ;;  %v1751_v42 = vrot.slane %v1706_v24, 2  ;;  %v1710_v3 = vpop.permute.xlu1 %1709  ;;  %v1708_v13 = vpop.permute.xlu0 %1707 }
 0x75b   : > { %v1715_v63 = vsel %vm598_vm11, %v1710_v3, %v1708_v13  ;;  %v1711_v15 = vsel %vm598_vm11, %v1708_v13, %v1710_v3 }
 0x75c   : > { %v1765_v31 = vsel %vm655_vm10, %v1763_v36, %v1751_v42  ;;  %v1764_v38 = vsel %vm655_vm10, %v1762_v19, %v1750_v21  ;;  %v1717_v60 = vmul.f32 %v6403_v49, %v1715_v63  ;;  %v1716_v11 = vmul.f32 %v6410_v25, %v1711_v15  ;;  %v4978_v15 = vld [vmem:[%s7976_s4 + $0x30] sm:$0xff] }
 0x75d   : > { %v5133_v30 = vpack.c.bf16 %v1765_v31, %v1759_v27  ;;  %v5135_v39 = vpack.c.bf16 %v1764_v38, %v1758_v17 }
 0x75f   : > { %5134 = vmatprep.subr.bf16.mxu0 %v5133_v30  ;;  %v4976_v30 = vld [vmem:[%s7976_s4 + $0x20] sm:$0xff] }
 0x760   : > { %5136 = vmatpush1.bf16.msra.mxu0 %v5135_v39  ;;  %v4977_v39 = vld [vmem:[%s7976_s4 + $0x28] sm:$0xff] }
 0x761   : > { %4970 = vmatprep.subr.msk.mxu0 %vm650_vm7, %v1717_v60  ;;  %v4979_v60 = vld [vmem:[%s7976_s4 + $0x38] sm:$0xff] }
 0x764   : > { %4971 = vmatpush1.msk.msra.mxu0 %vm650_vm7, %v1716_v11 }
 0x765   : > { %4972 = vmatmul.mubr.msk.f32.vlgmr.msra.gmra.mrb[2].mxu0 %vm683_vm12, %v4966_v8 }
 0x766   : > { %1873 = vmatprep.mubr.f32.mxu0 %v8037_v61 }
 0x769   : > { %4973 = vmatmul.mubr.msk.f32.gmra.mrb[4].mxu0 %vm683_vm12, %v4967_v18 }
 0x76a   : > { %1879 = vmatprep.mubr.f32.mxu0 %v8037_v61 }
 0x76b   : > { %v1768_v16 = vpop.permute.xlu0 %1767  ;;  %v1773_v7 = vpop.permute.xlu1 %1772 }
 0x76d   : > { %4974 = vmatmul.mubr.msk.f32.gmra.mrb[6].mxu0 %vm683_vm12, %v4968_v41 }
 0x76e   : > { %1885 = vmatprep.mubr.f32.mxu0 %v8037_v61 }
 0x76f   : > { %v1778_v58 = vpop.permute.xlu1 %1777  ;;  %v1783_v3 = vpop.permute.xlu0 %1782 }
 0x771   : > { %4975 = vmatmul.mubr.msk.f32.gmra.mrb[8].mxu0 %vm683_vm12, %v4969_v34 }
 0x772   : > { %1997 = vmatprep.mubr.f32.mxu0 %v8037_v61 }
 0x774   : > { %v1907_v11 = vpop.permute.xlu1 %1906 }
 0x838   : > { %v1869_v35 = vpop.f32.mrb[2].mxu0 }
 0x839   : > { %v1871_v62 = vpop.f32.mrb[3].mxu0  ;;  %v1870_v9 = vadd.f32 %v1869_v35, %v1768_v16  ;;  %v1911_v35 = vpop.permute.xlu0 %1910 }
 0x83a   : > { %v1872_v43 = vadd.f32 %v1871_v62, %v1768_v16 }
 0x83b   : > { %v1892_v22 = vmax.f32 %v1870_v9, 0.0 }
 0x83c   : > { %v1875_v10 = vpop.f32.mrb[4].mxu0  ;;  %v1893_v33 = vmax.f32 %v1872_v43, 0.0 }
 0x83d   : > { %v1876_v32 = vadd.f32 %v1875_v10, %v1773_v7  ;;  %v1877_v0 = vpop.f32.mrb[5].mxu0 }
 0x83e   : > { %v1878_v6 = vadd.f32 %v1877_v0, %v1773_v7 }
 0x83f   : > { %v1894_v12 = vmax.f32 %v1876_v32, 0.0 }
 0x840   : > { %v1895_v28 = vmax.f32 %v1878_v6, 0.0  ;;  %v1881_v24 = vpop.f32.mrb[6].mxu0 }
 0x841   : > { %v5139_v37 = vpack.c.bf16 %v1894_v12, %v1892_v22  ;;  %v1883_v1 = vpop.f32.mrb[7].mxu0  ;;  %v1882_v42 = vadd.f32 %v1881_v24, %v1778_v58 }
 0x842   : > { %v5137_v21 = vpack.c.bf16 %v1895_v28, %v1893_v33  ;;  %v1884_v13 = vadd.f32 %v1883_v1, %v1778_v58  ;;  %v1915_v58 = vpop.permute.xlu1 %1914 }
 0x843   : > { %v1896_v36 = vmax.f32 %v1882_v42, 0.0 }
 0x844   : > { %v1887_v29 = vpop.f32.mrb[8].mxu0  ;;  %5138 = vmatprep.subr.bf16.mxu0 %v5137_v21  ;;  %v1897_v63 = vmax.f32 %v1884_v13, 0.0 }
 0x845   : > { %v1888_v23 = vadd.f32 %v1887_v29, %v1783_v3  ;;  %v1889_v19 = vpop.f32.mrb[9].mxu0  ;;  %5140 = vmatpush1.bf16.msra.mxu0 %v5139_v37 }
 0x846   : > { %v1890_v27 = vadd.f32 %v1889_v19, %v1783_v3  ;;  %v1919_v37 = vpop.permute.xlu1 %1918 }
 0x847   : > { %v1898_v40 = vmax.f32 %v1888_v23, 0.0  ;;  %v5555_v23 = vld [vmem:[%s7978_s6 + $0x20] sm:$0xff] }
 0x848   : > { %v1899_v31 = vmax.f32 %v1890_v27, 0.0  ;;  %v2545_v19 = vmul.f32 3.0, %v5555_v23  ;;  %v6587_v27 = vld [vmem:[%s7977_s5 + $0xc] sm:$0xff] }
 0x849   : > { %v5143_v17 = vpack.c.bf16 %v1898_v40, %v1896_v36  ;;  %8047 = vst [vmem:[#allocation8_spill] sm:$0xff] %v6587_v27  ;;  %v2399_v40 = vcombine.high %v6587_v27, %v6587_v27 }
 0x84a   : > { %v5141_v38 = vpack.c.bf16 %v1899_v31, %v1897_v63  ;;  %v2546_v36 = vmul.f32 1.442695, %v2545_v19 }
 0x84c   : > { %5142 = vmatprep.subr.bf16.mxu0 %v5141_v38  ;;  %5495 = vpow2.f32 %v2546_v36 }
 0x84d   : > { %5144 = vmatpush1.bf16.msra.mxu0 %v5143_v17 }
 0x850   : > { %4980 = vmatmul.mubr.msk.f32.vlgmr.msra.gmra.mrb[10].mxu0 %vm819_vm13, %v4976_v30  ;;  %v6608_v30 = vld [vmem:[%s7978_s6 + $0x40] sm:$0xff] }
 0x851   : > { %2003 = vmatprep.mubr.f32.mxu0 %v8037_v61  ;;  %8048 = vst [vmem:[#allocation9_spill] sm:$0xff] %v6608_v30 }
 0x854   : > { %4981 = vmatmul.mubr.msk.f32.gmra.mrb[12].mxu0 %vm819_vm13, %v4977_v39 }
 0x855   : > { %2009 = vmatprep.mubr.f32.mxu0 %v8037_v61 }
 0x858   : > { %4982 = vmatmul.mubr.msk.f32.gmra.mrb[14].mxu0 %vm819_vm13, %v4978_v15  ;;  %v2631_v15 = vmul.f32 1.442695, %v6608_v30 }
 0x859   : > { %2015 = vmatprep.mubr.f32.mxu0 %v8037_v61 }
 0x85a   : > { %5497 = vpow2.f32 %v2631_v15 }
 0x85c   : > { %4983 = vmatmul.mubr.msk.f32.gmra.mrb[16].mxu0 %vm819_vm13, %v4979_v60 }
 0x85d   : > { %2467 = vmatprep.mubr.f32.mxu0 %v2399_v40 }
 0x923   : > { %v1999_v8 = vpop.f32.mrb[10].mxu0 }
 0x924   : > { %v2000_v18 = vadd.f32 %v1999_v8, %v1907_v11  ;;  %v2001_v41 = vpop.f32.mrb[11].mxu0 }
 0x925   : > { %v2002_v34 = vadd.f32 %v2001_v41, %v1907_v11  ;;  %v5496_v11 = vpop.eup %5495 }
 0x926   : > { %v6453_v16 = vmax.f32 %v2000_v18, 0.0 }
 0x927   : > { %v6455_v62 = vmax.f32 %v2002_v34, 0.0  ;;  %v2005_v7 = vpop.f32.mrb[12].mxu0 }
 0x928   : > { %v2006_v9 = vadd.f32 %v2005_v7, %v1911_v35  ;;  %v2007_v43 = vpop.f32.mrb[13].mxu0  ;;  %2053 = vrot.lane.b32.xlu0 %v6453_v16, %s5591_s26  ;;  %v8050_v7 = vmov 0  }
 0x929   : > { %2219 = vrot.lane.b32.xlu1 %v6455_v62, %s5592_s27  ;;  %v2008_v12 = vadd.f32 %v2007_v43, %v1911_v35  ;;  %v8049_v35 = vmov 1  }
 0x92a   : > { %v6461_v10 = vmax.f32 %v2006_v9, 0.0  ;;  %v5498_v9 = vpop.eup %5497 }
 0x92b   : > { %v2011_v32 = vpop.f32.mrb[14].mxu0  ;;  %v6479_v33 = vmax.f32 %v2008_v12, 0.0 }
 0x92c   : > { %v2013_v0 = vpop.f32.mrb[15].mxu0  ;;  %2097 = vrot.lane.b32.xlu0 %v6453_v16, %s5590_s25  ;;  %v2012_v28 = vadd.f32 %v2011_v32, %v1915_v58 }
 0x92d   : > { %2055 = vrot.lane.b32.xlu1 %v6461_v10, %s5591_s26  ;;  %v2014_v24 = vadd.f32 %v2013_v0, %v1915_v58 }
 0x92e   : > { %v6501_v1 = vmax.f32 %v2012_v28, 0.0 }
 0x92f   : > { %v2017_v6 = vpop.f32.mrb[16].mxu0  ;;  %v6503_v21 = vmax.f32 %v2014_v24, 0.0 }
 0x930   : > { %v2019_v22 = vpop.f32.mrb[17].mxu0  ;;  %2141 = vrot.lane.b32.xlu0 %v6453_v16, %s5589_s24  ;;  %v2018_v42 = vadd.f32 %v2017_v6, %v1919_v37 }
 0x931   : > { %2099 = vrot.lane.b32.xlu1 %v6461_v10, %s5590_s25  ;;  %v2020_v13 = vadd.f32 %v2019_v22, %v1919_v37 }
 0x932   : > { %v6509_v3 = vmax.f32 %v2018_v42, 0.0 }
 0x933   : > { %v6527_v29 = vmax.f32 %v2020_v13, 0.0  ;;  %v8051_v13 = vmov 4  }
 0x934   : > { %2185 = vrot.lane.b32.xlu0 %v6453_v16, %s5593_s28 }
 0x935   : > { %2143 = vrot.lane.b32.xlu1 %v6461_v10, %s5589_s24 }
 0x938   : > { %2217 = vrot.lane.b32.xlu0 %v6453_v16, %s5592_s27 }
 0x939   : > { %2187 = vrot.lane.b32.xlu1 %v6461_v10, %s5593_s28 }
 0x93c   : > { %2037 = vrot.lane.b32.xlu0 %v6455_v62, %s5591_s26 }
 0x93d   : > { %2039 = vrot.lane.b32.xlu1 %v6479_v33, %s5591_s26 }
 0x940   : > { %2085 = vrot.lane.b32.xlu0 %v6455_v62, %s5590_s25 }
 0x941   : > { %2087 = vrot.lane.b32.xlu1 %v6479_v33, %s5590_s25 }
 0x944   : > { %2129 = vrot.lane.b32.xlu0 %v6455_v62, %s5589_s24 }
 0x945   : > { %2131 = vrot.lane.b32.xlu1 %v6479_v33, %s5589_s24 }
 0x948   : > { %2173 = vrot.lane.b32.xlu0 %v6455_v62, %s5593_s28 }
 0x949   : > { %2175 = vrot.lane.b32.xlu1 %v6479_v33, %s5593_s28 }
 0x94c   : > { %2221 = vrot.lane.b32.xlu0 %v6461_v10, %s5592_s27 }
 0x94d   : > { %2223 = vrot.lane.b32.xlu1 %v6479_v33, %s5592_s27 }
 0x950   : > { %2057 = vrot.lane.b32.xlu0 %v6501_v1, %s5591_s26 }
 0x951   : > { %2227 = vrot.lane.b32.xlu1 %v6503_v21, %s5592_s27 }
 0x954   : > { %2101 = vrot.lane.b32.xlu0 %v6501_v1, %s5590_s25 }
 0x955   : > { %2059 = vrot.lane.b32.xlu1 %v6509_v3, %s5591_s26 }
 0x958   : > { %2145 = vrot.lane.b32.xlu0 %v6501_v1, %s5589_s24 }
 0x959   : > { %2103 = vrot.lane.b32.xlu1 %v6509_v3, %s5590_s25 }
 0x95c   : > { %2189 = vrot.lane.b32.xlu0 %v6501_v1, %s5593_s28 }
 0x95d   : > { %2147 = vrot.lane.b32.xlu1 %v6509_v3, %s5589_s24 }
 0x960   : > { %2225 = vrot.lane.b32.xlu0 %v6501_v1, %s5592_s27 }
 0x961   : > { %2191 = vrot.lane.b32.xlu1 %v6509_v3, %s5593_s28 }
 0x964   : > { %2041 = vrot.lane.b32.xlu0 %v6503_v21, %s5591_s26 }
 0x965   : > { %2043 = vrot.lane.b32.xlu1 %v6527_v29, %s5591_s26 }
 0x968   : > { %2261 = vrot.lane.b32.xlu0 %v6453_v16, %s5594_s29 }
 0x969   : > { %2263 = vrot.lane.b32.xlu1 %v6455_v62, %s5594_s29 }
 0x96c   : > { %2089 = vrot.lane.b32.xlu0 %v6503_v21, %s5590_s25 }
 0x96d   : > { %2091 = vrot.lane.b32.xlu1 %v6527_v29, %s5590_s25 }
 0x970   : > { %2133 = vrot.lane.b32.xlu0 %v6503_v21, %s5589_s24 }
 0x971   : > { %2267 = vrot.lane.b32.xlu1 %v6479_v33, %s5594_s29 }
 0x974   : > { %2177 = vrot.lane.b32.xlu0 %v6503_v21, %s5593_s28 }
 0x975   : > { %2135 = vrot.lane.b32.xlu1 %v6527_v29, %s5589_s24 }
 0x978   : > { %2229 = vrot.lane.b32.xlu0 %v6509_v3, %s5592_s27 }
 0x979   : > { %2271 = vrot.lane.b32.xlu1 %v6503_v21, %s5594_s29 }
 0x97c   : > { %2265 = vrot.lane.b32.xlu0 %v6461_v10, %s5594_s29 }
 0x97d   : > { %2179 = vrot.lane.b32.xlu1 %v6527_v29, %s5593_s28 }
 0x980   : > { %2269 = vrot.lane.b32.xlu0 %v6501_v1, %s5594_s29 }
 0x981   : > { %2307 = vrot.lane.b32.xlu1 %v6455_v62, %s5595_s30 }
 0x984   : > { %2273 = vrot.lane.b32.xlu0 %v6509_v3, %s5594_s29 }
 0x985   : > { %2311 = vrot.lane.b32.xlu1 %v6479_v33, %s5595_s30 }
 0x988   : > { %2305 = vrot.lane.b32.xlu0 %v6453_v16, %s5595_s30 }
 0x989   : > { %2315 = vrot.lane.b32.xlu1 %v6503_v21, %s5595_s30 }
 0x98c   : > { %2309 = vrot.lane.b32.xlu0 %v6461_v10, %s5595_s30 }
 0x98d   : > { %2231 = vrot.lane.b32.xlu1 %v6527_v29, %s5592_s27 }
 0x990   : > { %2313 = vrot.lane.b32.xlu0 %v6501_v1, %s5595_s30 }
 0x991   : > { %2351 = vrot.lane.b32.xlu1 %v6455_v62, %s5596_s10 }
 0x994   : > { %2317 = vrot.lane.b32.xlu0 %v6509_v3, %s5595_s30 }
 0x995   : > { %2275 = vrot.lane.b32.xlu1 %v6527_v29, %s5594_s29 }
 0x998   : > { %2349 = vrot.lane.b32.xlu0 %v6453_v16, %s5596_s10 }
 0x999   : > { %2355 = vrot.lane.b32.xlu1 %v6479_v33, %s5596_s10 }
 0x99a   : > { %v2054_v63 = vpop.permute.xlu0 %2053 }
 0x99b   : > { %v6595_v31 = vpop.permute.xlu1 %2219 }
 0x99c   : > { %2353 = vrot.lane.b32.xlu0 %v6461_v10, %s5596_s10 }
 0x99d   : > { %2319 = vrot.lane.b32.xlu1 %v6527_v29, %s5595_s30 }
 0x99e   : > { %v2098_v17 = vpop.permute.xlu0 %2097 }
 0x99f   : > { %v2056_v38 = vpop.permute.xlu1 %2055 }
 0x9a0   : > { %2357 = vrot.lane.b32.xlu0 %v6501_v1, %s5596_s10 }
 0x9a1   : > { %2359 = vrot.lane.b32.xlu1 %v6503_v21, %s5596_s10 }
 0x9a2   : > { %v6610_v39 = vpop.permute.xlu0 %2141 }
 0x9a3   : > { %v2100_v60 = vpop.permute.xlu1 %2099 }
 0x9a4   : > { %2361 = vrot.lane.b32.xlu0 %v6509_v3, %s5596_s10 }
 0x9a5   : > { %2363 = vrot.lane.b32.xlu1 %v6527_v29, %s5596_s10 }
 0x9a6   : > { %v6617_v8 = vpop.permute.xlu0 %2185 }
 0x9a7   : > { %v6619_v18 = vpop.permute.xlu1 %2143 }
 0x9a8   : > { %2394 = vperm.xlu0 %5450, %v5555_v23  }
 0x9a9   : > { %2550 = vperm.xlu1 %5451, %v5496_v11  }
 0x9aa   : > { %v6621_v41 = vpop.permute.xlu0 %2217 }
 0x9ab   : > { %v6623_v34 = vpop.permute.xlu1 %2187 }
 0x9ac   : > { %5453 = vset.pattern.permute.xlu0 %v8049_v35 }
 0x9ad   : > { %5452 = vset.pattern.permute.xlu1 %v8050_v7  ;;  %2635 = vperm.xlu0 %5453, %v5498_v9  }
 0x9ae   : > { %v2038_v43 = vpop.permute.xlu0 %2037  ;;  %2626 = vperm.xlu1 %5452, %v6608_v30  }
 0x9af   : > { %v2061_v32 = vsel %vm459_vm6, %v2054_v63, %v2038_v43  ;;  %v2073_v0 = vsel %vm459_vm6, %v2038_v43, %v2054_v63  ;;  %v2040_v6 = vpop.permute.xlu1 %2039 }
 0x9b0   : > { %v2077_v22 = vmul.f32 %v2073_v0, %v5764_v44  ;;  %v2078_v12 = vmul.f32 %v2061_v32, %v5766_v45  ;;  %v2062_v58 = vsel %vm459_vm6, %v2056_v38, %v2040_v6  ;;  %v2074_v28 = vsel %vm459_vm6, %v2040_v6, %v2056_v38 }
 0x9b1   : > { %v2079_v24 = vmul.f32 %v2074_v28, %v5764_v44  ;;  %v2080_v37 = vmul.f32 %v2062_v58, %v5766_v45  ;;  %5454 = vset.pattern.permute.xlu0 %v8051_v13 }
 0x9b2   : > { %v2086_v42 = vpop.permute.xlu0 %2085  ;;  %5455 = vset.pattern.permute.xlu1 %v8051_v13 }
 0x9b3   : > { %v5147_v23 = vpack.c.bf16 %v2079_v24, %v2077_v22  ;;  %v2088_v19 = vpop.permute.xlu1 %2087  ;;  %v5145_v36 = vpack.c.bf16 %v2080_v37, %v2078_v12  ;;  %v2117_v13 = vsel %vm479_vm3, %v2086_v42, %v2098_v17 }
 0x9b4   : > { %v2118_v7 = vsel %vm479_vm3, %v2088_v19, %v2100_v60 }
 0x9b5   : > { %5146 = vmatprep.subr.bf16.mxu0 %v5145_v36  ;;  %v2106_v36 = vsel %vm479_vm3, %v2100_v60, %v2088_v19 }
 0x9b6   : > { %5148 = vmatpush1.bf16.msra.mxu0 %v5147_v23  ;;  %v2130_v40 = vpop.permute.xlu0 %2129  ;;  %v2105_v23 = vsel %vm479_vm3, %v2098_v17, %v2086_v42  ;;  %v2124_v27 = vmul.f32 %v2106_v36, %v5770_v47  ;;  %v2121_v42 = vmul.f32 %v2117_v13, %v5768_v46 }
 0x9b7   : > { %v2132_v63 = vpop.permute.xlu1 %2131  ;;  %v2122_v61 = vmul.f32 %v2105_v23, %v5770_v47  ;;  %v2149_v23 = vsel %vm499_vm5, %v6610_v39, %v2130_v40 }
 0x9ba   : > { %v6638_v15 = vpop.permute.xlu0 %2173 }
 0x9bb   : > { %v6640_v11 = vpop.permute.xlu1 %2175 }
 0x9be   : > { %v6642_v38 = vpop.permute.xlu0 %2221 }
 0x9bf   : > { %v6644_v9 = vpop.permute.xlu1 %2223 }
 0x9c2   : > { %v2058_v43 = vpop.permute.xlu0 %2057 }
 0x9c3   : > { %v6646_v32 = vpop.permute.xlu1 %2227 }
 0x9c6   : > { %v2102_v0 = vpop.permute.xlu0 %2101 }
 0x9c7   : > { %v2060_v6 = vpop.permute.xlu1 %2059 }
 0x9ca   : > { %v2146_v22 = vpop.permute.xlu0 %2145 }
 0x9cb   : > { %v2104_v12 = vpop.permute.xlu1 %2103 }
 0x9ce   : > { %v6648_v58 = vpop.permute.xlu0 %2189 }
 0x9cf   : > { %v6650_v28 = vpop.permute.xlu1 %2147 }
 0x9d2   : > { %v6652_v24 = vpop.permute.xlu0 %2225 }
 0x9d3   : > { %v6654_v37 = vpop.permute.xlu1 %2191 }
 0x9d6   : > { %v2042_v20 = vpop.permute.xlu0 %2041 }
 0x9d7   : > { %v2063_v35 = vsel %vm459_vm6, %v2058_v43, %v2042_v20  ;;  %v2075_v14 = vsel %vm459_vm6, %v2042_v20, %v2058_v43  ;;  %v2044_v4 = vpop.permute.xlu1 %2043  ;;  %v2123_v20 = vmul.f32 %v2118_v7, %v5768_v46  ;;  %v2161_v7 = vsel %vm499_vm5, %v2130_v40, %v6610_v39 }
 0x9d8   : > { %v2081_v55 = vmul.f32 %v2075_v14, %v5764_v44  ;;  %v2082_v30 = vmul.f32 %v2063_v35, %v5766_v45  ;;  %v2064_v26 = vsel %vm459_vm6, %v2060_v6, %v2044_v4  ;;  %v2076_v5 = vsel %vm459_vm6, %v2044_v4, %v2060_v6 }
 0x9d9   : > { %v2083_v17 = vmul.f32 %v2076_v5, %v5764_v44  ;;  %v2084_v60 = vmul.f32 %v2064_v26, %v5766_v45  ;;  %v5153_v4 = vpack.c.bf16 %v2124_v27, %v2122_v61  ;;  %v5155_v6 = vpack.c.bf16 %v2123_v20, %v2121_v42 }
 0x9da   : > { %v6672_v19 = vpop.permute.xlu0 %2261  ;;  %v2150_v5 = vsel %vm499_vm5, %v6619_v18, %v2132_v63  ;;  %v2166_v42 = vmul.f32 %v2149_v23, %v5774_v50  ;;  %v2194_v23 = vsel %vm519_vm8, %v6623_v34, %v6640_v11 }
 0x9db   : > { %v5151_v14 = vpack.c.bf16 %v2083_v17, %v2081_v55  ;;  %v6674_v35 = vpop.permute.xlu1 %2263  ;;  %v5149_v43 = vpack.c.bf16 %v2084_v60, %v2082_v30  ;;  %v2162_v55 = vsel %vm499_vm5, %v2132_v63, %v6619_v18  ;;  %v2168_v39 = vmul.f32 %v2150_v5, %v5774_v50 }
 0x9dc   : > { %v2167_v20 = vmul.f32 %v2162_v55, %v5772_v48 }
 0x9dd   : > { %5150 = vmatprep.subr.bf16.mxu0 %v5149_v43  ;;  %v5161_v5 = vpack.c.bf16 %v2168_v39, %v2166_v42 }
 0x9de   : > { %5152 = vmatpush1.bf16.msra.mxu0 %v5151_v14  ;;  %v2090_v26 = vpop.permute.xlu0 %2089 }
 0x9df   : > { %v2107_v13 = vsel %vm479_vm3, %v2102_v0, %v2090_v26  ;;  %v2119_v30 = vsel %vm479_vm3, %v2090_v26, %v2102_v0  ;;  %v2092_v61 = vpop.permute.xlu1 %2091  ;;  %5154 = vmatprep.subr.bf16.mxu0 %v5153_v4  ;;  %v2165_v0 = vmul.f32 %v2161_v7, %v5772_v48 }
 0x9e0   : > { %v2125_v27 = vmul.f32 %v2119_v30, %v5768_v46  ;;  %v2126_v36 = vmul.f32 %v2107_v13, %v5770_v47  ;;  %v2108_v17 = vsel %vm479_vm3, %v2104_v12, %v2092_v61  ;;  %v2120_v60 = vsel %vm479_vm3, %v2092_v61, %v2104_v12 }
 0x9e1   : > { %v2127_v18 = vmul.f32 %v2120_v60, %v5768_v46  ;;  %v2128_v40 = vmul.f32 %v2108_v17, %v5770_v47  ;;  %v2193_v12 = vsel %vm519_vm8, %v6617_v8, %v6638_v15  ;;  %v5163_v55 = vpack.c.bf16 %v2167_v20, %v2165_v0 }
 0x9e2   : > { %5156 = vmatpush1.bf16.msra.mxu0 %v5155_v6  ;;  %v2134_v63 = vpop.permute.xlu0 %2133  ;;  %v2205_v13 = vsel %vm519_vm8, %v6638_v15, %v6617_v8  ;;  %v2210_v30 = vmul.f32 %v2193_v12, %v5778_v52 }
 0x9e3   : > { %v5159_v14 = vpack.c.bf16 %v2127_v18, %v2125_v27  ;;  %v6696_v43 = vpop.permute.xlu1 %2267  ;;  %v5157_v4 = vpack.c.bf16 %v2128_v40, %v2126_v36  ;;  %v2151_v6 = vsel %vm499_vm5, %v2146_v22, %v2134_v63  ;;  %v2163_v26 = vsel %vm499_vm5, %v2134_v63, %v2146_v22 }
 0x9e4   : > { %v2206_v27 = vsel %vm519_vm8, %v6640_v11, %v6623_v34  ;;  %v2212_v36 = vmul.f32 %v2194_v23, %v5778_v52  ;;  %v2169_v60 = vmul.f32 %v2163_v26, %v5772_v48  ;;  %v2170_v8 = vmul.f32 %v2151_v6, %v5774_v50 }
 0x9e5   : > { %5158 = vmatprep.subr.bf16.mxu0 %v5157_v4  ;;  %v2209_v40 = vmul.f32 %v2205_v13, %v5776_v51  ;;  %v2211_v63 = vmul.f32 %v2206_v27, %v5776_v51  ;;  %v5177_v27 = vpack.c.bf16 %v6479_v33, %v6455_v62  ;;  %v5181_v33 = vpack.c.bf16 %v6527_v29, %v6503_v21 }
 0x9e6   : > { %5160 = vmatpush1.bf16.msra.mxu0 %v5159_v14  ;;  %v2178_v7 = vpop.permute.xlu0 %2177 }
 0x9e7   : > { %v2136_v61 = vpop.permute.xlu1 %2135  ;;  %5162 = vmatprep.subr.bf16.mxu0 %v5161_v5  ;;  %v2195_v0 = vsel %vm519_vm8, %v6648_v58, %v2178_v7  ;;  %v2207_v20 = vsel %vm519_vm8, %v2178_v7, %v6648_v58  ;;  %v5171_v12 = vpack.c.bf16 %v2211_v63, %v2209_v40 }
 0x9e8   : > { %v2152_v22 = vsel %vm499_vm5, %v6650_v28, %v2136_v61  ;;  %v2164_v17 = vsel %vm499_vm5, %v2136_v61, %v6650_v28  ;;  %v5169_v28 = vpack.c.bf16 %v2212_v36, %v2210_v30  ;;  %v2213_v6 = vmul.f32 %v2207_v20, %v5776_v51 }
 0x9e9   : > { %v2171_v15 = vmul.f32 %v2164_v17, %v5772_v48  ;;  %v2172_v42 = vmul.f32 %v2152_v22, %v5774_v50  ;;  %v2214_v26 = vmul.f32 %v2195_v0, %v5778_v52  ;;  %v2249_v17 = vsel %vm538_vm2, %v6595_v31, %v6621_v41 }
 0x9ea   : > { %5164 = vmatpush1.bf16.msra.mxu0 %v5163_v55  ;;  %v2230_v39 = vpop.permute.xlu0 %2229 }
 0x9eb   : > { %v5167_v18 = vpack.c.bf16 %v2171_v15, %v2169_v60  ;;  %v6722_v34 = vpop.permute.xlu1 %2271  ;;  %v5165_v11 = vpack.c.bf16 %v2172_v42, %v2170_v8  ;;  %v2234_v60 = vsel %vm538_vm2, %v6642_v38, %v6644_v9  ;;  %v5179_v8 = vpack.c.bf16 %v6461_v10, %v6453_v16 }
 0x9ec   : > { %v2233_v15 = vsel %vm538_vm2, %v6621_v41, %v6595_v31  ;;  %v2235_v16 = vsel %vm538_vm2, %v6652_v24, %v6646_v32  ;;  %v5183_v10 = vpack.c.bf16 %v6509_v3, %v6501_v1  ;;  %v2251_v31 = vsel %vm538_vm2, %v6646_v32, %v6652_v24 }
 0x9ed   : > { %5166 = vmatprep.subr.bf16.mxu0 %v5165_v11  ;;  %v2255_v11 = vmul.f32 %v2234_v60, %v5780_v53  ;;  %v2253_v21 = vmul.f32 %v2233_v15, %v5780_v53  ;;  %v2257_v63 = vmul.f32 %v2235_v16, %v5780_v53  ;;  %v2293_v1 = vsel %vm558_vm4, %v6674_v35, %v6672_v19 }
 0x9ee   : > { %5168 = vmatpush1.bf16.msra.mxu0 %v5167_v18  ;;  %v2266_v14 = vpop.permute.xlu0 %2265  ;;  %v2254_v18 = vmul.f32 %v2249_v17, %v5782_v54  ;;  %v2258_v24 = vmul.f32 %v2251_v31, %v5782_v54 }
 0x9ef   : > { %v2180_v4 = vpop.permute.xlu1 %2179  ;;  %5170 = vmatprep.subr.bf16.mxu0 %v5169_v28  ;;  %v2294_v41 = vsel %vm558_vm4, %v6696_v43, %v2266_v14  ;;  %v2278_v3 = vsel %vm558_vm4, %v2266_v14, %v6696_v43  ;;  %v2298_v43 = vmul.f32 %v2293_v1, %v5786_v57 }
 0x9f0   : > { %v2196_v23 = vsel %vm519_vm8, %v6654_v37, %v2180_v4  ;;  %v2208_v5 = vsel %vm519_vm8, %v2180_v4, %v6654_v37  ;;  %v2250_v37 = vsel %vm538_vm2, %v6644_v9, %v6642_v38  ;;  %v5187_v9 = vpack.c.bf16 %v2255_v11, %v2253_v21 }
 0x9f1   : > { %v2215_v55 = vmul.f32 %v2208_v5, %v5776_v51  ;;  %v2216_v13 = vmul.f32 %v2196_v23, %v5778_v52  ;;  %v2256_v62 = vmul.f32 %v2250_v37, %v5782_v54  ;;  %v2300_v20 = vmul.f32 %v2294_v41, %v5786_v57 }
 0x9f2   : > { %5172 = vmatpush1.bf16.msra.mxu0 %v5171_v12  ;;  %v2270_v58 = vpop.permute.xlu0 %2269  ;;  %v2277_v23 = vsel %vm558_vm4, %v6672_v19, %v6674_v35  ;;  %v2299_v14 = vmul.f32 %v2278_v3, %v5784_v56 }
 0x9f3   : > { %v5175_v7 = vpack.c.bf16 %v2215_v55, %v2213_v6  ;;  %v6738_v30 = vpop.permute.xlu1 %2307  ;;  %v5173_v61 = vpack.c.bf16 %v2216_v13, %v2214_v26  ;;  %v5185_v29 = vpack.c.bf16 %v2256_v62, %v2254_v18  ;;  %v2279_v55 = vsel %vm558_vm4, %v2270_v58, %v6722_v34 }
 0x9f4   : > { %v2297_v13 = vmul.f32 %v2277_v23, %v5784_v56  ;;  %v2301_v37 = vmul.f32 %v2279_v55, %v5784_v56 }
 0x9f5   : > { %5174 = vmatprep.subr.bf16.mxu0 %v5173_v61  ;;  %v2295_v61 = vsel %vm558_vm4, %v6722_v34, %v2270_v58 }
 0x9f6   : > { %5176 = vmatpush1.bf16.msra.mxu0 %v5175_v7  ;;  %v2274_v36 = vpop.permute.xlu0 %2273  ;;  %v5193_v7 = vpack.c.bf16 %v2300_v20, %v2298_v43  ;;  %v2302_v34 = vmul.f32 %v2295_v61, %v5786_v57 }
 0x9f7   : > { %v2312_v22 = vpop.permute.xlu1 %2311  ;;  %5178 = vmatprep.subr.bf16.mxu0 %v5177_v27  ;;  %v5195_v27 = vpack.c.bf16 %v2299_v14, %v2297_v13 }
 0x9fa   : > { %5180 = vmatpush1.bf16.msra.mxu0 %v5179_v8  ;;  %v2306_v42 = vpop.permute.xlu0 %2305 }
 0x9fb   : > { %v2316_v40 = vpop.permute.xlu1 %2315  ;;  %5182 = vmatprep.subr.bf16.mxu0 %v5181_v33  ;;  %v2337_v60 = vsel %vm578_vm9, %v6738_v30, %v2306_v42  ;;  %v2321_v11 = vsel %vm578_vm9, %v2306_v42, %v6738_v30 }
 0x9fc   : > { %v2341_v41 = vmul.f32 %v2321_v11, %v5789_v59  ;;  %v4985_v11 = vld [vmem:[%s7977_s5 + $0x14] sm:$0xf] }
 0x9fe   : > { %5184 = vmatpush1.bf16.msra.mxu0 %v5183_v10  ;;  %v2310_v38 = vpop.permute.xlu0 %2309  ;;  %v2342_v10 = vmul.f32 %v2337_v60, %v5794_v2 }
 0x9ff   : > { %v2232_v28 = vpop.permute.xlu1 %2231  ;;  %5186 = vmatprep.subr.bf16.mxu0 %v5185_v29  ;;  %v2338_v19 = vsel %vm578_vm9, %v2312_v22, %v2310_v38  ;;  %v2322_v8 = vsel %vm578_vm9, %v2310_v38, %v2312_v22 }
 0xa00   : > { %v2236_v0 = vsel %vm538_vm2, %v2230_v39, %v2232_v28  ;;  %v2252_v32 = vsel %vm538_vm2, %v2232_v28, %v2230_v39  ;;  %v2344_v58 = vmul.f32 %v2338_v19, %v5794_v2  ;;  %v2343_v22 = vmul.f32 %v2322_v8, %v5789_v59 }
 0xa01   : > { %v2259_v4 = vmul.f32 %v2236_v0, %v5780_v53  ;;  %v2260_v12 = vmul.f32 %v2252_v32, %v5782_v54 }
 0xa02   : > { %5188 = vmatpush1.bf16.msra.mxu0 %v5187_v9  ;;  %v2314_v5 = vpop.permute.xlu0 %2313  ;;  %v5201_v9 = vpack.c.bf16 %v2344_v58, %v2342_v10  ;;  %v5203_v30 = vpack.c.bf16 %v2343_v22, %v2341_v41  ;;  %v8053_v58 = vmov 0.0  }
 0xa03   : > { %v5191_v6 = vpack.c.bf16 %v2259_v4, %v2257_v63  ;;  %v2352_v39 = vpop.permute.xlu1 %2351  ;;  %v5189_v26 = vpack.c.bf16 %v2260_v12, %v2258_v24  ;;  %v2323_v31 = vsel %vm578_vm9, %v2314_v5, %v2316_v40  ;;  %v2339_v38 = vsel %vm578_vm9, %v2316_v40, %v2314_v5 }
 0xa04   : > { %v2345_v42 = vmul.f32 %v2323_v31, %v5789_v59  ;;  %v2346_v3 = vmul.f32 %v2339_v38, %v5794_v2 }
 0xa05   : > { %5190 = vmatprep.subr.bf16.mxu0 %v5189_v26 }
 0xa06   : > { %5192 = vmatpush1.bf16.msra.mxu0 %v5191_v6  ;;  %v2318_v35 = vpop.permute.xlu0 %2317 }
 0xa07   : > { %v2276_v17 = vpop.permute.xlu1 %2275  ;;  %5194 = vmatprep.subr.bf16.mxu0 %v5193_v7 }
 0xa08   : > { %v2280_v62 = vsel %vm558_vm4, %v2274_v36, %v2276_v17  ;;  %v2296_v33 = vsel %vm558_vm4, %v2276_v17, %v2274_v36 }
 0xa09   : > { %v2303_v15 = vmul.f32 %v2280_v62, %v5784_v56  ;;  %v2304_v18 = vmul.f32 %v2296_v33, %v5786_v57 }
 0xa0a   : > { %5196 = vmatpush1.bf16.msra.mxu0 %v5195_v27  ;;  %v2350_v16 = vpop.permute.xlu0 %2349 }
 0xa0b   : > { %v5199_v21 = vpack.c.bf16 %v2303_v15, %v2301_v37  ;;  %v2356_v29 = vpop.permute.xlu1 %2355  ;;  %v5197_v36 = vpack.c.bf16 %v2304_v18, %v2302_v34  ;;  %v2381_v0 = vsel %vm598_vm11, %v2352_v39, %v2350_v16  ;;  %v2365_v5 = vsel %vm598_vm11, %v2350_v16, %v2352_v39  ;;  %v8052_v34 = vld [vmem:[#allocation8_spill] sm:$0xff] }
 0xa0c   : > { %v2386_v43 = vmul.f32 %v6403_v49, %v2381_v0  ;;  %v2385_v7 = vmul.f32 %v6410_v25, %v2365_v5 }
 0xa0d   : > { %5198 = vmatprep.subr.bf16.mxu0 %v5197_v36 }
 0xa0e   : > { %5200 = vmatpush1.bf16.msra.mxu0 %v5199_v21  ;;  %v2354_v63 = vpop.permute.xlu0 %2353 }
 0xa0f   : > { %v2382_v28 = vsel %vm598_vm11, %v2356_v29, %v2354_v63  ;;  %v2320_v1 = vpop.permute.xlu1 %2319  ;;  %5202 = vmatprep.subr.bf16.mxu0 %v5201_v9  ;;  %v2366_v40 = vsel %vm598_vm11, %v2354_v63, %v2356_v29 }
 0xa10   : > { %v2324_v32 = vsel %vm578_vm9, %v2318_v35, %v2320_v1  ;;  %v2340_v24 = vsel %vm578_vm9, %v2320_v1, %v2318_v35  ;;  %v2388_v20 = vmul.f32 %v6403_v49, %v2382_v28  ;;  %v2387_v55 = vmul.f32 %v6410_v25, %v2366_v40  ;;  %v8055_v1 = vld [vmem:[#allocation6_spill] sm:$0xff] }
 0xa11   : > { %v2347_v4 = vmul.f32 %v2324_v32, %v5789_v59  ;;  %v2348_v12 = vmul.f32 %v2340_v24, %v5794_v2 }
 0xa12   : > { %5204 = vmatpush1.bf16.msra.mxu0 %v5203_v30  ;;  %v2358_v23 = vpop.permute.xlu0 %2357  ;;  %v5209_v13 = vpack.c.bf16 %v2388_v20, %v2386_v43  ;;  %v5211_v39 = vpack.c.bf16 %v2387_v55, %v2385_v7  ;;  %v8054_v30 = vld [vmem:[#allocation5_spill] sm:$0xff] }
 0xa13   : > { %v5207_v14 = vpack.c.bf16 %v2347_v4, %v2345_v42  ;;  %v2360_v6 = vpop.permute.xlu1 %2359  ;;  %v5205_v26 = vpack.c.bf16 %v2348_v12, %v2346_v3 }
 0xa14   : > { %v2367_v61 = vsel %vm598_vm11, %v2358_v23, %v2360_v6  ;;  %v2383_v19 = vsel %vm598_vm11, %v2360_v6, %v2358_v23 }
 0xa15   : > { %5206 = vmatprep.subr.bf16.mxu0 %v5205_v26  ;;  %v2389_v60 = vmul.f32 %v6410_v25, %v2367_v61  ;;  %v2390_v8 = vmul.f32 %v6403_v49, %v2383_v19 }
 0xa16   : > { %5208 = vmatpush1.bf16.msra.mxu0 %v5207_v14  ;;  %v2362_v35 = vpop.permute.xlu0 %2361 }
 0xa17   : > { %v2364_v27 = vpop.permute.xlu1 %2363  ;;  %5210 = vmatprep.subr.bf16.mxu0 %v5209_v13 }
 0xa18   : > { %v2368_v37 = vsel %vm598_vm11, %v2362_v35, %v2364_v27  ;;  %v2384_v17 = vsel %vm598_vm11, %v2364_v27, %v2362_v35 }
 0xa19   : > { %v2391_v62 = vmul.f32 %v6410_v25, %v2368_v37  ;;  %v2392_v33 = vmul.f32 %v6403_v49, %v2384_v17  ;;  %2468 = vmatmul.mubr.f32.vlgmr.msra.gmra.mrb[18].mxu0 %v8052_v34 }
 0xa1a   : > { %5212 = vmatpush1.bf16.msra.mxu0 %v5211_v39  ;;  %2538 = vmatprep.mubr.f32.mxu0 %v8053_v58 }
 0xa1b   : > { %v5215_v15 = vpack.c.bf16 %v2391_v62, %v2389_v60  ;;  %v5213_v18 = vpack.c.bf16 %v2392_v33, %v2390_v8 }
 0xa1d   : > { %5214 = vmatprep.subr.bf16.mxu0 %v5213_v18 }
 0xa1e   : > { %5216 = vmatpush1.bf16.msra.mxu0 %v5215_v15 }
 0xa21   : > { %4986 = vmatmul.mubr.msk.f32.vlgmr.msra.gmra.mrb[18].mxu0 %vm819_vm13, %v4985_v11 }
 0xa22   : > { %3817 = vmatprep.mubr.f32.mxu0 %v8053_v58 }
 0xa27   : > { %v2395_v25 = vpop.permute.xlu0 %2394 }
 0xa28   : > { %v2551_v49 = vpop.permute.xlu1 %2550 }
 0xaf4   : > { %v2540_v16 = vpop.f32.mrb[18].mxu0 }
 0xaf5   : > { %v5387_v10 = vadd.f32 %v2540_v16, %v2395_v25  ;;  %v2542_v22 = vpop.f32.mrb[19].mxu0 }
 0xaf6   : > { %v5388_v21 = vadd.f32 %v2542_v22, %v2395_v25 }
 0xaf7   : > { %v2553_v29 = vmul.f32 %v5387_v10, %v2551_v49 }
 0xaf8   : > { %v2554_v36 = vmul.f32 %v5388_v21, %v2551_v49  ;;  %v2627_v49 = vpop.permute.xlu1 %2626 }
 0xaf9   : > { %v2555_v31 = vadd.f32 2.0, %v2553_v29  ;;  %v2585_v41 = vrot.slane %v2553_v29, 6 }
 0xafa   : > { %v2556_v38 = vadd.f32 2.0, %v2554_v36  ;;  %v2586_v9 = vrot.slane %v2554_v36, 6 }
 0xafb   : > { %v2557_v63 = vsub.f32 0.0, %v2555_v31  ;;  %v2589_v42 = vadd.f32 %v2585_v41, %v8054_v30  ;;  %v2636_v31 = vpop.permute.xlu0 %2635 }
 0xafc   : > { %v2558_v28 = vsub.f32 0.0, %v2556_v38  ;;  %v2590_v3 = vadd.f32 %v2586_v9, %v8055_v1 }
 0xafd   : > { %v2559_v0 = vmax.f32 %v2557_v63, 0.0 }
 0xafe   : > { %v2560_v32 = vmax.f32 %v2558_v28, 0.0 }
 0xaff   : > { %v2561_v24 = vsub.f32 0.0, %v2559_v0  ;;  %v2567_v40 = vsub.f32 %v2557_v63, %v2559_v0  ;;  %v4991_v63 = vld [vmem:[%s7974_s2 + $0x8] sm:$0xf] }
 0xb00   : > { %v2562_v20 = vsub.f32 0.0, %v2560_v32  ;;  %v2568_v4 = vsub.f32 %v2558_v28, %v2560_v32  ;;  %v8059_v28 = vld [vmem:[#allocation9_spill] sm:$0xff] }
 0xb01   : > { %v2563_v12 = vmul.f32 1.442695, %v2561_v24  ;;  %v2569_v23 = vmul.f32 1.442695, %v2567_v40  ;;  %v8061_v24 = vmov 2   ;;  %v8062_v40 = vmov 3  }
 0xb02   : > { %v2565_v5 = vmul.f32 1.442695, %v2562_v20  ;;  %v2571_v43 = vmul.f32 1.442695, %v2568_v4 }
 0xb03   : > { %5499 = vpow2.f32 %v2563_v12 }
 0xb04   : > { %5501 = vpow2.f32 %v2565_v5 }
 0xb05   : > { %5503 = vpow2.f32 %v2569_v23 }
 0xb06   : > { %5505 = vpow2.f32 %v2571_v43 }
 0xb0d   : > { %v5500_v14 = vpop.eup %5499 }
 0xb0e   : > { %v5502_v6 = vpop.eup %5501 }
 0xb0f   : > { %v5504_v26 = vpop.eup %5503 }
 0xb10   : > { %v5506_v55 = vpop.eup %5505  ;;  %v2573_v13 = vadd.f32 %v5504_v26, %v5500_v14 }
 0xb11   : > { %v2574_v7 = vadd.f32 %v5506_v55, %v5502_v6 }
 0xb12   : > { %5507 = vlog2.f32 %v2573_v13 }
 0xb13   : > { %5509 = vlog2.f32 %v2574_v7 }
 0xb1c   : > { %v5508_v61 = vpop.eup %5507 }
 0xb1d   : > { %v5510_v19 = vpop.eup %5509  ;;  %v2576_v35 = vmul.f32 0.6931472, %v5508_v61 }
 0xb1e   : > { %v2578_v27 = vmul.f32 0.6931472, %v5510_v19 }
 0xb1f   : > { %v2579_v39 = vadd.f32 %v2576_v35, %v2559_v0  ;;  %v4989_v0 = vld [vmem:[%s7978_s6 + $0x50] sm:$0xff] }
 0xb20   : > { %v2580_v37 = vadd.f32 %v2578_v27, %v2560_v32  ;;  %v8060_v32 = vmov 5  }
 0xb21   : > { %v2581_v17 = vsub.f32 0.0, %v2579_v39 }
 0xb22   : > { %v2582_v60 = vsub.f32 0.0, %v2580_v37 }
 0xb23   : > { %v2591_v8 = vmul.f32 1.442695, %v2581_v17  ;;  %v2599_v62 = vrot.slane %v2581_v17, 2 }
 0xb24   : > { %v2593_v33 = vmul.f32 1.442695, %v2582_v60  ;;  %v2600_v34 = vrot.slane %v2582_v60, 2 }
 0xb25   : > { %5511 = vpow2.f32 %v2591_v8  ;;  %v2603_v15 = vsel %vm650_vm7, %v2599_v62, 0.0 }
 0xb26   : > { %5513 = vpow2.f32 %v2593_v33  ;;  %v2604_v18 = vsel %vm650_vm7, %v2600_v34, 0.0 }
 0xb27   : > { %v6845_v11 = vadd.f32 %v2604_v18, %v2603_v15 }
 0xb29   : > { %8056 = vst [vmem:[#allocation8_spill] sm:$0xff] %v6845_v11 }
 0xb2f   : > { %v5512_v25 = vpop.eup %5511 }
 0xb30   : > { %v5514_v16 = vpop.eup %5513  ;;  %v2595_v10 = vmul.f32 %v5512_v25, %v2589_v42 }
 0xb31   : > { %v2596_v22 = vmul.f32 %v5514_v16, %v2590_v3  ;;  %v4990_v3 = vld [vmem:[%s7978_s6 + $0x58] sm:$0xff] }
 0xb32   : > { %v2617_v21 = vsel %vm650_vm7, %v8054_v30, %v2595_v10 }
 0xb33   : > { %v2618_v29 = vsel %vm650_vm7, %v8055_v1, %v2596_v22  ;;  %v2629_v36 = vadd.f32 %v2627_v49, %v2617_v21  ;;  %v4988_v1 = vld [vmem:[%s7978_s6 + $0x48] sm:$0xff] }
 0xb34   : > { %v2630_v41 = vadd.f32 %v2627_v49, %v2618_v29 }
 0xb35   : > { %v2638_v9 = vmul.f32 %v2636_v31, %v2629_v36 }
 0xb36   : > { %v2639_v38 = vmul.f32 %v2636_v31, %v2630_v41 }
 0xb38   : > { %4992 = vmatprep.subr.msk.mxu1 %vm369_vm0, %v2639_v38 }
 0xb39   : > { %4993 = vmatpush1.msk.msra.mxu1 %vm369_vm0, %v2638_v9 }
 0xb3a   : > { %4994 = vmatmul.mubr.msk.f32.vlgmr.msra.gmra.mrb[20].mxu1 %vm365_vm1, %v4991_v63 }
 0xb3b   : > { %2969 = vmatprep.mubr.f32.mxu1 %v8053_v58 }
 0xc0d   : > { %v6858_v30 = vpop.f32.mrb[20].mxu1 }
 0xc0e   : > { %8057 = vst [vmem:[#allocation5_spill] sm:$0xff] %v6858_v30  ;;  %2776 = vrot.lane.b32.xlu0 %v6858_v30, %s5592_s27  ;;  %2746 = vrot.lane.b32.xlu1 %v6858_v30, %s5590_s25  ;;  %v6864_v42 = vpop.f32.mrb[21].mxu1 }
 0xc0f   : > { %8058 = vst [vmem:[#allocation6_spill] sm:$0xff] %v6864_v42 }
 0xc12   : > { %2787 = vrot.lane.b32.xlu0 %v6858_v30, %s5594_s29  ;;  %2757 = vrot.lane.b32.xlu1 %v6858_v30, %s5589_s24 }
 0xc16   : > { %2735 = vrot.lane.b32.xlu1 %v6858_v30, %s5591_s26  ;;  %2754 = vrot.lane.b32.xlu0 %v6864_v42, %s5589_s24 }
 0xc1a   : > { %2768 = vrot.lane.b32.xlu1 %v6858_v30, %s5593_s28  ;;  %2731 = vrot.lane.b32.xlu0 %v6864_v42, %s5591_s26 }
 0xc1e   : > { %2765 = vrot.lane.b32.xlu0 %v6864_v42, %s5593_s28  ;;  %2743 = vrot.lane.b32.xlu1 %v6864_v42, %s5590_s25 }
 0xc22   : > { %2798 = vrot.lane.b32.xlu0 %v6858_v30, %s5595_s30  ;;  %2778 = vrot.lane.b32.xlu1 %v6864_v42, %s5592_s27 }
 0xc26   : > { %2809 = vrot.lane.b32.xlu0 %v6858_v30, %s5596_s10  ;;  %2789 = vrot.lane.b32.xlu1 %v6864_v42, %s5594_s29 }
 0xc2a   : > { %2800 = vrot.lane.b32.xlu1 %v6864_v42, %s5595_s30  ;;  %2869 = vperm.xlu0 %5454, %v8059_v28  }
 0xc2e   : > { %2811 = vrot.lane.b32.xlu1 %v6864_v42, %s5596_s10  ;;  %2884 = vperm.xlu0 %5454, %v4990_v3  }
 0xc32   : > { %2874 = vperm.xlu1 %5455, %v4988_v1   ;;  %5457 = vset.pattern.permute.xlu0 %v8060_v32 }
 0xc33   : > { %3012 = vperm.xlu0 %5457, %v4988_v1  }
 0xc36   : > { %2879 = vperm.xlu1 %5455, %v4989_v0  }
 0xc37   : > { %5458 = vset.pattern.permute.xlu0 %v8061_v24 }
 0xc3a   : > { %5456 = vset.pattern.permute.xlu1 %v8060_v32 }
 0xc3b   : > { %3008 = vperm.xlu1 %5456, %v8059_v28  }
 0xc3f   : > { %3016 = vperm.xlu1 %5456, %v4989_v0  }
 0xc43   : > { %3020 = vperm.xlu1 %5456, %v4990_v3  }
 0xc47   : > { %5459 = vset.pattern.permute.xlu1 %v8062_v40 }
 0xc80   : > { %v2777_v20 = vpop.permute.xlu0 %2776  ;;  %v2747_v4 = vpop.permute.xlu1 %2746 }
 0xc84   : > { %v2788_v12 = vpop.permute.xlu0 %2787  ;;  %v2758_v23 = vpop.permute.xlu1 %2757 }
 0xc88   : > { %v2736_v5 = vpop.permute.xlu1 %2735  ;;  %v2755_v43 = vpop.permute.xlu0 %2754 }
 0xc89   : > { %v2762_v7 = vsel %vm499_vm5, %v2755_v43, %v2758_v23  ;;  %v2759_v19 = vsel %vm499_vm5, %v2758_v23, %v2755_v43 }
 0xc8a   : > { %v2763_v60 = vmul.f32 %v2762_v7, %v5772_v48  ;;  %v2764_v62 = vmul.f32 %v2759_v19, %v5774_v50 }
 0xc8c   : > { %v2769_v14 = vpop.permute.xlu1 %2768  ;;  %v2732_v6 = vpop.permute.xlu0 %2731  ;;  %v2828_v38 = vrot.slane %v2763_v60, 4  ;;  %v2829_v3 = vrot.slane %v2764_v62, 4 }
 0xc8d   : > { %v2737_v8 = vsel %vm459_vm6, %v2736_v5, %v2732_v6  ;;  %v2740_v33 = vsel %vm459_vm6, %v2732_v6, %v2736_v5 }
 0xc8e   : > { %v2742_v22 = vmul.f32 %v2737_v8, %v5766_v45  ;;  %v2741_v36 = vmul.f32 %v2740_v33, %v5764_v44 }
 0xc90   : > { %v2744_v26 = vpop.permute.xlu1 %2743  ;;  %v2766_v35 = vpop.permute.xlu0 %2765 }
 0xc91   : > { %v2748_v55 = vsel %vm479_vm3, %v2747_v4, %v2744_v26  ;;  %v2751_v13 = vsel %vm479_vm3, %v2744_v26, %v2747_v4  ;;  %v2770_v34 = vsel %vm519_vm8, %v2769_v14, %v2766_v35  ;;  %v2773_v18 = vsel %vm519_vm8, %v2766_v35, %v2769_v14 }
 0xc92   : > { %v2753_v61 = vmul.f32 %v2748_v55, %v5770_v47  ;;  %v2752_v27 = vmul.f32 %v2751_v13, %v5768_v46  ;;  %v2774_v9 = vmul.f32 %v2773_v18, %v5776_v51  ;;  %v2775_v63 = vmul.f32 %v2770_v34, %v5778_v52 }
 0xc94   : > { %v2779_v39 = vpop.permute.xlu1 %2778  ;;  %v2823_v15 = vrot.slane %v2753_v61, 6  ;;  %v2822_v25 = vrot.slane %v2752_v27, 6  ;;  %v2799_v28 = vpop.permute.xlu0 %2798  ;;  %v2834_v13 = vrot.slane %v2774_v9, 2  ;;  %v2835_v7 = vrot.slane %v2775_v63, 2 }
 0xc95   : > { %v2780_v37 = vsel %vm538_vm2, %v2777_v20, %v2779_v39  ;;  %v2784_v17 = vsel %vm538_vm2, %v2779_v39, %v2777_v20 }
 0xc96   : > { %v2785_v16 = vmul.f32 %v2780_v37, %v5780_v53  ;;  %v2786_v49 = vmul.f32 %v2784_v17, %v5782_v54  ;;  %v2857_v1 = vsel %vm650_vm7, %v2742_v22, %v2823_v15  ;;  %v2856_v0 = vsel %vm650_vm7, %v2741_v36, %v2822_v25  ;;  %v4996_v36 = vld [vmem:[%s7975_s3 + $0x40] sm:$0xff] }
 0xc97   : > { %v2859_v55 = vsel %vm369_vm0, %v2857_v1, %v2829_v3  ;;  %v2858_v61 = vsel %vm369_vm0, %v2856_v0, %v2828_v38  ;;  %v4999_v38 = vld [vmem:[%s7975_s3 + $0x58] sm:$0xff] }
 0xc98   : > { %v2790_v10 = vpop.permute.xlu1 %2789  ;;  %v2840_v20 = vrot.slane %v2785_v16, 6  ;;  %v2841_v4 = vrot.slane %v2786_v49, 6  ;;  %v2810_v17 = vpop.permute.xlu0 %2809  ;;  %v2861_v8 = vsel %vm655_vm10, %v2859_v55, %v2835_v7  ;;  %v2860_v15 = vsel %vm655_vm10, %v2858_v61, %v2834_v13 }
 0xc99   : > { %v2791_v21 = vsel %vm558_vm4, %v2788_v12, %v2790_v10  ;;  %v2795_v29 = vsel %vm558_vm4, %v2790_v10, %v2788_v12  ;;  %v6956_v10 = vld [vmem:[%s7979_s7 + $0x18] ss:$0 sm:$0xff] }
 0xc9a   : > { %v2796_v31 = vmul.f32 %v2791_v21, %v5784_v56  ;;  %v2797_v41 = vmul.f32 %v2795_v29, %v5786_v57  ;;  %v2862_v19 = vsel %vm650_vm7, %v6858_v30, %v2840_v20  ;;  %v2863_v37 = vsel %vm650_vm7, %v6864_v42, %v2841_v4  ;;  %v6963_v21 = vld [vmem:[%s7979_s7 + $0x10] ss:$0 sm:$0xff] }
 0xc9c   : > { %v2801_v12 = vpop.permute.xlu1 %2800  ;;  %v2846_v23 = vrot.slane %v2796_v31, 4  ;;  %v2847_v5 = vrot.slane %v2797_v41, 4  ;;  %v4997_v31 = vld [vmem:[%s7975_s3 + $0x48] sm:$0xff]  ;;  %v4998_v41 = vld [vmem:[%s7975_s3 + $0x50] sm:$0xff] }
 0xc9d   : > { %v2802_v43 = vsel %vm578_vm9, %v2799_v28, %v2801_v12  ;;  %v2806_v14 = vsel %vm578_vm9, %v2801_v12, %v2799_v28 }
 0xc9e   : > { %v2807_v6 = vmul.f32 %v2802_v43, %v5789_v59  ;;  %v2808_v26 = vmul.f32 %v2806_v14, %v5794_v2  ;;  %v2864_v60 = vsel %vm369_vm0, %v2862_v19, %v2846_v23  ;;  %v2865_v62 = vsel %vm369_vm0, %v2863_v37, %v2847_v5 }
 0xca0   : > { %v2852_v35 = vrot.slane %v2807_v6, 2  ;;  %v2853_v27 = vrot.slane %v2808_v26, 2  ;;  %v2812_v39 = vpop.permute.xlu1 %2811 }
 0xca1   : > { %v2817_v33 = vsel %vm598_vm11, %v2812_v39, %v2810_v17  ;;  %v2813_v49 = vsel %vm598_vm11, %v2810_v17, %v2812_v39 }
 0xca2   : > { %v2867_v34 = vsel %vm655_vm10, %v2865_v62, %v2853_v27  ;;  %v2866_v18 = vsel %vm655_vm10, %v2864_v60, %v2852_v35  ;;  %v2819_v22 = vmul.f32 %v6956_v10, %v2817_v33  ;;  %v2818_v29 = vmul.f32 %v6963_v21, %v2813_v49  ;;  %v5008_v49 = vld [vmem:[%s7976_s4 + $0x50] sm:$0xff] }
 0xca3   : > { %v5217_v25 = vpack.c.bf16 %v2867_v34, %v2861_v8  ;;  %v5219_v16 = vpack.c.bf16 %v2866_v18, %v2860_v15 }
 0xca5   : > { %5218 = vmatprep.subr.bf16.mxu1 %v5217_v25  ;;  %v5006_v25 = vld [vmem:[%s7976_s4 + $0x40] sm:$0xff] }
 0xca6   : > { %5220 = vmatpush1.bf16.msra.mxu1 %v5219_v16  ;;  %v5007_v16 = vld [vmem:[%s7976_s4 + $0x48] sm:$0xff] }
 0xca7   : > { %5000 = vmatprep.subr.msk.mxu1 %vm650_vm7, %v2819_v22  ;;  %v5009_v22 = vld [vmem:[%s7976_s4 + $0x58] sm:$0xff] }
 0xca9   : > { %v2870_v9 = vpop.permute.xlu0 %2869 }
 0xcaa   : > { %5001 = vmatpush1.msk.msra.mxu1 %vm650_vm7, %v2818_v29 }
 0xcab   : > { %5002 = vmatmul.mubr.msk.f32.vlgmr.msra.gmra.mrb[22].mxu1 %vm683_vm12, %v4996_v36 }
 0xcac   : > { %2975 = vmatprep.mubr.f32.mxu1 %v8053_v58 }
 0xcad   : > { %v2885_v35 = vpop.permute.xlu0 %2884 }
 0xcaf   : > { %5003 = vmatmul.mubr.msk.f32.gmra.mrb[24].mxu1 %vm683_vm12, %v4997_v31 }
 0xcb0   : > { %2981 = vmatprep.mubr.f32.mxu1 %v8053_v58 }
 0xcb1   : > { %v2875_v1 = vpop.permute.xlu1 %2874 }
 0xcb3   : > { %5004 = vmatmul.mubr.msk.f32.gmra.mrb[26].mxu1 %vm683_vm12, %v4998_v41 }
 0xcb4   : > { %2987 = vmatprep.mubr.f32.mxu1 %v8053_v58 }
 0xcb5   : > { %v2880_v26 = vpop.permute.xlu1 %2879 }
 0xcb7   : > { %5005 = vmatmul.mubr.msk.f32.gmra.mrb[28].mxu1 %vm683_vm12, %v4999_v38 }
 0xcb8   : > { %3099 = vmatprep.mubr.f32.mxu1 %v8053_v58 }
 0xcba   : > { %v3009_v29 = vpop.permute.xlu1 %3008 }
 0xd7e   : > { %v2971_v63 = vpop.f32.mrb[22].mxu1 }
 0xd7f   : > { %v2973_v28 = vpop.f32.mrb[23].mxu1  ;;  %v2972_v3 = vadd.f32 %v2971_v63, %v2870_v9 }
 0xd80   : > { %v2974_v0 = vadd.f32 %v2973_v28, %v2870_v9  ;;  %v3013_v9 = vpop.permute.xlu0 %3012 }
 0xd81   : > { %v2994_v5 = vmax.f32 %v2972_v3, 0.0 }
 0xd82   : > { %v2977_v20 = vpop.f32.mrb[24].mxu1  ;;  %v2995_v14 = vmax.f32 %v2974_v0, 0.0 }
 0xd83   : > { %v2978_v4 = vadd.f32 %v2977_v20, %v2875_v1  ;;  %v2979_v12 = vpop.f32.mrb[25].mxu1 }
 0xd84   : > { %v2980_v23 = vadd.f32 %v2979_v12, %v2875_v1 }
 0xd85   : > { %v2996_v43 = vmax.f32 %v2978_v4, 0.0 }
 0xd86   : > { %v2997_v6 = vmax.f32 %v2980_v23, 0.0  ;;  %v2983_v55 = vpop.f32.mrb[26].mxu1 }
 0xd87   : > { %v5223_v13 = vpack.c.bf16 %v2996_v43, %v2994_v5  ;;  %v2985_v7 = vpop.f32.mrb[27].mxu1  ;;  %v2984_v19 = vadd.f32 %v2983_v55, %v2880_v26 }
 0xd88   : > { %v5221_v61 = vpack.c.bf16 %v2997_v6, %v2995_v14  ;;  %v2986_v27 = vadd.f32 %v2985_v7, %v2880_v26  ;;  %v3017_v6 = vpop.permute.xlu1 %3016 }
 0xd89   : > { %v2998_v8 = vmax.f32 %v2984_v19, 0.0 }
 0xd8a   : > { %v2989_v39 = vpop.f32.mrb[28].mxu1  ;;  %5222 = vmatprep.subr.bf16.mxu1 %v5221_v61  ;;  %v2999_v33 = vmax.f32 %v2986_v27, 0.0 }
 0xd8b   : > { %v2990_v37 = vadd.f32 %v2989_v39, %v2885_v35  ;;  %v2991_v17 = vpop.f32.mrb[29].mxu1  ;;  %5224 = vmatpush1.bf16.msra.mxu1 %v5223_v13 }
 0xd8c   : > { %v2992_v60 = vadd.f32 %v2991_v17, %v2885_v35  ;;  %v3021_v13 = vpop.permute.xlu1 %3020 }
 0xd8d   : > { %v3000_v62 = vmax.f32 %v2990_v37, 0.0  ;;  %v5558_v37 = vld [vmem:[%s7978_s6 + $0x40] sm:$0xff] }
 0xd8e   : > { %v3001_v34 = vmax.f32 %v2992_v60, 0.0  ;;  %v3647_v17 = vmul.f32 3.0, %v5558_v37  ;;  %v7140_v60 = vld [vmem:[%s7977_s5 + $0x18] sm:$0xff] }
 0xd8f   : > { %v5227_v15 = vpack.c.bf16 %v3000_v62, %v2998_v8  ;;  %8063 = vst [vmem:[#allocation9_spill] sm:$0xff] %v7140_v60  ;;  %v3501_v8 = vcombine.high %v7140_v60, %v7140_v60 }
 0xd90   : > { %v5225_v18 = vpack.c.bf16 %v3001_v34, %v2999_v33  ;;  %v3648_v62 = vmul.f32 1.442695, %v3647_v17 }
 0xd92   : > { %5226 = vmatprep.subr.bf16.mxu1 %v5225_v18  ;;  %5515 = vpow2.f32 %v3648_v62 }
 0xd93   : > { %5228 = vmatpush1.bf16.msra.mxu1 %v5227_v15 }
 0xd96   : > { %5010 = vmatmul.mubr.msk.f32.vlgmr.msra.gmra.mrb[30].mxu1 %vm819_vm13, %v5006_v25  ;;  %v7161_v25 = vld [vmem:[%s7978_s6 + $0x60] sm:$0xff] }
 0xd97   : > { %3105 = vmatprep.mubr.f32.mxu1 %v8053_v58  ;;  %8064 = vst [vmem:[#allocation10_spill] sm:$0xff] %v7161_v25 }
 0xd9a   : > { %5011 = vmatmul.mubr.msk.f32.gmra.mrb[32].mxu1 %vm819_vm13, %v5007_v16 }
 0xd9b   : > { %3111 = vmatprep.mubr.f32.mxu1 %v8053_v58 }
 0xd9e   : > { %5012 = vmatmul.mubr.msk.f32.gmra.mrb[34].mxu1 %vm819_vm13, %v5008_v49  ;;  %v3733_v49 = vmul.f32 1.442695, %v7161_v25 }
 0xd9f   : > { %3117 = vmatprep.mubr.f32.mxu1 %v8053_v58 }
 0xda0   : > { %5517 = vpow2.f32 %v3733_v49 }
 0xda2   : > { %5013 = vmatmul.mubr.msk.f32.gmra.mrb[36].mxu1 %vm819_vm13, %v5009_v22 }
 0xda3   : > { %3569 = vmatprep.mubr.f32.mxu1 %v3501_v8 }
 0xe69   : > { %v3101_v36 = vpop.f32.mrb[30].mxu1 }
 0xe6a   : > { %v3102_v31 = vadd.f32 %v3101_v36, %v3009_v29  ;;  %v3103_v41 = vpop.f32.mrb[31].mxu1 }
 0xe6b   : > { %v3104_v38 = vadd.f32 %v3103_v41, %v3009_v29  ;;  %v5516_v29 = vpop.eup %5515 }
 0xe6c   : > { %v7006_v63 = vmax.f32 %v3102_v31, 0.0 }
 0xe6d   : > { %v7008_v28 = vmax.f32 %v3104_v38, 0.0  ;;  %v3107_v1 = vpop.f32.mrb[32].mxu1 }
 0xe6e   : > { %v3108_v3 = vadd.f32 %v3107_v1, %v3013_v9  ;;  %v3109_v0 = vpop.f32.mrb[33].mxu1  ;;  %3155 = vrot.lane.b32.xlu0 %v7006_v63, %s5591_s26  ;;  %v8066_v1 = vmov 0  }
 0xe6f   : > { %3321 = vrot.lane.b32.xlu1 %v7008_v28, %s5592_s27  ;;  %v3110_v43 = vadd.f32 %v3109_v0, %v3013_v9  ;;  %v8065_v9 = vmov 1  }
 0xe70   : > { %v7014_v20 = vmax.f32 %v3108_v3, 0.0  ;;  %v5518_v3 = vpop.eup %5517 }
 0xe71   : > { %v3113_v4 = vpop.f32.mrb[34].mxu1  ;;  %v7032_v14 = vmax.f32 %v3110_v43, 0.0 }
 0xe72   : > { %v3115_v12 = vpop.f32.mrb[35].mxu1  ;;  %3199 = vrot.lane.b32.xlu0 %v7006_v63, %s5590_s25  ;;  %v3114_v26 = vadd.f32 %v3113_v4, %v3017_v6 }
 0xe73   : > { %3157 = vrot.lane.b32.xlu1 %v7014_v20, %s5591_s26  ;;  %v3116_v55 = vadd.f32 %v3115_v12, %v3017_v6 }
 0xe74   : > { %v7054_v7 = vmax.f32 %v3114_v26, 0.0 }
 0xe75   : > { %v3119_v23 = vpop.f32.mrb[36].mxu1  ;;  %v7056_v61 = vmax.f32 %v3116_v55, 0.0 }
 0xe76   : > { %v3121_v5 = vpop.f32.mrb[37].mxu1  ;;  %3243 = vrot.lane.b32.xlu0 %v7006_v63, %s5589_s24  ;;  %v3120_v19 = vadd.f32 %v3119_v23, %v3021_v13 }
 0xe77   : > { %3201 = vrot.lane.b32.xlu1 %v7014_v20, %s5590_s25  ;;  %v3122_v27 = vadd.f32 %v3121_v5, %v3021_v13 }
 0xe78   : > { %v7062_v35 = vmax.f32 %v3120_v19, 0.0 }
 0xe79   : > { %v7080_v39 = vmax.f32 %v3122_v27, 0.0  ;;  %v8067_v27 = vmov 4  }
 0xe7a   : > { %3287 = vrot.lane.b32.xlu0 %v7006_v63, %s5593_s28 }
 0xe7b   : > { %3245 = vrot.lane.b32.xlu1 %v7014_v20, %s5589_s24 }
 0xe7e   : > { %3319 = vrot.lane.b32.xlu0 %v7006_v63, %s5592_s27 }
 0xe7f   : > { %3289 = vrot.lane.b32.xlu1 %v7014_v20, %s5593_s28 }
 0xe82   : > { %3139 = vrot.lane.b32.xlu0 %v7008_v28, %s5591_s26 }
 0xe83   : > { %3141 = vrot.lane.b32.xlu1 %v7032_v14, %s5591_s26 }
 0xe86   : > { %3187 = vrot.lane.b32.xlu0 %v7008_v28, %s5590_s25 }
 0xe87   : > { %3189 = vrot.lane.b32.xlu1 %v7032_v14, %s5590_s25 }
 0xe8a   : > { %3231 = vrot.lane.b32.xlu0 %v7008_v28, %s5589_s24 }
 0xe8b   : > { %3233 = vrot.lane.b32.xlu1 %v7032_v14, %s5589_s24 }
 0xe8e   : > { %3275 = vrot.lane.b32.xlu0 %v7008_v28, %s5593_s28 }
 0xe8f   : > { %3277 = vrot.lane.b32.xlu1 %v7032_v14, %s5593_s28 }
 0xe92   : > { %3323 = vrot.lane.b32.xlu0 %v7014_v20, %s5592_s27 }
 0xe93   : > { %3325 = vrot.lane.b32.xlu1 %v7032_v14, %s5592_s27 }
 0xe96   : > { %3159 = vrot.lane.b32.xlu0 %v7054_v7, %s5591_s26 }
 0xe97   : > { %3329 = vrot.lane.b32.xlu1 %v7056_v61, %s5592_s27 }
 0xe9a   : > { %3203 = vrot.lane.b32.xlu0 %v7054_v7, %s5590_s25 }
 0xe9b   : > { %3161 = vrot.lane.b32.xlu1 %v7062_v35, %s5591_s26 }
 0xe9e   : > { %3247 = vrot.lane.b32.xlu0 %v7054_v7, %s5589_s24 }
 0xe9f   : > { %3205 = vrot.lane.b32.xlu1 %v7062_v35, %s5590_s25 }
 0xea2   : > { %3291 = vrot.lane.b32.xlu0 %v7054_v7, %s5593_s28 }
 0xea3   : > { %3249 = vrot.lane.b32.xlu1 %v7062_v35, %s5589_s24 }
 0xea6   : > { %3327 = vrot.lane.b32.xlu0 %v7054_v7, %s5592_s27 }
 0xea7   : > { %3293 = vrot.lane.b32.xlu1 %v7062_v35, %s5593_s28 }
 0xeaa   : > { %3143 = vrot.lane.b32.xlu0 %v7056_v61, %s5591_s26 }
 0xeab   : > { %3145 = vrot.lane.b32.xlu1 %v7080_v39, %s5591_s26 }
 0xeae   : > { %3363 = vrot.lane.b32.xlu0 %v7006_v63, %s5594_s29 }
 0xeaf   : > { %3365 = vrot.lane.b32.xlu1 %v7008_v28, %s5594_s29 }
 0xeb2   : > { %3191 = vrot.lane.b32.xlu0 %v7056_v61, %s5590_s25 }
 0xeb3   : > { %3193 = vrot.lane.b32.xlu1 %v7080_v39, %s5590_s25 }
 0xeb6   : > { %3235 = vrot.lane.b32.xlu0 %v7056_v61, %s5589_s24 }
 0xeb7   : > { %3369 = vrot.lane.b32.xlu1 %v7032_v14, %s5594_s29 }
 0xeba   : > { %3279 = vrot.lane.b32.xlu0 %v7056_v61, %s5593_s28 }
 0xebb   : > { %3237 = vrot.lane.b32.xlu1 %v7080_v39, %s5589_s24 }
 0xebe   : > { %3331 = vrot.lane.b32.xlu0 %v7062_v35, %s5592_s27 }
 0xebf   : > { %3373 = vrot.lane.b32.xlu1 %v7056_v61, %s5594_s29 }
 0xec2   : > { %3367 = vrot.lane.b32.xlu0 %v7014_v20, %s5594_s29 }
 0xec3   : > { %3281 = vrot.lane.b32.xlu1 %v7080_v39, %s5593_s28 }
 0xec6   : > { %3371 = vrot.lane.b32.xlu0 %v7054_v7, %s5594_s29 }
 0xec7   : > { %3409 = vrot.lane.b32.xlu1 %v7008_v28, %s5595_s30 }
 0xeca   : > { %3375 = vrot.lane.b32.xlu0 %v7062_v35, %s5594_s29 }
 0xecb   : > { %3413 = vrot.lane.b32.xlu1 %v7032_v14, %s5595_s30 }
 0xece   : > { %3407 = vrot.lane.b32.xlu0 %v7006_v63, %s5595_s30 }
 0xecf   : > { %3417 = vrot.lane.b32.xlu1 %v7056_v61, %s5595_s30 }
 0xed2   : > { %3411 = vrot.lane.b32.xlu0 %v7014_v20, %s5595_s30 }
 0xed3   : > { %3333 = vrot.lane.b32.xlu1 %v7080_v39, %s5592_s27 }
 0xed6   : > { %3415 = vrot.lane.b32.xlu0 %v7054_v7, %s5595_s30 }
 0xed7   : > { %3453 = vrot.lane.b32.xlu1 %v7008_v28, %s5596_s10 }
 0xeda   : > { %3419 = vrot.lane.b32.xlu0 %v7062_v35, %s5595_s30 }
 0xedb   : > { %3377 = vrot.lane.b32.xlu1 %v7080_v39, %s5594_s29 }
 0xede   : > { %3451 = vrot.lane.b32.xlu0 %v7006_v63, %s5596_s10 }
 0xedf   : > { %3457 = vrot.lane.b32.xlu1 %v7032_v14, %s5596_s10 }
 0xee0   : > { %v3156_v33 = vpop.permute.xlu0 %3155 }
 0xee1   : > { %v7148_v34 = vpop.permute.xlu1 %3321 }
 0xee2   : > { %3455 = vrot.lane.b32.xlu0 %v7014_v20, %s5596_s10 }
 0xee3   : > { %3421 = vrot.lane.b32.xlu1 %v7080_v39, %s5595_s30 }
 0xee4   : > { %v3200_v15 = vpop.permute.xlu0 %3199 }
 0xee5   : > { %v3158_v18 = vpop.permute.xlu1 %3157 }
 0xee6   : > { %3459 = vrot.lane.b32.xlu0 %v7054_v7, %s5596_s10 }
 0xee7   : > { %3461 = vrot.lane.b32.xlu1 %v7056_v61, %s5596_s10 }
 0xee8   : > { %v7163_v16 = vpop.permute.xlu0 %3243 }
 0xee9   : > { %v3202_v22 = vpop.permute.xlu1 %3201 }
 0xeea   : > { %3463 = vrot.lane.b32.xlu0 %v7062_v35, %s5596_s10 }
 0xeeb   : > { %3465 = vrot.lane.b32.xlu1 %v7080_v39, %s5596_s10 }
 0xeec   : > { %v7170_v36 = vpop.permute.xlu0 %3287 }
 0xeed   : > { %v7172_v31 = vpop.permute.xlu1 %3245 }
 0xeee   : > { %3496 = vperm.xlu0 %5458, %v5558_v37  }
 0xeef   : > { %3652 = vperm.xlu1 %5459, %v5516_v29  }
 0xef0   : > { %v7174_v41 = vpop.permute.xlu0 %3319 }
 0xef1   : > { %v7176_v38 = vpop.permute.xlu1 %3289 }
 0xef2   : > { %5461 = vset.pattern.permute.xlu0 %v8065_v9 }
 0xef3   : > { %5460 = vset.pattern.permute.xlu1 %v8066_v1  ;;  %3737 = vperm.xlu0 %5461, %v5518_v3  }
 0xef4   : > { %v3140_v0 = vpop.permute.xlu0 %3139  ;;  %3728 = vperm.xlu1 %5460, %v7161_v25  }
 0xef5   : > { %v3163_v4 = vsel %vm459_vm6, %v3156_v33, %v3140_v0  ;;  %v3175_v12 = vsel %vm459_vm6, %v3140_v0, %v3156_v33  ;;  %v3142_v23 = vpop.permute.xlu1 %3141 }
 0xef6   : > { %v3179_v5 = vmul.f32 %v3175_v12, %v5764_v44  ;;  %v3180_v43 = vmul.f32 %v3163_v4, %v5766_v45  ;;  %v3164_v6 = vsel %vm459_vm6, %v3158_v18, %v3142_v23  ;;  %v3176_v26 = vsel %vm459_vm6, %v3142_v23, %v3158_v18 }
 0xef7   : > { %v3181_v55 = vmul.f32 %v3176_v26, %v5764_v44  ;;  %v3182_v13 = vmul.f32 %v3164_v6, %v5766_v45  ;;  %5462 = vset.pattern.permute.xlu0 %v8067_v27 }
 0xef8   : > { %v3188_v19 = vpop.permute.xlu0 %3187  ;;  %5463 = vset.pattern.permute.xlu1 %v8067_v27 }
 0xef9   : > { %v5231_v37 = vpack.c.bf16 %v3181_v55, %v3179_v5  ;;  %v3190_v17 = vpop.permute.xlu1 %3189  ;;  %v5229_v8 = vpack.c.bf16 %v3182_v13, %v3180_v43  ;;  %v3207_v55 = vsel %vm479_vm3, %v3200_v15, %v3188_v19 }
 0xefa   : > { %v3208_v13 = vsel %vm479_vm3, %v3202_v22, %v3190_v17  ;;  %v3224_v58 = vmul.f32 %v3207_v55, %v5770_v47 }
 0xefb   : > { %5230 = vmatprep.subr.bf16.mxu1 %v5229_v8  ;;  %v3220_v8 = vsel %vm479_vm3, %v3190_v17, %v3202_v22  ;;  %v3226_v60 = vmul.f32 %v3208_v13, %v5770_v47 }
 0xefc   : > { %v3232_v62 = vpop.permute.xlu0 %3231  ;;  %5232 = vmatpush1.bf16.msra.mxu1 %v5231_v37  ;;  %v3219_v37 = vsel %vm479_vm3, %v3188_v19, %v3200_v15  ;;  %v3225_v17 = vmul.f32 %v3220_v8, %v5768_v46 }
 0xefd   : > { %v3234_v33 = vpop.permute.xlu1 %3233  ;;  %v3223_v19 = vmul.f32 %v3219_v37, %v5768_v46  ;;  %v3251_v55 = vsel %vm499_vm5, %v7163_v16, %v3232_v62  ;;  %v3263_v13 = vsel %vm499_vm5, %v3232_v62, %v7163_v16 }
 0xf00   : > { %v7191_v49 = vpop.permute.xlu0 %3275 }
 0xf01   : > { %v7193_v29 = vpop.permute.xlu1 %3277 }
 0xf04   : > { %v7195_v18 = vpop.permute.xlu0 %3323 }
 0xf05   : > { %v7197_v9 = vpop.permute.xlu1 %3325 }
 0xf08   : > { %v3160_v1 = vpop.permute.xlu0 %3159 }
 0xf09   : > { %v7199_v3 = vpop.permute.xlu1 %3329 }
 0xf0c   : > { %v3204_v0 = vpop.permute.xlu0 %3203 }
 0xf0d   : > { %v3162_v4 = vpop.permute.xlu1 %3161 }
 0xf10   : > { %v3248_v12 = vpop.permute.xlu0 %3247 }
 0xf11   : > { %v3206_v23 = vpop.permute.xlu1 %3205 }
 0xf14   : > { %v7201_v5 = vpop.permute.xlu0 %3291 }
 0xf15   : > { %v7203_v43 = vpop.permute.xlu1 %3249 }
 0xf18   : > { %v7205_v6 = vpop.permute.xlu0 %3327 }
 0xf19   : > { %v7207_v26 = vpop.permute.xlu1 %3293 }
 0xf1c   : > { %v3144_v27 = vpop.permute.xlu0 %3143 }
 0xf1d   : > { %v3165_v11 = vsel %vm459_vm6, %v3160_v1, %v3144_v27  ;;  %v3177_v40 = vsel %vm459_vm6, %v3144_v27, %v3160_v1  ;;  %v3146_v24 = vpop.permute.xlu1 %3145 }
 0xf1e   : > { %v3183_v32 = vmul.f32 %v3177_v40, %v5764_v44  ;;  %v3184_v25 = vmul.f32 %v3165_v11, %v5766_v45  ;;  %v3166_v42 = vsel %vm459_vm6, %v3162_v4, %v3146_v24  ;;  %v3178_v30 = vsel %vm459_vm6, %v3146_v24, %v3162_v4 }
 0xf1f   : > { %v3185_v15 = vmul.f32 %v3178_v30, %v5764_v44  ;;  %v3186_v22 = vmul.f32 %v3166_v42, %v5766_v45  ;;  %v5237_v24 = vpack.c.bf16 %v3226_v60, %v3224_v58  ;;  %v5239_v4 = vpack.c.bf16 %v3225_v17, %v3223_v19 }
 0xf20   : > { %v7225_v1 = vpop.permute.xlu0 %3363  ;;  %v3252_v30 = vsel %vm499_vm5, %v7172_v31, %v3234_v33  ;;  %v3268_v19 = vmul.f32 %v3251_v55, %v5774_v50  ;;  %v3296_v55 = vsel %vm519_vm8, %v7176_v38, %v7193_v29 }
 0xf21   : > { %v5235_v40 = vpack.c.bf16 %v3185_v15, %v3183_v32  ;;  %v7227_v11 = vpop.permute.xlu1 %3365  ;;  %v5233_v27 = vpack.c.bf16 %v3186_v22, %v3184_v25  ;;  %v3264_v32 = vsel %vm499_vm5, %v3234_v33, %v7172_v31  ;;  %v3270_v16 = vmul.f32 %v3252_v30, %v5774_v50 }
 0xf22   : > { %v3269_v17 = vmul.f32 %v3264_v32, %v5772_v48 }
 0xf23   : > { %5234 = vmatprep.subr.bf16.mxu1 %v5233_v27  ;;  %v5245_v30 = vpack.c.bf16 %v3270_v16, %v3268_v19 }
 0xf24   : > { %v3192_v42 = vpop.permute.xlu0 %3191  ;;  %5236 = vmatpush1.bf16.msra.mxu1 %v5235_v40 }
 0xf25   : > { %v3209_v37 = vsel %vm479_vm3, %v3204_v0, %v3192_v42  ;;  %v3221_v25 = vsel %vm479_vm3, %v3192_v42, %v3204_v0  ;;  %5238 = vmatprep.subr.bf16.mxu1 %v5237_v24  ;;  %v3194_v58 = vpop.permute.xlu1 %3193  ;;  %v3267_v0 = vmul.f32 %v3263_v13, %v5772_v48 }
 0xf26   : > { %v3227_v60 = vmul.f32 %v3221_v25, %v5768_v46  ;;  %v3228_v8 = vmul.f32 %v3209_v37, %v5770_v47  ;;  %v3210_v15 = vsel %vm479_vm3, %v3206_v23, %v3194_v58  ;;  %v3222_v22 = vsel %vm479_vm3, %v3194_v58, %v3206_v23 }
 0xf27   : > { %v3229_v31 = vmul.f32 %v3222_v22, %v5768_v46  ;;  %v3230_v62 = vmul.f32 %v3210_v15, %v5770_v47  ;;  %v3295_v23 = vsel %vm519_vm8, %v7170_v36, %v7191_v49  ;;  %v5247_v32 = vpack.c.bf16 %v3269_v17, %v3267_v0 }
 0xf28   : > { %v3236_v33 = vpop.permute.xlu0 %3235  ;;  %5240 = vmatpush1.bf16.msra.mxu1 %v5239_v4  ;;  %v3307_v37 = vsel %vm519_vm8, %v7191_v49, %v7170_v36  ;;  %v3312_v25 = vmul.f32 %v3295_v23, %v5778_v52 }
 0xf29   : > { %v5243_v40 = vpack.c.bf16 %v3229_v31, %v3227_v60  ;;  %v7249_v27 = vpop.permute.xlu1 %3369  ;;  %v5241_v24 = vpack.c.bf16 %v3230_v62, %v3228_v8  ;;  %v3253_v4 = vsel %vm499_vm5, %v3248_v12, %v3236_v33  ;;  %v3265_v42 = vsel %vm499_vm5, %v3236_v33, %v3248_v12 }
 0xf2a   : > { %v3308_v60 = vsel %vm519_vm8, %v7193_v29, %v7176_v38  ;;  %v3314_v8 = vmul.f32 %v3296_v55, %v5778_v52  ;;  %v3271_v22 = vmul.f32 %v3265_v42, %v5772_v48  ;;  %v3272_v36 = vmul.f32 %v3253_v4, %v5774_v50 }
 0xf2b   : > { %5242 = vmatprep.subr.bf16.mxu1 %v5241_v24  ;;  %v3311_v62 = vmul.f32 %v3307_v37, %v5776_v51  ;;  %v3313_v33 = vmul.f32 %v3308_v60, %v5776_v51  ;;  %v5261_v60 = vpack.c.bf16 %v7032_v14, %v7008_v28  ;;  %v5265_v14 = vpack.c.bf16 %v7080_v39, %v7056_v61 }
 0xf2c   : > { %v3280_v13 = vpop.permute.xlu0 %3279  ;;  %5244 = vmatpush1.bf16.msra.mxu1 %v5243_v40 }
 0xf2d   : > { %5246 = vmatprep.subr.bf16.mxu1 %v5245_v30  ;;  %v3238_v58 = vpop.permute.xlu1 %3237  ;;  %v3297_v0 = vsel %vm519_vm8, %v7201_v5, %v3280_v13  ;;  %v3309_v17 = vsel %vm519_vm8, %v3280_v13, %v7201_v5  ;;  %v5255_v23 = vpack.c.bf16 %v3313_v33, %v3311_v62 }
 0xf2e   : > { %v3254_v12 = vsel %vm499_vm5, %v7203_v43, %v3238_v58  ;;  %v3266_v15 = vsel %vm499_vm5, %v3238_v58, %v7203_v43  ;;  %v5253_v43 = vpack.c.bf16 %v3314_v8, %v3312_v25  ;;  %v3315_v4 = vmul.f32 %v3309_v17, %v5776_v51 }
 0xf2f   : > { %v3273_v49 = vmul.f32 %v3266_v15, %v5772_v48  ;;  %v3274_v19 = vmul.f32 %v3254_v12, %v5774_v50  ;;  %v3316_v42 = vmul.f32 %v3297_v0, %v5778_v52  ;;  %v3351_v15 = vsel %vm538_vm2, %v7148_v34, %v7174_v41 }
 0xf30   : > { %v3332_v16 = vpop.permute.xlu0 %3331  ;;  %5248 = vmatpush1.bf16.msra.mxu1 %v5247_v32 }
 0xf31   : > { %v5251_v31 = vpack.c.bf16 %v3273_v49, %v3271_v22  ;;  %v7275_v38 = vpop.permute.xlu1 %3373  ;;  %v5249_v29 = vpack.c.bf16 %v3274_v19, %v3272_v36  ;;  %v3336_v22 = vsel %vm538_vm2, %v7195_v18, %v7197_v9  ;;  %v5263_v36 = vpack.c.bf16 %v7014_v20, %v7006_v63 }
 0xf32   : > { %v3335_v49 = vsel %vm538_vm2, %v7174_v41, %v7148_v34  ;;  %v3337_v63 = vsel %vm538_vm2, %v7205_v6, %v7199_v3  ;;  %v5267_v20 = vpack.c.bf16 %v7062_v35, %v7054_v7  ;;  %v3353_v34 = vsel %vm538_vm2, %v7199_v3, %v7205_v6 }
 0xf33   : > { %5250 = vmatprep.subr.bf16.mxu1 %v5249_v29  ;;  %v3357_v29 = vmul.f32 %v3336_v22, %v5780_v53  ;;  %v3355_v61 = vmul.f32 %v3335_v49, %v5780_v53  ;;  %v3359_v33 = vmul.f32 %v3337_v63, %v5780_v53  ;;  %v3395_v7 = vsel %vm558_vm4, %v7227_v11, %v7225_v1 }
 0xf34   : > { %v3368_v40 = vpop.permute.xlu0 %3367  ;;  %5252 = vmatpush1.bf16.msra.mxu1 %v5251_v31  ;;  %v3356_v31 = vmul.f32 %v3351_v15, %v5782_v54  ;;  %v3360_v6 = vmul.f32 %v3353_v34, %v5782_v54 }
 0xf35   : > { %5254 = vmatprep.subr.bf16.mxu1 %v5253_v43  ;;  %v3282_v24 = vpop.permute.xlu1 %3281  ;;  %v3396_v41 = vsel %vm558_vm4, %v7249_v27, %v3368_v40  ;;  %v5271_v62 = vpack.c.bf16 %v3357_v29, %v3355_v61  ;;  %v3380_v35 = vsel %vm558_vm4, %v3368_v40, %v7249_v27  ;;  %v3400_v27 = vmul.f32 %v3395_v7, %v5786_v57 }
 0xf36   : > { %v3298_v55 = vsel %vm519_vm8, %v7207_v26, %v3282_v24  ;;  %v3310_v30 = vsel %vm519_vm8, %v3282_v24, %v7207_v26  ;;  %v3352_v26 = vsel %vm538_vm2, %v7197_v9, %v7195_v18  ;;  %v3402_v17 = vmul.f32 %v3396_v41, %v5786_v57 }
 0xf37   : > { %v3317_v32 = vmul.f32 %v3310_v30, %v5776_v51  ;;  %v3318_v37 = vmul.f32 %v3298_v55, %v5778_v52  ;;  %v3358_v28 = vmul.f32 %v3352_v26, %v5782_v54  ;;  %v3379_v55 = vsel %vm558_vm4, %v7225_v1, %v7227_v11 }
 0xf38   : > { %v3372_v5 = vpop.permute.xlu0 %3371  ;;  %5256 = vmatpush1.bf16.msra.mxu1 %v5255_v23  ;;  %v3401_v40 = vmul.f32 %v3380_v35, %v5784_v56 }
 0xf39   : > { %v5259_v13 = vpack.c.bf16 %v3317_v32, %v3315_v4  ;;  %v7291_v25 = vpop.permute.xlu1 %3409  ;;  %v5257_v58 = vpack.c.bf16 %v3318_v37, %v3316_v42  ;;  %v5269_v39 = vpack.c.bf16 %v3358_v28, %v3356_v31  ;;  %v3381_v32 = vsel %vm558_vm4, %v3372_v5, %v7275_v38 }
 0xf3a   : > { %v3399_v37 = vmul.f32 %v3379_v55, %v5784_v56  ;;  %v3403_v26 = vmul.f32 %v3381_v32, %v5784_v56 }
 0xf3b   : > { %5258 = vmatprep.subr.bf16.mxu1 %v5257_v58  ;;  %v3397_v58 = vsel %vm558_vm4, %v7275_v38, %v3372_v5 }
 0xf3c   : > { %v3376_v8 = vpop.permute.xlu0 %3375  ;;  %5260 = vmatpush1.bf16.msra.mxu1 %v5259_v13  ;;  %v5277_v13 = vpack.c.bf16 %v3402_v17, %v3400_v27  ;;  %v3404_v38 = vmul.f32 %v3397_v58, %v5786_v57 }
 0xf3d   : > { %5262 = vmatprep.subr.bf16.mxu1 %v5261_v60  ;;  %v3414_v12 = vpop.permute.xlu1 %3413  ;;  %v5279_v60 = vpack.c.bf16 %v3401_v40, %v3399_v37 }
 0xf40   : > { %v3408_v19 = vpop.permute.xlu0 %3407  ;;  %5264 = vmatpush1.bf16.msra.mxu1 %v5263_v36 }
 0xf41   : > { %5266 = vmatprep.subr.bf16.mxu1 %v5265_v14  ;;  %v3418_v18 = vpop.permute.xlu1 %3417  ;;  %v3439_v22 = vsel %vm578_vm9, %v7291_v25, %v3408_v19  ;;  %v3423_v29 = vsel %vm578_vm9, %v3408_v19, %v7291_v25 }
 0xf42   : > { %v3443_v41 = vmul.f32 %v3423_v29, %v5789_v59  ;;  %v5015_v29 = vld [vmem:[%s7977_s5 + $0x20] sm:$0xf] }
 0xf44   : > { %v3412_v9 = vpop.permute.xlu0 %3411  ;;  %5268 = vmatpush1.bf16.msra.mxu1 %v5267_v20  ;;  %v3444_v20 = vmul.f32 %v3439_v22, %v5794_v2 }
 0xf45   : > { %5270 = vmatprep.subr.bf16.mxu1 %v5269_v39  ;;  %v3334_v43 = vpop.permute.xlu1 %3333  ;;  %v3440_v1 = vsel %vm578_vm9, %v3414_v12, %v3412_v9  ;;  %v3424_v36 = vsel %vm578_vm9, %v3412_v9, %v3414_v12 }
 0xf46   : > { %v3338_v0 = vsel %vm538_vm2, %v3332_v16, %v3334_v43  ;;  %v3354_v3 = vsel %vm538_vm2, %v3334_v43, %v3332_v16  ;;  %v3446_v5 = vmul.f32 %v3440_v1, %v5794_v2  ;;  %v3445_v12 = vmul.f32 %v3424_v36, %v5789_v59 }
 0xf47   : > { %v3361_v24 = vmul.f32 %v3338_v0, %v5780_v53  ;;  %v3362_v23 = vmul.f32 %v3354_v3, %v5782_v54 }
 0xf48   : > { %v3416_v30 = vpop.permute.xlu0 %3415  ;;  %5272 = vmatpush1.bf16.msra.mxu1 %v5271_v62  ;;  %v5285_v62 = vpack.c.bf16 %v3446_v5, %v3444_v20  ;;  %v5287_v25 = vpack.c.bf16 %v3445_v12, %v3443_v41  ;;  %v8069_v5 = vmov 0.0  }
 0xf49   : > { %v5275_v4 = vpack.c.bf16 %v3361_v24, %v3359_v33  ;;  %v3454_v16 = vpop.permute.xlu1 %3453  ;;  %v5273_v42 = vpack.c.bf16 %v3362_v23, %v3360_v6  ;;  %v3425_v34 = vsel %vm578_vm9, %v3416_v30, %v3418_v18  ;;  %v3441_v9 = vsel %vm578_vm9, %v3418_v18, %v3416_v30 }
 0xf4a   : > { %v3447_v19 = vmul.f32 %v3425_v34, %v5789_v59  ;;  %v3448_v35 = vmul.f32 %v3441_v9, %v5794_v2 }
 0xf4b   : > { %5274 = vmatprep.subr.bf16.mxu1 %v5273_v42 }
 0xf4c   : > { %v3420_v11 = vpop.permute.xlu0 %3419  ;;  %5276 = vmatpush1.bf16.msra.mxu1 %v5275_v4 }
 0xf4d   : > { %5278 = vmatprep.subr.bf16.mxu1 %v5277_v13  ;;  %v3378_v15 = vpop.permute.xlu1 %3377 }
 0xf4e   : > { %v3382_v28 = vsel %vm558_vm4, %v3376_v8, %v3378_v15  ;;  %v3398_v14 = vsel %vm558_vm4, %v3378_v15, %v3376_v8 }
 0xf4f   : > { %v3405_v49 = vmul.f32 %v3382_v28, %v5784_v56  ;;  %v3406_v31 = vmul.f32 %v3398_v14, %v5786_v57 }
 0xf50   : > { %v3452_v63 = vpop.permute.xlu0 %3451  ;;  %5280 = vmatpush1.bf16.msra.mxu1 %v5279_v60 }
 0xf51   : > { %v5283_v61 = vpack.c.bf16 %v3405_v49, %v3403_v26  ;;  %v3458_v39 = vpop.permute.xlu1 %3457  ;;  %v5281_v8 = vpack.c.bf16 %v3406_v31, %v3404_v38  ;;  %v3483_v0 = vsel %vm598_vm11, %v3454_v16, %v3452_v63  ;;  %v3467_v30 = vsel %vm598_vm11, %v3452_v63, %v3454_v16  ;;  %v8068_v38 = vld [vmem:[#allocation9_spill] sm:$0xff] }
 0xf52   : > { %v3488_v27 = vmul.f32 %v6956_v10, %v3483_v0  ;;  %v3487_v13 = vmul.f32 %v6963_v21, %v3467_v30 }
 0xf53   : > { %5282 = vmatprep.subr.bf16.mxu1 %v5281_v8 }
 0xf54   : > { %v3456_v33 = vpop.permute.xlu0 %3455  ;;  %5284 = vmatpush1.bf16.msra.mxu1 %v5283_v61 }
 0xf55   : > { %v3484_v43 = vsel %vm598_vm11, %v3458_v39, %v3456_v33  ;;  %5286 = vmatprep.subr.bf16.mxu1 %v5285_v62  ;;  %v3422_v7 = vpop.permute.xlu1 %3421  ;;  %v3468_v18 = vsel %vm598_vm11, %v3456_v33, %v3458_v39 }
 0xf56   : > { %v3426_v3 = vsel %vm578_vm9, %v3420_v11, %v3422_v7  ;;  %v3442_v6 = vsel %vm578_vm9, %v3422_v7, %v3420_v11  ;;  %v3490_v17 = vmul.f32 %v6956_v10, %v3484_v43  ;;  %v3489_v32 = vmul.f32 %v6963_v21, %v3468_v18  ;;  %v8071_v7 = vld [vmem:[#allocation6_spill] sm:$0xff] }
 0xf57   : > { %v3449_v24 = vmul.f32 %v3426_v3, %v5789_v59  ;;  %v3450_v23 = vmul.f32 %v3442_v6, %v5794_v2 }
 0xf58   : > { %v3460_v55 = vpop.permute.xlu0 %3459  ;;  %5288 = vmatpush1.bf16.msra.mxu1 %v5287_v25  ;;  %v5293_v37 = vpack.c.bf16 %v3490_v17, %v3488_v27  ;;  %v5295_v16 = vpack.c.bf16 %v3489_v32, %v3487_v13  ;;  %v8070_v25 = vld [vmem:[#allocation5_spill] sm:$0xff] }
 0xf59   : > { %v5291_v40 = vpack.c.bf16 %v3449_v24, %v3447_v19  ;;  %v3462_v4 = vpop.permute.xlu1 %3461  ;;  %v5289_v42 = vpack.c.bf16 %v3450_v23, %v3448_v35 }
 0xf5a   : > { %v3469_v58 = vsel %vm598_vm11, %v3460_v55, %v3462_v4  ;;  %v3485_v1 = vsel %vm598_vm11, %v3462_v4, %v3460_v55 }
 0xf5b   : > { %5290 = vmatprep.subr.bf16.mxu1 %v5289_v42  ;;  %v3491_v22 = vmul.f32 %v6963_v21, %v3469_v58  ;;  %v3492_v36 = vmul.f32 %v6956_v10, %v3485_v1 }
 0xf5c   : > { %v3464_v11 = vpop.permute.xlu0 %3463  ;;  %5292 = vmatpush1.bf16.msra.mxu1 %v5291_v40 }
 0xf5d   : > { %5294 = vmatprep.subr.bf16.mxu1 %v5293_v37  ;;  %v3466_v60 = vpop.permute.xlu1 %3465 }
 0xf5e   : > { %v3470_v26 = vsel %vm598_vm11, %v3464_v11, %v3466_v60  ;;  %v3486_v15 = vsel %vm598_vm11, %v3466_v60, %v3464_v11 }
 0xf5f   : > { %v3493_v28 = vmul.f32 %v6963_v21, %v3470_v26  ;;  %v3494_v14 = vmul.f32 %v6956_v10, %v3486_v15  ;;  %3570 = vmatmul.mubr.f32.vlgmr.msra.gmra.mrb[38].mxu1 %v8068_v38 }
 0xf60   : > { %5296 = vmatpush1.bf16.msra.mxu1 %v5295_v16  ;;  %3640 = vmatprep.mubr.f32.mxu1 %v8069_v5 }
 0xf61   : > { %v5299_v49 = vpack.c.bf16 %v3493_v28, %v3491_v22  ;;  %v5297_v31 = vpack.c.bf16 %v3494_v14, %v3492_v36 }
 0xf63   : > { %5298 = vmatprep.subr.bf16.mxu1 %v5297_v31 }
 0xf64   : > { %5300 = vmatpush1.bf16.msra.mxu1 %v5299_v49 }
 0xf67   : > { %5016 = vmatmul.mubr.msk.f32.vlgmr.msra.gmra.mrb[38].mxu1 %vm819_vm13, %v5015_v29 }
 0xf6d   : > { %v3497_v63 = vpop.permute.xlu0 %3496 }
 0xf6e   : > { %v3653_v21 = vpop.permute.xlu1 %3652 }
0x103a   : > { %v3642_v20 = vpop.f32.mrb[38].mxu1 }
0x103b   : > { %v5389_v12 = vadd.f32 %v3642_v20, %v3497_v63  ;;  %v3644_v10 = vpop.f32.mrb[39].mxu1 }
0x103c   : > { %v5390_v61 = vadd.f32 %v3644_v10, %v3497_v63 }
0x103d   : > { %v3655_v39 = vmul.f32 %v5389_v12, %v3653_v21  ;;  %v3729_v12 = vpop.permute.xlu1 %3728 }
0x103e   : > { %v3656_v8 = vmul.f32 %v5390_v61, %v3653_v21 }
0x103f   : > { %v3657_v34 = vadd.f32 2.0, %v3655_v39  ;;  %v3687_v41 = vrot.slane %v3655_v39, 6 }
0x1040   : > { %v3658_v9 = vadd.f32 2.0, %v3656_v8  ;;  %v3688_v62 = vrot.slane %v3656_v8, 6 }
0x1041   : > { %v3659_v33 = vsub.f32 0.0, %v3657_v34  ;;  %v3691_v19 = vadd.f32 %v3687_v41, %v8070_v25  ;;  %v3738_v34 = vpop.permute.xlu0 %3737 }
0x1042   : > { %v3660_v43 = vsub.f32 0.0, %v3658_v9  ;;  %v3692_v35 = vadd.f32 %v3688_v62, %v8071_v7 }
0x1043   : > { %v3661_v0 = vmax.f32 %v3659_v33, 0.0 }
0x1044   : > { %v3662_v3 = vmax.f32 %v3660_v43, 0.0 }
0x1045   : > { %v3663_v6 = vsub.f32 0.0, %v3661_v0  ;;  %v3669_v18 = vsub.f32 %v3659_v33, %v3661_v0  ;;  %v5021_v33 = vld [vmem:[%s7974_s2 + $0xc] sm:$0xf] }
0x1046   : > { %v3664_v17 = vsub.f32 0.0, %v3662_v3  ;;  %v3670_v24 = vsub.f32 %v3660_v43, %v3662_v3  ;;  %v8074_v43 = vld [vmem:[#allocation10_spill] sm:$0xff] }
0x1047   : > { %v3665_v23 = vmul.f32 1.442695, %v3663_v6  ;;  %v3671_v55 = vmul.f32 1.442695, %v3669_v18  ;;  %v8076_v6 = vmov 2   ;;  %v8077_v18 = vmov 3  }
0x1048   : > { %v3667_v30 = vmul.f32 1.442695, %v3664_v17  ;;  %v3673_v27 = vmul.f32 1.442695, %v3670_v24 }
0x1049   : > { %5519 = vpow2.f32 %v3665_v23 }
0x104a   : > { %5521 = vpow2.f32 %v3667_v30 }
0x104b   : > { %5523 = vpow2.f32 %v3671_v55 }
0x104c   : > { %5525 = vpow2.f32 %v3673_v27 }
0x1053   : > { %v5520_v40 = vpop.eup %5519 }
0x1054   : > { %v5522_v4 = vpop.eup %5521 }
0x1055   : > { %v5524_v42 = vpop.eup %5523 }
0x1056   : > { %v5526_v32 = vpop.eup %5525  ;;  %v3675_v37 = vadd.f32 %v5524_v42, %v5520_v40 }
0x1057   : > { %v3676_v13 = vadd.f32 %v5526_v32, %v5522_v4 }
0x1058   : > { %5527 = vlog2.f32 %v3675_v37 }
0x1059   : > { %5529 = vlog2.f32 %v3676_v13 }
0x1062   : > { %v5528_v58 = vpop.eup %5527 }
0x1063   : > { %v5530_v1 = vpop.eup %5529  ;;  %v3678_v11 = vmul.f32 0.6931472, %v5528_v58 }
0x1064   : > { %v3680_v60 = vmul.f32 0.6931472, %v5530_v1 }
0x1065   : > { %v3681_v16 = vadd.f32 %v3678_v11, %v3661_v0  ;;  %v5019_v0 = vld [vmem:[%s7978_s6 + $0x70] sm:$0xff] }
0x1066   : > { %v3682_v26 = vadd.f32 %v3680_v60, %v3662_v3  ;;  %v8075_v3 = vmov 5  }
0x1067   : > { %v3683_v15 = vsub.f32 0.0, %v3681_v16 }
0x1068   : > { %v3684_v22 = vsub.f32 0.0, %v3682_v26 }
0x1069   : > { %v3693_v36 = vmul.f32 1.442695, %v3683_v15  ;;  %v3701_v28 = vrot.slane %v3683_v15, 2 }
0x106a   : > { %v3695_v14 = vmul.f32 1.442695, %v3684_v22  ;;  %v3702_v38 = vrot.slane %v3684_v22, 2 }
0x106b   : > { %5531 = vpow2.f32 %v3693_v36  ;;  %v3705_v49 = vsel %vm650_vm7, %v3701_v28, 0.0 }
0x106c   : > { %5533 = vpow2.f32 %v3695_v14  ;;  %v3706_v31 = vsel %vm650_vm7, %v3702_v38, 0.0 }
0x106d   : > { %v7397_v29 = vadd.f32 %v3706_v31, %v3705_v49 }
0x1075   : > { %v5532_v63 = vpop.eup %5531 }
0x1076   : > { %v5534_v20 = vpop.eup %5533  ;;  %v3697_v21 = vmul.f32 %v5532_v63, %v3691_v19 }
0x1077   : > { %v3698_v10 = vmul.f32 %v5534_v20, %v3692_v35  ;;  %v5020_v35 = vld [vmem:[%s7978_s6 + $0x78] sm:$0xff] }
0x1078   : > { %v3719_v61 = vsel %vm650_vm7, %v8070_v25, %v3697_v21 }
0x1079   : > { %v3720_v39 = vsel %vm650_vm7, %v8071_v7, %v3698_v10  ;;  %v3731_v8 = vadd.f32 %v3729_v12, %v3719_v61  ;;  %v5018_v7 = vld [vmem:[%s7978_s6 + $0x68] sm:$0xff] }
0x107a   : > { %v3732_v41 = vadd.f32 %v3729_v12, %v3720_v39 }
0x107b   : > { %v3740_v62 = vmul.f32 %v3738_v34, %v3731_v8 }
0x107c   : > { %v3741_v9 = vmul.f32 %v3738_v34, %v3732_v41 }
0x107e   : > { %5022 = vmatprep.subr.msk.mxu0 %vm369_vm0, %v3741_v9 }
0x107f   : > { %5023 = vmatpush1.msk.msra.mxu0 %vm369_vm0, %v3740_v62 }
0x1080   : > { %5024 = vmatmul.mubr.msk.f32.vlgmr.msra.gmra.mrb[20].mxu0 %vm365_vm1, %v5021_v33 }
0x1081   : > { %4071 = vmatprep.mubr.f32.mxu0 %v8069_v5 }
0x1153   : > { %v7410_v25 = vpop.f32.mrb[20].mxu0 }
0x1154   : > { %8072 = vst [vmem:[#allocation9_spill] sm:$0xff] %v7410_v25  ;;  %3878 = vrot.lane.b32.xlu0 %v7410_v25, %s5592_s27  ;;  %3848 = vrot.lane.b32.xlu1 %v7410_v25, %s5590_s25  ;;  %v7416_v19 = vpop.f32.mrb[21].mxu0 }
0x1155   : > { %8073 = vst [vmem:[#allocation5_spill] sm:$0xff] %v7416_v19 }
0x1158   : > { %3889 = vrot.lane.b32.xlu0 %v7410_v25, %s5594_s29  ;;  %3859 = vrot.lane.b32.xlu1 %v7410_v25, %s5589_s24 }
0x115c   : > { %3837 = vrot.lane.b32.xlu1 %v7410_v25, %s5591_s26  ;;  %3856 = vrot.lane.b32.xlu0 %v7416_v19, %s5589_s24 }
0x1160   : > { %3870 = vrot.lane.b32.xlu1 %v7410_v25, %s5593_s28  ;;  %3833 = vrot.lane.b32.xlu0 %v7416_v19, %s5591_s26 }
0x1164   : > { %3867 = vrot.lane.b32.xlu0 %v7416_v19, %s5593_s28  ;;  %3845 = vrot.lane.b32.xlu1 %v7416_v19, %s5590_s25 }
0x1168   : > { %3900 = vrot.lane.b32.xlu0 %v7410_v25, %s5595_s30  ;;  %3880 = vrot.lane.b32.xlu1 %v7416_v19, %s5592_s27 }
0x116c   : > { %3911 = vrot.lane.b32.xlu0 %v7410_v25, %s5596_s10  ;;  %3891 = vrot.lane.b32.xlu1 %v7416_v19, %s5594_s29 }
0x1170   : > { %3902 = vrot.lane.b32.xlu1 %v7416_v19, %s5595_s30  ;;  %3971 = vperm.xlu0 %5462, %v8074_v43  }
0x1174   : > { %3913 = vrot.lane.b32.xlu1 %v7416_v19, %s5596_s10  ;;  %3986 = vperm.xlu0 %5462, %v5020_v35  }
0x1178   : > { %3976 = vperm.xlu1 %5463, %v5018_v7   ;;  %5465 = vset.pattern.permute.xlu0 %v8075_v3 }
0x1179   : > { %4114 = vperm.xlu0 %5465, %v5018_v7  }
0x117c   : > { %3981 = vperm.xlu1 %5463, %v5019_v0  }
0x117d   : > { %5466 = vset.pattern.permute.xlu0 %v8076_v6 }
0x1180   : > { %5464 = vset.pattern.permute.xlu1 %v8075_v3 }
0x1181   : > { %4110 = vperm.xlu1 %5464, %v8074_v43  }
0x1185   : > { %4118 = vperm.xlu1 %5464, %v5019_v0  }
0x1189   : > { %4122 = vperm.xlu1 %5464, %v5020_v35  }
0x118d   : > { %5467 = vset.pattern.permute.xlu1 %v8077_v18 }
0x11c6   : > { %v3879_v17 = vpop.permute.xlu0 %3878  ;;  %v3849_v24 = vpop.permute.xlu1 %3848 }
0x11ca   : > { %v3890_v23 = vpop.permute.xlu0 %3889  ;;  %v3860_v55 = vpop.permute.xlu1 %3859 }
0x11ce   : > { %v3838_v30 = vpop.permute.xlu1 %3837  ;;  %v3857_v27 = vpop.permute.xlu0 %3856 }
0x11cf   : > { %v3864_v13 = vsel %vm499_vm5, %v3857_v27, %v3860_v55  ;;  %v3861_v1 = vsel %vm499_vm5, %v3860_v55, %v3857_v27 }
0x11d0   : > { %v3865_v22 = vmul.f32 %v3864_v13, %v5772_v48  ;;  %v3866_v28 = vmul.f32 %v3861_v1, %v5774_v50 }
0x11d2   : > { %v3871_v40 = vpop.permute.xlu1 %3870  ;;  %v3834_v4 = vpop.permute.xlu0 %3833  ;;  %v3930_v9 = vrot.slane %v3865_v22, 4  ;;  %v3931_v35 = vrot.slane %v3866_v28, 4 }
0x11d3   : > { %v3839_v36 = vsel %vm459_vm6, %v3838_v30, %v3834_v4  ;;  %v3842_v14 = vsel %vm459_vm6, %v3834_v4, %v3838_v30 }
0x11d4   : > { %v3844_v10 = vmul.f32 %v3839_v36, %v5766_v45  ;;  %v3843_v8 = vmul.f32 %v3842_v14, %v5764_v44 }
0x11d6   : > { %v3846_v42 = vpop.permute.xlu1 %3845  ;;  %v3868_v11 = vpop.permute.xlu0 %3867 }
0x11d7   : > { %v3850_v32 = vsel %vm479_vm3, %v3849_v24, %v3846_v42  ;;  %v3853_v37 = vsel %vm479_vm3, %v3846_v42, %v3849_v24  ;;  %v3872_v38 = vsel %vm519_vm8, %v3871_v40, %v3868_v11  ;;  %v3875_v31 = vsel %vm519_vm8, %v3868_v11, %v3871_v40 }
0x11d8   : > { %v3855_v58 = vmul.f32 %v3850_v32, %v5770_v47  ;;  %v3854_v60 = vmul.f32 %v3853_v37, %v5768_v46  ;;  %v3876_v62 = vmul.f32 %v3875_v31, %v5776_v51  ;;  %v3877_v33 = vmul.f32 %v3872_v38, %v5778_v52 }
0x11da   : > { %v3881_v16 = vpop.permute.xlu1 %3880  ;;  %v3925_v49 = vrot.slane %v3855_v58, 6  ;;  %v3924_v63 = vrot.slane %v3854_v60, 6  ;;  %v3901_v7 = vpop.permute.xlu0 %3900  ;;  %v3936_v42 = vrot.slane %v3876_v62, 2  ;;  %v3937_v32 = vrot.slane %v3877_v33, 2 }
0x11db   : > { %v3882_v26 = vsel %vm538_vm2, %v3879_v17, %v3881_v16  ;;  %v3886_v15 = vsel %vm538_vm2, %v3881_v16, %v3879_v17 }
0x11dc   : > { %v3887_v20 = vmul.f32 %v3882_v26, %v5780_v53  ;;  %v3888_v21 = vmul.f32 %v3886_v15, %v5782_v54  ;;  %v3959_v43 = vsel %vm650_vm7, %v3844_v10, %v3925_v49  ;;  %v3958_v0 = vsel %vm650_vm7, %v3843_v8, %v3924_v63  ;;  %v5028_v8 = vld [vmem:[%s7975_s3 + $0x70] sm:$0xff] }
0x11dd   : > { %v3961_v4 = vsel %vm369_vm0, %v3959_v43, %v3931_v35  ;;  %v3960_v37 = vsel %vm369_vm0, %v3958_v0, %v3930_v9 }
0x11de   : > { %v3892_v12 = vpop.permute.xlu1 %3891  ;;  %v3942_v3 = vrot.slane %v3887_v20, 6  ;;  %v3943_v6 = vrot.slane %v3888_v21, 6  ;;  %v3912_v16 = vpop.permute.xlu0 %3911  ;;  %v3963_v15 = vsel %vm655_vm10, %v3961_v4, %v3937_v32  ;;  %v3962_v38 = vsel %vm655_vm10, %v3960_v37, %v3936_v42  ;;  %v7508_v20 = vld [vmem:[%s7979_s7 + $0x18] ss:$0 sm:$0xff] }
0x11df   : > { %v3893_v61 = vsel %vm558_vm4, %v3890_v23, %v3892_v12  ;;  %v3897_v39 = vsel %vm558_vm4, %v3892_v12, %v3890_v23  ;;  %8078 = vst [vmem:[#allocation6_spill] sm:$0xff] %v7508_v20  ;;  %v7515_v12 = vld [vmem:[%s7979_s7 + $0x10] ss:$0 sm:$0xff] }
0x11e0   : > { %v3898_v34 = vmul.f32 %v3893_v61, %v5784_v56  ;;  %v3899_v41 = vmul.f32 %v3897_v39, %v5786_v57  ;;  %v3964_v13 = vsel %vm650_vm7, %v7410_v25, %v3942_v3  ;;  %v3965_v58 = vsel %vm650_vm7, %v7416_v19, %v3943_v6  ;;  %8079 = vst [vmem:[#allocation10_spill] sm:$0xff] %v7515_v12  ;;  %v5026_v61 = vld [vmem:[%s7975_s3 + $0x60] sm:$0xff]  ;;  %v5027_v39 = vld [vmem:[%s7975_s3 + $0x68] sm:$0xff] }
0x11e2   : > { %v3903_v17 = vpop.permute.xlu1 %3902  ;;  %v3948_v24 = vrot.slane %v3898_v34, 4  ;;  %v3949_v23 = vrot.slane %v3899_v41, 4  ;;  %v5029_v34 = vld [vmem:[%s7975_s3 + $0x78] sm:$0xff] }
0x11e3   : > { %v3904_v55 = vsel %vm578_vm9, %v3901_v7, %v3903_v17  ;;  %v3908_v30 = vsel %vm578_vm9, %v3903_v17, %v3901_v7 }
0x11e4   : > { %v3909_v27 = vmul.f32 %v3904_v55, %v5789_v59  ;;  %v3910_v40 = vmul.f32 %v3908_v30, %v5794_v2  ;;  %v3966_v26 = vsel %vm369_vm0, %v3964_v13, %v3948_v24  ;;  %v3967_v22 = vsel %vm369_vm0, %v3965_v58, %v3949_v23 }
0x11e6   : > { %v3954_v1 = vrot.slane %v3909_v27, 2  ;;  %v3955_v11 = vrot.slane %v3910_v40, 2  ;;  %v3914_v60 = vpop.permute.xlu1 %3913 }
0x11e7   : > { %v3919_v28 = vsel %vm598_vm11, %v3914_v60, %v3912_v16  ;;  %v3915_v63 = vsel %vm598_vm11, %v3912_v16, %v3914_v60 }
0x11e8   : > { %v3968_v36 = vsel %vm655_vm10, %v3966_v26, %v3954_v1  ;;  %v3969_v14 = vsel %vm655_vm10, %v3967_v22, %v3955_v11  ;;  %v3921_v21 = vmul.f32 %v7508_v20, %v3919_v28  ;;  %v3920_v10 = vmul.f32 %v7515_v12, %v3915_v63 }
0x11e9   : > { %v5301_v49 = vpack.c.bf16 %v3969_v14, %v3963_v15  ;;  %v5303_v31 = vpack.c.bf16 %v3968_v36, %v3962_v38  ;;  %v5036_v14 = vld [vmem:[%s7976_s4 + $0x60] sm:$0xff]  ;;  %v5037_v38 = vld [vmem:[%s7976_s4 + $0x68] sm:$0xff] }
0x11eb   : > { %5302 = vmatprep.subr.bf16.mxu0 %v5301_v49  ;;  %v5038_v49 = vld [vmem:[%s7976_s4 + $0x70] sm:$0xff] }
0x11ec   : > { %5304 = vmatpush1.bf16.msra.mxu0 %v5303_v31  ;;  %v5039_v31 = vld [vmem:[%s7976_s4 + $0x78] sm:$0xff] }
0x11ed   : > { %5030 = vmatprep.subr.msk.mxu0 %vm650_vm7, %v3921_v21 }
0x11ef   : > { %v3972_v41 = vpop.permute.xlu0 %3971 }
0x11f0   : > { %5031 = vmatpush1.msk.msra.mxu0 %vm650_vm7, %v3920_v10 }
0x11f1   : > { %5032 = vmatmul.mubr.msk.f32.vlgmr.msra.gmra.mrb[22].mxu0 %vm683_vm12, %v5026_v61 }
0x11f2   : > { %4077 = vmatprep.mubr.f32.mxu0 %v8069_v5 }
0x11f3   : > { %v3987_v37 = vpop.permute.xlu0 %3986 }
0x11f5   : > { %5033 = vmatmul.mubr.msk.f32.gmra.mrb[24].mxu0 %vm683_vm12, %v5027_v39 }
0x11f6   : > { %4083 = vmatprep.mubr.f32.mxu0 %v8069_v5 }
0x11f7   : > { %v3977_v33 = vpop.permute.xlu1 %3976 }
0x11f9   : > { %5034 = vmatmul.mubr.msk.f32.gmra.mrb[26].mxu0 %vm683_vm12, %v5028_v8  ;;  %v4115_v8 = vpop.permute.xlu0 %4114 }
0x11fa   : > { %4089 = vmatprep.mubr.f32.mxu0 %v8069_v5 }
0x11fb   : > { %v3982_v30 = vpop.permute.xlu1 %3981 }
0x11fd   : > { %5035 = vmatmul.mubr.msk.f32.gmra.mrb[28].mxu0 %vm683_vm12, %v5029_v34 }
0x11fe   : > { %4201 = vmatprep.mubr.f32.mxu0 %v8069_v5 }
0x1200   : > { %v4111_v63 = vpop.permute.xlu1 %4110 }
0x12c4   : > { %v4073_v9 = vpop.f32.mrb[22].mxu0 }
0x12c5   : > { %v4075_v62 = vpop.f32.mrb[23].mxu0  ;;  %v4074_v43 = vadd.f32 %v4073_v9, %v3972_v41 }
0x12c6   : > { %v4076_v7 = vadd.f32 %v4075_v62, %v3972_v41 }
0x12c7   : > { %v4096_v17 = vmax.f32 %v4074_v43, 0.0 }
0x12c8   : > { %v4079_v35 = vpop.f32.mrb[24].mxu0  ;;  %v4097_v23 = vmax.f32 %v4076_v7, 0.0 }
0x12c9   : > { %v4080_v0 = vadd.f32 %v4079_v35, %v3977_v33  ;;  %v4081_v3 = vpop.f32.mrb[25].mxu0 }
0x12ca   : > { %v4082_v6 = vadd.f32 %v4081_v3, %v3977_v33 }
0x12cb   : > { %v4098_v24 = vmax.f32 %v4080_v0, 0.0 }
0x12cc   : > { %v4099_v55 = vmax.f32 %v4082_v6, 0.0  ;;  %v4085_v27 = vpop.f32.mrb[26].mxu0 }
0x12cd   : > { %v5307_v40 = vpack.c.bf16 %v4098_v24, %v4096_v17  ;;  %v4087_v4 = vpop.f32.mrb[27].mxu0  ;;  %v4086_v32 = vadd.f32 %v4085_v27, %v3982_v30  ;;  %v4119_v24 = vpop.permute.xlu1 %4118 }
0x12ce   : > { %v5305_v42 = vpack.c.bf16 %v4099_v55, %v4097_v23  ;;  %v4088_v13 = vadd.f32 %v4087_v4, %v3982_v30 }
0x12cf   : > { %v4100_v16 = vmax.f32 %v4086_v32, 0.0 }
0x12d0   : > { %v4091_v58 = vpop.f32.mrb[28].mxu0  ;;  %5306 = vmatprep.subr.bf16.mxu0 %v5305_v42  ;;  %v4101_v15 = vmax.f32 %v4088_v13, 0.0  ;;  %v5561_v13 = vld [vmem:[%s7978_s6 + $0x60] sm:$0xff] }
0x12d1   : > { %v4092_v1 = vadd.f32 %v4091_v58, %v3987_v37  ;;  %v4093_v11 = vpop.f32.mrb[29].mxu0  ;;  %5308 = vmatpush1.bf16.msra.mxu0 %v5307_v40  ;;  %v4123_v30 = vpop.permute.xlu1 %4122  ;;  %v4749_v58 = vmul.f32 3.0, %v5561_v13 }
0x12d2   : > { %v4094_v60 = vadd.f32 %v4093_v11, %v3987_v37 }
0x12d3   : > { %v4102_v26 = vmax.f32 %v4092_v1, 0.0  ;;  %v7692_v1 = vld [vmem:[%s7977_s5 + $0x24] sm:$0xff] }
0x12d4   : > { %v4103_v22 = vmax.f32 %v4094_v60, 0.0  ;;  %8080 = vst [vmem:[#allocation11_spill] sm:$0xff] %v7692_v1  ;;  %v4603_v11 = vcombine.high %v7692_v1, %v7692_v1  ;;  %v4750_v60 = vmul.f32 1.442695, %v4749_v58 }
0x12d5   : > { %v5311_v36 = vpack.c.bf16 %v4102_v26, %v4100_v16 }
0x12d6   : > { %v5309_v28 = vpack.c.bf16 %v4103_v22, %v4101_v15  ;;  %5535 = vpow2.f32 %v4750_v60 }
0x12d8   : > { %5310 = vmatprep.subr.bf16.mxu0 %v5309_v28 }
0x12d9   : > { %5312 = vmatpush1.bf16.msra.mxu0 %v5311_v36 }
0x12dc   : > { %5040 = vmatmul.mubr.msk.f32.vlgmr.msra.gmra.mrb[30].mxu0 %vm819_vm13, %v5036_v14 }
0x12dd   : > { %4207 = vmatprep.mubr.f32.mxu0 %v8069_v5 }
0x12e0   : > { %5041 = vmatmul.mubr.msk.f32.gmra.mrb[32].mxu0 %vm819_vm13, %v5037_v38  ;;  %v5536_v14 = vpop.eup %5535 }
0x12e1   : > { %4213 = vmatprep.mubr.f32.mxu0 %v8069_v5 }
0x12e4   : > { %5042 = vmatmul.mubr.msk.f32.gmra.mrb[34].mxu0 %vm819_vm13, %v5038_v49 }
0x12e5   : > { %4219 = vmatprep.mubr.f32.mxu0 %v8069_v5 }
0x12e8   : > { %5043 = vmatmul.mubr.msk.f32.gmra.mrb[36].mxu0 %vm819_vm13, %v5039_v31 }
0x12e9   : > { %4671 = vmatprep.mubr.f32.mxu0 %v4603_v11 }
0x13af   : > { %v4203_v21 = vpop.f32.mrb[30].mxu0 }
0x13b0   : > { %v4204_v10 = vadd.f32 %v4203_v21, %v4111_v63  ;;  %v4205_v61 = vpop.f32.mrb[31].mxu0 }
0x13b1   : > { %v4206_v39 = vadd.f32 %v4205_v61, %v4111_v63 }
0x13b2   : > { %v7558_v34 = vmax.f32 %v4204_v10, 0.0 }
0x13b3   : > { %v7560_v41 = vmax.f32 %v4206_v39, 0.0  ;;  %v4209_v9 = vpop.f32.mrb[32].mxu0 }
0x13b4   : > { %v4210_v62 = vadd.f32 %v4209_v9, %v4115_v8  ;;  %v4211_v33 = vpop.f32.mrb[33].mxu0  ;;  %4257 = vrot.lane.b32.xlu0 %v7558_v34, %s5591_s26 }
0x13b5   : > { %4423 = vrot.lane.b32.xlu1 %v7560_v41, %s5592_s27  ;;  %v4212_v6 = vadd.f32 %v4211_v33, %v4115_v8 }
0x13b6   : > { %v7566_v43 = vmax.f32 %v4210_v62, 0.0 }
0x13b7   : > { %v4215_v7 = vpop.f32.mrb[34].mxu0  ;;  %v7584_v17 = vmax.f32 %v4212_v6, 0.0 }
0x13b8   : > { %v4217_v35 = vpop.f32.mrb[35].mxu0  ;;  %4301 = vrot.lane.b32.xlu0 %v7558_v34, %s5590_s25  ;;  %v4216_v23 = vadd.f32 %v4215_v7, %v4119_v24 }
0x13b9   : > { %4259 = vrot.lane.b32.xlu1 %v7566_v43, %s5591_s26  ;;  %v4218_v55 = vadd.f32 %v4217_v35, %v4119_v24 }
0x13ba   : > { %v7606_v27 = vmax.f32 %v4216_v23, 0.0 }
0x13bb   : > { %v4221_v0 = vpop.f32.mrb[36].mxu0  ;;  %v7608_v40 = vmax.f32 %v4218_v55, 0.0 }
0x13bc   : > { %v4223_v3 = vpop.f32.mrb[37].mxu0  ;;  %4345 = vrot.lane.b32.xlu0 %v7558_v34, %s5589_s24  ;;  %v4222_v4 = vadd.f32 %v4221_v0, %v4123_v30 }
0x13bd   : > { %4303 = vrot.lane.b32.xlu1 %v7566_v43, %s5590_s25  ;;  %v4224_v32 = vadd.f32 %v4223_v3, %v4123_v30 }
0x13be   : > { %v7614_v42 = vmax.f32 %v4222_v4, 0.0 }
0x13bf   : > { %v7632_v37 = vmax.f32 %v4224_v32, 0.0 }
0x13c0   : > { %4389 = vrot.lane.b32.xlu0 %v7558_v34, %s5593_s28 }
0x13c1   : > { %4347 = vrot.lane.b32.xlu1 %v7566_v43, %s5589_s24 }
0x13c4   : > { %4421 = vrot.lane.b32.xlu0 %v7558_v34, %s5592_s27 }
0x13c5   : > { %4391 = vrot.lane.b32.xlu1 %v7566_v43, %s5593_s28 }
0x13c8   : > { %4241 = vrot.lane.b32.xlu0 %v7560_v41, %s5591_s26 }
0x13c9   : > { %4243 = vrot.lane.b32.xlu1 %v7584_v17, %s5591_s26 }
0x13cc   : > { %4289 = vrot.lane.b32.xlu0 %v7560_v41, %s5590_s25 }
0x13cd   : > { %4291 = vrot.lane.b32.xlu1 %v7584_v17, %s5590_s25 }
0x13d0   : > { %4333 = vrot.lane.b32.xlu0 %v7560_v41, %s5589_s24 }
0x13d1   : > { %4335 = vrot.lane.b32.xlu1 %v7584_v17, %s5589_s24 }
0x13d4   : > { %4377 = vrot.lane.b32.xlu0 %v7560_v41, %s5593_s28 }
0x13d5   : > { %4379 = vrot.lane.b32.xlu1 %v7584_v17, %s5593_s28 }
0x13d8   : > { %4425 = vrot.lane.b32.xlu0 %v7566_v43, %s5592_s27 }
0x13d9   : > { %4427 = vrot.lane.b32.xlu1 %v7584_v17, %s5592_s27 }
0x13dc   : > { %4261 = vrot.lane.b32.xlu0 %v7606_v27, %s5591_s26 }
0x13dd   : > { %4431 = vrot.lane.b32.xlu1 %v7608_v40, %s5592_s27 }
0x13e0   : > { %4305 = vrot.lane.b32.xlu0 %v7606_v27, %s5590_s25 }
0x13e1   : > { %4263 = vrot.lane.b32.xlu1 %v7614_v42, %s5591_s26 }
0x13e4   : > { %4349 = vrot.lane.b32.xlu0 %v7606_v27, %s5589_s24 }
0x13e5   : > { %4307 = vrot.lane.b32.xlu1 %v7614_v42, %s5590_s25 }
0x13e8   : > { %4393 = vrot.lane.b32.xlu0 %v7606_v27, %s5593_s28 }
0x13e9   : > { %4351 = vrot.lane.b32.xlu1 %v7614_v42, %s5589_s24 }
0x13ec   : > { %4429 = vrot.lane.b32.xlu0 %v7606_v27, %s5592_s27 }
0x13ed   : > { %4395 = vrot.lane.b32.xlu1 %v7614_v42, %s5593_s28 }
0x13f0   : > { %4245 = vrot.lane.b32.xlu0 %v7608_v40, %s5591_s26 }
0x13f1   : > { %4247 = vrot.lane.b32.xlu1 %v7632_v37, %s5591_s26 }
0x13f4   : > { %4465 = vrot.lane.b32.xlu0 %v7558_v34, %s5594_s29 }
0x13f5   : > { %4467 = vrot.lane.b32.xlu1 %v7560_v41, %s5594_s29 }
0x13f8   : > { %4293 = vrot.lane.b32.xlu0 %v7608_v40, %s5590_s25 }
0x13f9   : > { %4295 = vrot.lane.b32.xlu1 %v7632_v37, %s5590_s25 }
0x13fc   : > { %4337 = vrot.lane.b32.xlu0 %v7608_v40, %s5589_s24 }
0x13fd   : > { %4471 = vrot.lane.b32.xlu1 %v7584_v17, %s5594_s29 }
0x1400   : > { %4381 = vrot.lane.b32.xlu0 %v7608_v40, %s5593_s28 }
0x1401   : > { %4339 = vrot.lane.b32.xlu1 %v7632_v37, %s5589_s24  ;;  %s324_s24 = scalar_lea.vmem %s7981_s9, %s8093_s0 }
0x1404   : > { %4433 = vrot.lane.b32.xlu0 %v7614_v42, %s5592_s27 }
0x1405   : > { %4475 = vrot.lane.b32.xlu1 %v7608_v40, %s5594_s29 }
0x1408   : > { %4469 = vrot.lane.b32.xlu0 %v7566_v43, %s5594_s29 }
0x1409   : > { %4383 = vrot.lane.b32.xlu1 %v7632_v37, %s5593_s28 }
0x140c   : > { %4473 = vrot.lane.b32.xlu0 %v7606_v27, %s5594_s29 }
0x140d   : > { %4511 = vrot.lane.b32.xlu1 %v7560_v41, %s5595_s30 }
0x1410   : > { %4477 = vrot.lane.b32.xlu0 %v7614_v42, %s5594_s29 }
0x1411   : > { %4515 = vrot.lane.b32.xlu1 %v7584_v17, %s5595_s30 }
0x1414   : > { %4509 = vrot.lane.b32.xlu0 %v7558_v34, %s5595_s30 }
0x1415   : > { %4519 = vrot.lane.b32.xlu1 %v7608_v40, %s5595_s30 }
0x1418   : > { %4513 = vrot.lane.b32.xlu0 %v7566_v43, %s5595_s30 }
0x1419   : > { %4435 = vrot.lane.b32.xlu1 %v7632_v37, %s5592_s27 }
0x141c   : > { %4517 = vrot.lane.b32.xlu0 %v7606_v27, %s5595_s30 }
0x141d   : > { %4555 = vrot.lane.b32.xlu1 %v7560_v41, %s5596_s10 }
0x1420   : > { %4521 = vrot.lane.b32.xlu0 %v7614_v42, %s5595_s30 }
0x1421   : > { %4479 = vrot.lane.b32.xlu1 %v7632_v37, %s5594_s29 }
0x1424   : > { %4553 = vrot.lane.b32.xlu0 %v7558_v34, %s5596_s10 }
0x1425   : > { %4559 = vrot.lane.b32.xlu1 %v7584_v17, %s5596_s10 }
0x1426   : > { %v4258_v16 = vpop.permute.xlu0 %4257 }
0x1427   : > { %v4424_v26 = vpop.permute.xlu1 %4423 }
0x1428   : > { %4557 = vrot.lane.b32.xlu0 %v7566_v43, %s5596_s10 }
0x1429   : > { %4523 = vrot.lane.b32.xlu1 %v7632_v37, %s5595_s30 }
0x142a   : > { %v4302_v15 = vpop.permute.xlu0 %4301 }
0x142b   : > { %v4260_v22 = vpop.permute.xlu1 %4259 }
0x142c   : > { %4561 = vrot.lane.b32.xlu0 %v7606_v27, %s5596_s10 }
0x142d   : > { %4563 = vrot.lane.b32.xlu1 %v7608_v40, %s5596_s10 }
0x142e   : > { %v7708_v36 = vpop.permute.xlu0 %4345 }
0x142f   : > { %v4304_v28 = vpop.permute.xlu1 %4303 }
0x1430   : > { %4565 = vrot.lane.b32.xlu0 %v7614_v42, %s5596_s10 }
0x1431   : > { %4567 = vrot.lane.b32.xlu1 %v7632_v37, %s5596_s10 }
0x1432   : > { %v7714_v38 = vpop.permute.xlu0 %4389 }
0x1433   : > { %v7716_v49 = vpop.permute.xlu1 %4347 }
0x1434   : > { %4598 = vperm.xlu0 %5466, %v5561_v13  }
0x1435   : > { %4754 = vperm.xlu1 %5467, %v5536_v14  }
0x1436   : > { %v4422_v31 = vpop.permute.xlu0 %4421 }
0x1437   : > { %v7719_v63 = vsel %vm538_vm2, %v4422_v31, %v4424_v26  ;;  %v7722_v21 = vsel %vm538_vm2, %v4424_v26, %v4422_v31  ;;  %v7724_v10 = vpop.permute.xlu1 %4391 }
0x1438   : > { %5468 = vset.pattern.permute.xlu0 %v8077_v18 }
0x143a   : > { %v4242_v61 = vpop.permute.xlu0 %4241 }
0x143b   : > { %v4265_v39 = vsel %vm459_vm6, %v4258_v16, %v4242_v61  ;;  %v4277_v8 = vsel %vm459_vm6, %v4242_v61, %v4258_v16  ;;  %v4244_v9 = vpop.permute.xlu1 %4243 }
0x143c   : > { %v4281_v62 = vmul.f32 %v4277_v8, %v5764_v44  ;;  %v4282_v33 = vmul.f32 %v4265_v39, %v5766_v45  ;;  %v4266_v7 = vsel %vm459_vm6, %v4260_v22, %v4244_v9  ;;  %v4278_v35 = vsel %vm459_vm6, %v4244_v9, %v4260_v22  ;;  %v8081_v39 = vld [vmem:[#allocation8_spill] sm:$0xff] }
0x143d   : > { %v4283_v0 = vmul.f32 %v4278_v35, %v5764_v44  ;;  %v4284_v3 = vmul.f32 %v4266_v7, %v5766_v45 }
0x143e   : > { %v4290_v6 = vpop.permute.xlu0 %4289 }
0x143f   : > { %v5315_v18 = vpack.c.bf16 %v4283_v0, %v4281_v62  ;;  %v4292_v24 = vpop.permute.xlu1 %4291  ;;  %v5313_v23 = vpack.c.bf16 %v4284_v3, %v4282_v33  ;;  %v8082_v33 = vld [vmem:[#allocation7_spill] sm:$0xff] }
0x1441   : > { %5314 = vmatprep.subr.bf16.mxu0 %v5313_v23  ;;  %v4310_v23 = vsel %vm479_vm3, %v4304_v28, %v4292_v24 }
0x1442   : > { %v4334_v55 = vpop.permute.xlu0 %4333  ;;  %5316 = vmatpush1.bf16.msra.mxu0 %v5315_v18  ;;  %v4309_v18 = vsel %vm479_vm3, %v4302_v15, %v4290_v6  ;;  %v4328_v20 = vmul.f32 %v4310_v23, %v5770_v47 }
0x1443   : > { %v4336_v30 = vpop.permute.xlu1 %4335  ;;  %v4326_v12 = vmul.f32 %v4309_v18, %v5770_v47  ;;  %v4353_v18 = vsel %vm499_vm5, %v7708_v36, %v4334_v55 }
0x1446   : > { %v7735_v4 = vpop.permute.xlu0 %4377 }
0x1447   : > { %v4409_v32 = vsel %vm519_vm8, %v7735_v4, %v7714_v38  ;;  %v7740_v13 = vpop.permute.xlu1 %4379 }
0x1448   : > { %v7743_v58 = vmul.f32 %v4409_v32, %v5776_v51  ;;  %v4410_v11 = vsel %vm519_vm8, %v7740_v13, %v7724_v10 }
0x1449   : > { %v7749_v60 = vmul.f32 %v4410_v11, %v5776_v51  ;;  %v4321_v11 = vsel %vm479_vm3, %v4290_v6, %v4302_v15 }
0x144a   : > { %v7751_v16 = vpop.permute.xlu0 %4425  ;;  %v4325_v6 = vmul.f32 %v4321_v11, %v5768_v46 }
0x144b   : > { %v7755_v22 = vpop.permute.xlu1 %4427 }
0x144e   : > { %v4262_v14 = vpop.permute.xlu0 %4261 }
0x144f   : > { %v7757_v31 = vpop.permute.xlu1 %4431 }
0x1452   : > { %v4306_v61 = vpop.permute.xlu0 %4305 }
0x1453   : > { %2606 = vadd.xlane.f32.xlu0 %v8081_v39  ;;  %v4264_v8 = vpop.permute.xlu1 %4263 }
0x1456   : > { %v7760_v9 = vpop.permute.xlu0 %4349 }
0x1457   : > { %3708 = vadd.xlane.f32.xlu0 %v7397_v29  ;;  %v4308_v62 = vpop.permute.xlu1 %4307  ;;  %v4322_v29 = vsel %vm479_vm3, %v4292_v24, %v4304_v28 }
0x1458   : > { %v4327_v24 = vmul.f32 %v4322_v29, %v5768_v46 }
0x1459   : > { %1504 = vadd.xlane.f32.xlu1 %v8082_v33 }
0x145a   : > { %v7764_v7 = vpop.permute.xlu0 %4393 }
0x145b   : > { %v7766_v35 = vpop.permute.xlu1 %4351 }
0x145e   : > { %v7768_v0 = vpop.permute.xlu0 %4429 }
0x145f   : > { %v7770_v3 = vpop.permute.xlu1 %4395 }
0x1462   : > { %v4246_v32 = vpop.permute.xlu0 %4245 }
0x1463   : > { %v4267_v39 = vsel %vm459_vm6, %v4262_v14, %v4246_v32  ;;  %v4279_v33 = vsel %vm459_vm6, %v4246_v32, %v4262_v14  ;;  %v4248_v26 = vpop.permute.xlu1 %4247 }
0x1464   : > { %v4285_v19 = vmul.f32 %v4279_v33, %v5764_v44  ;;  %v4286_v25 = vmul.f32 %v4267_v39, %v5766_v45  ;;  %v4268_v5 = vsel %vm459_vm6, %v4264_v8, %v4248_v26  ;;  %v4280_v1 = vsel %vm459_vm6, %v4248_v26, %v4264_v8 }
0x1465   : > { %v4287_v15 = vmul.f32 %v4280_v1, %v5764_v44  ;;  %v4288_v28 = vmul.f32 %v4268_v5, %v5766_v45  ;;  %v5321_v26 = vpack.c.bf16 %v4328_v20, %v4326_v12  ;;  %v5323_v8 = vpack.c.bf16 %v4327_v24, %v4325_v6 }
0x1466   : > { %v7788_v14 = vpop.permute.xlu0 %4465  ;;  %v4354_v44 = vsel %vm499_vm5, %v7716_v49, %v4336_v30  ;;  %v4365_v5 = vsel %vm499_vm5, %v4334_v55, %v7708_v36 }
0x1467   : > { %v5319_v32 = vpack.c.bf16 %v4287_v15, %v4285_v19  ;;  %v7790_v39 = vpop.permute.xlu1 %4467  ;;  %v5317_v33 = vpack.c.bf16 %v4288_v28, %v4286_v25  ;;  %v4366_v19 = vsel %vm499_vm5, %v4336_v30, %v7716_v49  ;;  %v4370_v15 = vmul.f32 %v4353_v18, %v5774_v50 }
0x1468   : > { %v4372_v36 = vmul.f32 %v4354_v44, %v5774_v50  ;;  %v4371_v28 = vmul.f32 %v4366_v19, %v5772_v48 }
0x1469   : > { %5318 = vmatprep.subr.bf16.mxu0 %v5317_v33 }
0x146a   : > { %v4294_v45 = vpop.permute.xlu0 %4293  ;;  %5320 = vmatpush1.bf16.msra.mxu0 %v5319_v32 }
0x146b   : > { %v4311_v1 = vsel %vm479_vm3, %v4306_v61, %v4294_v45  ;;  %v4323_v25 = vsel %vm479_vm3, %v4294_v45, %v4306_v61  ;;  %5322 = vmatprep.subr.bf16.mxu0 %v5321_v26  ;;  %v4296_v20 = vpop.permute.xlu1 %4295  ;;  %v4369_v61 = vmul.f32 %v4365_v5, %v5772_v48 }
0x146c   : > { %v4329_v12 = vmul.f32 %v4323_v25, %v5768_v46  ;;  %v4330_v23 = vmul.f32 %v4311_v1, %v5770_v47  ;;  %v4312_v11 = vsel %vm479_vm3, %v4308_v62, %v4296_v20  ;;  %v4324_v29 = vsel %vm479_vm3, %v4296_v20, %v4308_v62 }
0x146d   : > { %v4331_v49 = vmul.f32 %v4324_v29, %v5768_v46  ;;  %v4332_v55 = vmul.f32 %v4312_v11, %v5770_v47  ;;  %v4397_v62 = vsel %vm519_vm8, %v7714_v38, %v7735_v4  ;;  %v4398_v46 = vsel %vm519_vm8, %v7724_v10, %v7740_v13 }
0x146e   : > { %v4338_v30 = vpop.permute.xlu0 %4337  ;;  %5324 = vmatpush1.bf16.msra.mxu0 %v5323_v8  ;;  %v5329_v47 = vpack.c.bf16 %v4372_v36, %v4370_v15  ;;  %v5331_v18 = vpack.c.bf16 %v4371_v28, %v4369_v61  ;;  %v4414_v45 = vmul.f32 %v4397_v62, %v5778_v52  ;;  %v4416_v38 = vmul.f32 %v4398_v46, %v5778_v52 }
0x146f   : > { %v5327_v6 = vpack.c.bf16 %v4331_v49, %v4329_v12  ;;  %v7812_v24 = vpop.permute.xlu1 %4471  ;;  %v5325_v32 = vpack.c.bf16 %v4332_v55, %v4330_v23  ;;  %v4355_v33 = vsel %vm499_vm5, %v7760_v9, %v4338_v30  ;;  %v4367_v26 = vsel %vm499_vm5, %v4338_v30, %v7760_v9 }
0x1470   : > { %v4373_v13 = vmul.f32 %v4367_v26, %v5772_v48  ;;  %v4374_v5 = vmul.f32 %v4355_v33, %v5774_v50  ;;  %v5337_v23 = vpack.c.bf16 %v4416_v38, %v4414_v45  ;;  %v4454_v62 = vsel %vm538_vm2, %v7755_v22, %v7751_v16 }
0x1471   : > { %5326 = vmatprep.subr.bf16.mxu0 %v5325_v32  ;;  %v4460_v46 = vmul.f32 %v4454_v62, %v5782_v54 }
0x1472   : > { %v4382_v8 = vpop.permute.xlu0 %4381  ;;  %5328 = vmatpush1.bf16.msra.mxu0 %v5327_v6 }
0x1473   : > { %5330 = vmatprep.subr.bf16.mxu0 %v5329_v47  ;;  %v4340_v44 = vpop.permute.xlu1 %4339  ;;  %v4399_v11 = vsel %vm519_vm8, %v7764_v7, %v4382_v8  ;;  %v4458_v47 = vmul.f32 %v7722_v21, %v5782_v54 }
0x1474   : > { %v4356_v10 = vsel %vm499_vm5, %v7766_v35, %v4340_v44  ;;  %v4368_v4 = vsel %vm499_vm5, %v4340_v44, %v7766_v35  ;;  %v4411_v35 = vsel %vm519_vm8, %v4382_v8, %v7764_v7  ;;  %v4418_v49 = vmul.f32 %v4399_v11, %v5778_v52 }
0x1475   : > { %v4375_v9 = vmul.f32 %v4368_v4, %v5772_v48  ;;  %v4376_v19 = vmul.f32 %v4356_v10, %v5774_v50  ;;  %v4417_v36 = vmul.f32 %v4411_v35, %v5776_v51  ;;  %v8083_v7 = vpack.c.bf16 %v7749_v60, %v7743_v58 }
0x1476   : > { %v4434_v1 = vpop.permute.xlu0 %4433  ;;  %5332 = vmatpush1.bf16.msra.mxu0 %v5331_v18  ;;  %v4438_v58 = vsel %vm538_vm2, %v7751_v16, %v7755_v22  ;;  %v5347_v60 = vpack.c.bf16 %v7566_v43, %v7558_v34  ;;  %v4439_v16 = vsel %vm538_vm2, %v7768_v0, %v7757_v31  ;;  %v5351_v34 = vpack.c.bf16 %v7614_v42, %v7606_v27 }
0x1477   : > { %v5335_v25 = vpack.c.bf16 %v4375_v9, %v4373_v13  ;;  %v7834_v20 = vpop.permute.xlu1 %4475  ;;  %v5333_v12 = vpack.c.bf16 %v4376_v19, %v4374_v5  ;;  %v4459_v33 = vmul.f32 %v4438_v58, %v5780_v53  ;;  %v4457_v43 = vmul.f32 %v7719_v63, %v5780_v53 }
0x1478   : > { %v4461_v18 = vmul.f32 %v4439_v16, %v5780_v53  ;;  %v4497_v27 = vsel %vm558_vm4, %v7790_v39, %v7788_v14  ;;  %v4481_v4 = vsel %vm558_vm4, %v7788_v14, %v7790_v39 }
0x1479   : > { %5334 = vmatprep.subr.bf16.mxu0 %v5333_v12  ;;  %v5355_v8 = vpack.c.bf16 %v4459_v33, %v4457_v43 }
0x147a   : > { %v4470_v29 = vpop.permute.xlu0 %4469  ;;  %5336 = vmatpush1.bf16.msra.mxu0 %v5335_v25 }
0x147b   : > { %5338 = vmatprep.subr.bf16.mxu0 %v5337_v23  ;;  %v4384_v48 = vpop.permute.xlu1 %4383  ;;  %v4498_v21 = vsel %vm558_vm4, %v7812_v24, %v4470_v29  ;;  %v4482_v42 = vsel %vm558_vm4, %v4470_v29, %v7812_v24  ;;  %v4502_v24 = vmul.f32 %v4497_v27, %v5786_v57 }
0x147c   : > { %v4400_v50 = vsel %vm519_vm8, %v7770_v3, %v4384_v48  ;;  %v4412_v15 = vsel %vm519_vm8, %v4384_v48, %v7770_v3  ;;  %v5345_v3 = vpack.c.bf16 %v7584_v17, %v7560_v41  ;;  %v5349_v41 = vpack.c.bf16 %v7632_v37, %v7608_v40 }
0x147d   : > { %v4419_v55 = vmul.f32 %v4412_v15, %v5776_v51  ;;  %v4420_v30 = vmul.f32 %v4400_v50, %v5778_v52  ;;  %v5353_v40 = vpack.c.bf16 %v4460_v46, %v4458_v47  ;;  %v4455_v37 = vsel %vm538_vm2, %v7757_v31, %v7768_v0 }
0x147e   : > { %v4474_v61 = vpop.permute.xlu0 %4473  ;;  %5340 = vmatpush1.bf16.msra.mxu0 %v8083_v7  ;;  %v4462_v0 = vmul.f32 %v4455_v37, %v5782_v54  ;;  %v4504_v45 = vmul.f32 %v4498_v21, %v5786_v57  ;;  %v4503_v5 = vmul.f32 %v4482_v42, %v5784_v56  ;;  %v8085_v42 = vld [vmem:[#allocation10_spill] sm:$0xff] }
0x147f   : > { %v5343_v28 = vpack.c.bf16 %v4419_v55, %v4417_v36  ;;  %v7851_v6 = vpop.permute.xlu1 %4511  ;;  %v5341_v32 = vpack.c.bf16 %v4420_v30, %v4418_v49  ;;  %v4483_v25 = vsel %vm558_vm4, %v4474_v61, %v7834_v20  ;;  %v4499_v12 = vsel %vm558_vm4, %v7834_v20, %v4474_v61 }
0x1480   : > { %v4505_v11 = vmul.f32 %v4483_v25, %v5784_v56  ;;  %v4506_v20 = vmul.f32 %v4499_v12, %v5786_v57  ;;  %v8087_v25 = vmov 0.0   ;;  %v5045_v12 = vld [vmem:[%s7977_s5 + $0x2c] sm:$0xf] }
0x1481   : > { %5342 = vmatprep.subr.bf16.mxu0 %v5341_v32 }
0x1482   : > { %v4478_v51 = vpop.permute.xlu0 %4477  ;;  %5344 = vmatpush1.bf16.msra.mxu0 %v5343_v28 }
0x1483   : > { %5346 = vmatprep.subr.bf16.mxu0 %v5345_v3  ;;  %v4516_v52 = vpop.permute.xlu1 %4515 }
0x1486   : > { %v4510_v17 = vpop.permute.xlu0 %4509  ;;  %5348 = vmatpush1.bf16.msra.mxu0 %v5347_v60 }
0x1487   : > { %5350 = vmatprep.subr.bf16.mxu0 %v5349_v41  ;;  %v4520_v26 = vpop.permute.xlu1 %4519  ;;  %v4541_v29 = vsel %vm578_vm9, %v7851_v6, %v4510_v17  ;;  %v4525_v30 = vsel %vm578_vm9, %v4510_v17, %v7851_v6 }
0x1488   : > { %v4546_v7 = vmul.f32 %v4541_v29, %v5794_v2 }
0x148a   : > { %v4514_v22 = vpop.permute.xlu0 %4513  ;;  %5352 = vmatpush1.bf16.msra.mxu0 %v5351_v34  ;;  %v8084_v34 = vld [vmem:[#allocation6_spill] sm:$0xff] }
0x148b   : > { %5354 = vmatprep.subr.bf16.mxu0 %v5353_v40  ;;  %v4436_v44 = vpop.permute.xlu1 %4435  ;;  %v4542_v14 = vsel %vm578_vm9, %v4516_v52, %v4514_v22  ;;  %v4526_v48 = vsel %vm578_vm9, %v4514_v22, %v4516_v52  ;;  %v4545_v52 = vmul.f32 %v4525_v30, %v5789_v59 }
0x148c   : > { %v4440_v63 = vsel %vm538_vm2, %v4434_v1, %v4436_v44  ;;  %v4456_v31 = vsel %vm538_vm2, %v4436_v44, %v4434_v1  ;;  %v4548_v36 = vmul.f32 %v4542_v14, %v5794_v2  ;;  %v4547_v28 = vmul.f32 %v4526_v48, %v5789_v59 }
0x148d   : > { %v4463_v38 = vmul.f32 %v4440_v63, %v5780_v53  ;;  %v4464_v10 = vmul.f32 %v4456_v31, %v5782_v54  ;;  %v4501_v53 = vmul.f32 %v4481_v4, %v5784_v56  ;;  %v5361_v54 = vpack.c.bf16 %v4504_v45, %v4502_v24 }
0x148e   : > { %v4518_v13 = vpop.permute.xlu0 %4517  ;;  %5356 = vmatpush1.bf16.msra.mxu0 %v5355_v8  ;;  %v5371_v6 = vpack.c.bf16 %v4547_v28, %v4545_v52 }
0x148f   : > { %v5359_v9 = vpack.c.bf16 %v4463_v38, %v4461_v18  ;;  %v4556_v19 = vpop.permute.xlu1 %4555  ;;  %v5357_v1 = vpack.c.bf16 %v4464_v10, %v4462_v0  ;;  %v5363_v23 = vpack.c.bf16 %v4503_v5, %v4501_v53 }
0x1491   : > { %5358 = vmatprep.subr.bf16.mxu0 %v5357_v1  ;;  %v8086_v1 = vld [vmem:[#allocation11_spill] sm:$0xff] }
0x1492   : > { %v4522_v39 = vpop.permute.xlu0 %4521  ;;  %5360 = vmatpush1.bf16.msra.mxu0 %v5359_v9 }
0x1493   : > { %5362 = vmatprep.subr.bf16.mxu0 %v5361_v54  ;;  %v4480_v35 = vpop.permute.xlu1 %4479 }
0x1494   : > { %v4484_v50 = vsel %vm558_vm4, %v4478_v51, %v4480_v35  ;;  %v4500_v15 = vsel %vm558_vm4, %v4480_v35, %v4478_v51  ;;  %v4527_v51 = vsel %vm578_vm9, %v4518_v13, %v4520_v26 }
0x1495   : > { %v4507_v49 = vmul.f32 %v4484_v50, %v5784_v56  ;;  %v4508_v55 = vmul.f32 %v4500_v15, %v5786_v57  ;;  %v4543_v56 = vsel %vm578_vm9, %v4520_v26, %v4518_v13  ;;  %v5369_v57 = vpack.c.bf16 %v4548_v36, %v4546_v7 }
0x1496   : > { %v4554_v61 = vpop.permute.xlu0 %4553  ;;  %5364 = vmatpush1.bf16.msra.mxu0 %v5363_v23  ;;  %v4549_v60 = vmul.f32 %v4527_v51, %v5789_v59  ;;  %v4550_v17 = vmul.f32 %v4543_v56, %v5794_v2 }
0x1497   : > { %v5367_v32 = vpack.c.bf16 %v4507_v49, %v4505_v11  ;;  %v4560_v3 = vpop.permute.xlu1 %4559  ;;  %v5365_v62 = vpack.c.bf16 %v4508_v55, %v4506_v20  ;;  %v4585_v47 = vsel %vm598_vm11, %v4556_v19, %v4554_v61  ;;  %v4569_v22 = vsel %vm598_vm11, %v4554_v61, %v4556_v19 }
0x1498   : > { %v4590_v8 = vmul.f32 %v8084_v34, %v4585_v47  ;;  %v4589_v0 = vmul.f32 %v8085_v42, %v4569_v22 }
0x1499   : > { %5366 = vmatprep.subr.bf16.mxu0 %v5365_v62 }
0x149a   : > { %v4558_v58 = vpop.permute.xlu0 %4557  ;;  %5368 = vmatpush1.bf16.msra.mxu0 %v5367_v32 }
0x149b   : > { %v4586_v46 = vsel %vm598_vm11, %v4560_v3, %v4558_v58  ;;  %5370 = vmatprep.subr.bf16.mxu0 %v5369_v57  ;;  %v4524_v41 = vpop.permute.xlu1 %4523  ;;  %v4570_v26 = vsel %vm598_vm11, %v4558_v58, %v4560_v3 }
0x149c   : > { %v4528_v33 = vsel %vm578_vm9, %v4522_v39, %v4524_v41  ;;  %v4544_v16 = vsel %vm578_vm9, %v4524_v41, %v4522_v39  ;;  %v4592_v43 = vmul.f32 %v8084_v34, %v4586_v46  ;;  %v4591_v63 = vmul.f32 %v8085_v42, %v4570_v26 }
0x149d   : > { %v4551_v40 = vmul.f32 %v4528_v33, %v5789_v59  ;;  %v4552_v37 = vmul.f32 %v4544_v16, %v5794_v2 }
0x149e   : > { %v4562_v21 = vpop.permute.xlu0 %4561  ;;  %5372 = vmatpush1.bf16.msra.mxu0 %v5371_v6  ;;  %v5377_v31 = vpack.c.bf16 %v4592_v43, %v4590_v8  ;;  %v5379_v10 = vpack.c.bf16 %v4591_v63, %v4589_v0 }
0x149f   : > { %v5375_v18 = vpack.c.bf16 %v4551_v40, %v4549_v60  ;;  %v4564_v44 = vpop.permute.xlu1 %4563  ;;  %v5373_v27 = vpack.c.bf16 %v4552_v37, %v4550_v17  ;;  %v8089_v37 = vld [vmem:[#allocation5_spill] sm:$0xff] }
0x14a0   : > { %v4571_v45 = vsel %vm598_vm11, %v4562_v21, %v4564_v44  ;;  %v4587_v59 = vsel %vm598_vm11, %v4564_v44, %v4562_v21 }
0x14a1   : > { %5374 = vmatprep.subr.bf16.mxu0 %v5373_v27  ;;  %v4593_v24 = vmul.f32 %v8085_v42, %v4571_v45  ;;  %v4594_v5 = vmul.f32 %v8084_v34, %v4587_v59 }
0x14a2   : > { %v4566_v2 = vpop.permute.xlu0 %4565  ;;  %5376 = vmatpush1.bf16.msra.mxu0 %v5375_v18 }
0x14a3   : > { %5378 = vmatprep.subr.bf16.mxu0 %v5377_v31  ;;  %v4568_v38 = vpop.permute.xlu1 %4567 }
0x14a4   : > { %v4572_v4 = vsel %vm598_vm11, %v4566_v2, %v4568_v38  ;;  %v4588_v13 = vsel %vm598_vm11, %v4568_v38, %v4566_v2 }
0x14a5   : > { %v4595_v9 = vmul.f32 %v8085_v42, %v4572_v4  ;;  %v4596_v19 = vmul.f32 %v8084_v34, %v4588_v13  ;;  %4672 = vmatmul.mubr.f32.vlgmr.msra.gmra.mrb[38].mxu0 %v8086_v1  ;;  %v8088_v34 = vld [vmem:[#allocation9_spill] sm:$0xff] }
0x14a6   : > { %5380 = vmatpush1.bf16.msra.mxu0 %v5379_v10  ;;  %4742 = vmatprep.mubr.f32.mxu0 %v8087_v25 }
0x14a7   : > { %v5383_v53 = vpack.c.bf16 %v4595_v9, %v4593_v24  ;;  %v5381_v54 = vpack.c.bf16 %v4596_v19, %v4594_v5 }
0x14a9   : > { %5382 = vmatprep.subr.bf16.mxu0 %v5381_v54 }
0x14aa   : > { %5384 = vmatpush1.bf16.msra.mxu0 %v5383_v53 }
0x14ad   : > { %5046 = vmatmul.mubr.msk.f32.vlgmr.msra.gmra.mrb[38].mxu0 %vm819_vm13, %v5045_v12 }
0x14b3   : > { %v4599_v14 = vpop.permute.xlu0 %4598 }
0x14b4   : > { %v4755_v23 = vpop.permute.xlu1 %4754 }
0x14e0   : > { %v2607_v39 = vpop.xlane.xlu0 %2606 }
0x14e1   : > { %v2608_v11 = vrot.slane %v2607_v39, 4 }
0x14e3   : > { %v2609_v35 = vadd.f32 %v2608_v11, %v2607_v39 }
0x14e4   : > { %v3709_v29 = vpop.xlane.xlu0 %3708 }
0x14e5   : > { %v3710_v48 = vrot.slane %v3709_v29, 4  ;;  %v2610_v50 = vrot.slane %v2609_v35, 2 }
0x14e6   : > { %v1505_v15 = vpop.xlane.xlu1 %1504 }
0x14e7   : > { %v3711_v20 = vadd.f32 %v3710_v48, %v3709_v29  ;;  %v1506_v36 = vrot.slane %v1505_v15, 4  ;;  %v2611_v30 = vadd.f32 %v2610_v50, %v2609_v35 }
0x14e9   : > { %v3712_v49 = vrot.slane %v3711_v20, 2  ;;  %v1507_v55 = vadd.f32 %v1506_v36, %v1505_v15  ;;  %v2612_v32 = vrot.slane %v2611_v30, 1 }
0x14eb   : > { %v1508_v61 = vrot.slane %v1507_v55, 2  ;;  %v3713_v7 = vadd.f32 %v3712_v49, %v3711_v20  ;;  %v2613_v52 = vadd.f32 %v2612_v32, %v2611_v30 }
0x14ed   : > { %v1509_v28 = vadd.f32 %v1508_v61, %v1507_v55  ;;  %v3714_v62 = vrot.slane %v3713_v7, 1 }
0x14ef   : > { %v1510_v3 = vrot.slane %v1509_v28, 1  ;;  %v3715_v56 = vadd.f32 %v3714_v62, %v3713_v7 }
0x14f1   : > { %v1511_v51 = vadd.f32 %v1510_v3, %v1509_v28 }
0x14f3   : > { %5401 = vpush %v1511_v51 }
0x14f4   : > { %5403 = vpush %v2613_v52 }
0x14f5   : > { %5405 = vpush %v3715_v56 }
0x1524   : > { %s5402_s21 = spop %5401 }
0x1525   : > { %s5404_s23 = spop %5403 }
0x1526   : > { %s5406_s12 = spop %5405 }
0x1580   : > { %v4744_v57 = vpop.f32.mrb[38].mxu0 }
0x1581   : > { %v5391_v58 = vadd.f32 %v4744_v57, %v4599_v14  ;;  %v4746_v6 = vpop.f32.mrb[39].mxu0 }
0x1582   : > { %v5392_v60 = vadd.f32 %v4746_v6, %v4599_v14 }
0x1583   : > { %v4757_v46 = vmul.f32 %v5391_v58, %v4755_v23 }
0x1584   : > { %v4758_v41 = vmul.f32 %v5392_v60, %v4755_v23 }
0x1585   : > { %v4759_v17 = vadd.f32 2.0, %v4757_v46  ;;  %v4789_v47 = vrot.slane %v4757_v46, 6 }
0x1586   : > { %v4760_v33 = vadd.f32 2.0, %v4758_v41  ;;  %v4790_v16 = vrot.slane %v4758_v41, 6 }
0x1587   : > { %v4761_v26 = vsub.f32 0.0, %v4759_v17  ;;  %v4793_v43 = vadd.f32 %v4789_v47, %v8088_v34 }
0x1588   : > { %v4762_v40 = vsub.f32 0.0, %v4760_v33  ;;  %v4794_v21 = vadd.f32 %v4790_v16, %v8089_v37 }
0x1589   : > { %v4763_v22 = vmax.f32 %v4761_v26, 0.0 }
0x158a   : > { %v4764_v8 = vmax.f32 %v4762_v40, 0.0 }
0x158b   : > { %v4765_v18 = vsub.f32 0.0, %v4763_v22  ;;  %v4771_v44 = vsub.f32 %v4761_v26, %v4763_v22 }
0x158c   : > { %v4766_v27 = vsub.f32 0.0, %v4764_v8  ;;  %v4772_v42 = vsub.f32 %v4762_v40, %v4764_v8  ;;  %v446_v40 = vstv %s445_s17 }
0x158d   : > { %v4767_v63 = vmul.f32 1.442695, %v4765_v18  ;;  %v4773_v31 = vmul.f32 1.442695, %v4771_v44  ;;  %v2615_v18 = vstv %s5404_s23 }
0x158e   : > { %v4769_v0 = vmul.f32 1.442695, %v4766_v27  ;;  %v4775_v45 = vmul.f32 1.442695, %v4772_v42  ;;  %v2723_v27 = vstv %s4995_s22 }
0x158f   : > { %5537 = vpow2.f32 %v4767_v63  ;;  %v3717_v63 = vstv %s5406_s12 }
0x1590   : > { %5539 = vpow2.f32 %v4773_v31 }
0x1591   : > { %5541 = vpow2.f32 %v4769_v0  ;;  %v3825_v0 = vstv %s5025_s11 }
0x1592   : > { %5543 = vpow2.f32 %v4775_v45 }
0x1599   : > { %v5538_v59 = vpop.eup %5537 }
0x159a   : > { %v5540_v2 = vpop.eup %5539 }
0x159b   : > { %v5542_v38 = vpop.eup %5541  ;;  %v4777_v10 = vadd.f32 %v5540_v2, %v5538_v59 }
0x159c   : > { %v5544_v4 = vpop.eup %5543 }
0x159d   : > { %5545 = vlog2.f32 %v4777_v10  ;;  %v4778_v13 = vadd.f32 %v5544_v4, %v5542_v38 }
0x159f   : > { %5547 = vlog2.f32 %v4778_v13 }
0x15a7   : > { %v5546_v24 = vpop.eup %5545 }
0x15a8   : > { %v4780_v5 = vmul.f32 0.6931472, %v5546_v24 }
0x15a9   : > { %v5548_v9 = vpop.eup %5547 }
0x15aa   : > { %v4783_v19 = vadd.f32 %v4780_v5, %v4763_v22  ;;  %v4782_v1 = vmul.f32 0.6931472, %v5548_v9  ;;  %v1621_v22 = vstv %s4965_s18 }
0x15ac   : > { %v4785_v25 = vsub.f32 0.0, %v4783_v19  ;;  %v4784_v53 = vadd.f32 %v4782_v1, %v4764_v8 }
0x15ae   : > { %v4795_v54 = vmul.f32 1.442695, %v4785_v25  ;;  %v4786_v12 = vsub.f32 0.0, %v4784_v53  ;;  %v4803_v14 = vrot.slane %v4785_v25, 2 }
0x15b0   : > { %5549 = vpow2.f32 %v4795_v54  ;;  %v4797_v39 = vmul.f32 1.442695, %v4786_v12  ;;  %v4804_v23 = vrot.slane %v4786_v12, 2  ;;  %v4807_v11 = vsel %vm650_vm7, %v4803_v14, 0.0 }
0x15b2   : > { %5551 = vpow2.f32 %v4797_v39  ;;  %v4808_v35 = vsel %vm650_vm7, %v4804_v23, 0.0 }
0x15b3   : > { %v4809_v29 = vadd.f32 %v4808_v35, %v4807_v11 }
0x15b5   : > { %4810 = vadd.xlane.f32.xlu1 %v4809_v29 }
0x15ba   : > { %v5550_v48 = vpop.eup %5549 }
0x15bb   : > { %v4799_v50 = vmul.f32 %v5550_v48, %v4793_v43 }
0x15bc   : > { %v5552_v15 = vpop.eup %5551 }
0x15bd   : > { %v4800_v20 = vmul.f32 %v5552_v15, %v4794_v21  ;;  %v4821_v36 = vsel %vm650_vm7, %v8088_v34, %v4799_v50 }
0x15be   : > { %v4828_v49 = vmul.f32 %v4821_v36, %v4821_v36 }
0x15bf   : > { %v4822_v55 = vsel %vm650_vm7, %v8089_v37, %v4800_v20  ;;  %v1513_v37 = vstv %s5402_s21 }
0x15c0   : > { %v4829_v30 = vmul.f32 %v4822_v55, %v4822_v55  ;;  %v4830_v61 = vadd.f32 1.837877, %v4828_v49  ;;  %v4825_v7 = vcombine.low %v4821_v36, %v4822_v55  ;;  %v1514_v21 = vadd.f32 %v1513_v37, %v446_v40 }
0x15c2   : > { %v4831_v28 = vadd.f32 1.837877, %v4829_v30  ;;  %v4832_v32 = vmul.f32 -0.5, %v4830_v61  ;;  %4827 = vst [vmem:[%s320_s20] sm:$0xff] %v4825_v7  ;;  %v1622_v8 = vadd.f32 %v1621_v22, %v1514_v21 }
0x15c4   : > { %v4833_v3 = vmul.f32 -0.5, %v4831_v28  ;;  %v4834_v62 = vsel %vm369_vm0, %v4832_v32, 0.0  ;;  %v2616_v44 = vadd.f32 %v2615_v18, %v1622_v8 }
0x15c6   : > { %v4835_v51 = vsel %vm369_vm0, %v4833_v3, 0.0  ;;  %v2724_v42 = vadd.f32 %v2723_v27, %v2616_v44 }
0x15c7   : > { %v4836_v52 = vadd.f32 %v4835_v51, %v4834_v62 }
0x15c8   : > { %v3718_v31 = vadd.f32 %v3717_v63, %v2724_v42 }
0x15c9   : > { %4837 = vadd.xlane.f32.xlu0 %v4836_v52 }
0x15ca   : > { %v3826_v59 = vadd.f32 %v3825_v0, %v3718_v31 }
0x1642   : > { %v4811_v56 = vpop.xlane.xlu1 %4810 }
0x1643   : > { %v4812_v57 = vrot.slane %v4811_v56, 4 }
0x1645   : > { %v4813_v58 = vadd.f32 %v4812_v57, %v4811_v56 }
0x1647   : > { %v4814_v6 = vrot.slane %v4813_v58, 2 }
0x1649   : > { %v4815_v60 = vadd.f32 %v4814_v6, %v4813_v58 }
0x164b   : > { %v4816_v46 = vrot.slane %v4815_v60, 1 }
0x164d   : > { %v4817_v41 = vadd.f32 %v4816_v46, %v4815_v60 }
0x164f   : > { %5407 = vpush %v4817_v41 }
0x1656   : > { %v4838_v17 = vpop.xlane.xlu0 %4837 }
0x1657   : > { %v4839_v47 = vrot.slane %v4838_v17, 4 }
0x1659   : > { %v4840_v33 = vadd.f32 %v4839_v47, %v4838_v17 }
0x165b   : > { %v4841_v16 = vrot.slane %v4840_v33, 2 }
0x165d   : > { %v4842_v26 = vadd.f32 %v4841_v16, %v4840_v33 }
0x165f   : > { %v4843_v34 = vrot.slane %v4842_v26, 1 }
0x1661   : > { %v4844_v43 = vadd.f32 %v4843_v34, %v4842_v26 }
0x1663   : > { %5409 = vpush %v4844_v43 }
0x1680   : > { %s5408_s13 = spop %5407 }
0x1681   : > { %v4819_v45 = vstv %s5408_s13 }
0x1682   : > { %v4820_v2 = vadd.f32 %v4819_v45, %v3826_v59 }
0x1694   : > { %s5410_s15 = spop %5409 }
0x1695   : > { %v4846_v38 = vstv %s5410_s15 }
0x1696   : > { %v4847_v10 = vadd.f32 %v4846_v38, %v4820_v2 }
0x1698   : > { %v4848_v4 = vsub.f32 0.0, %v4847_v10 }
0x169a   : > { %4850 = vst.msk [vmem:[%s324_s24] sm:$0x1] %vm4849_vm14, %v4848_v4 }
0x169b PF: > { %s26_s14 = sadd.s32 1, %s5582_s14  }
0x169c   : > { %p23_p10 = scmp.ge.s32.totalorder %s26_s14, 4  }
0x169e   :  { %25 = sbr.rel (!%p23_p10) target bundleno = 16 (0x10), region = 105 }

</bundles_post_ra>
